<compile_context>
chip_gen: v6e
topology: v6e:2x2x1
jax: 0.10.0
libtpu: 0.0.40
codegen_flags: <defaults>
</compile_context>

<pallas_src>
import math
from functools import lru_cache, partial

import jax
import jax.numpy as jnp
from jax.experimental import pallas as pl
from jax.experimental.pallas import tpu as pltpu

_BN_EPS = 1e-5
_VMEM_LIMIT = 32 * 1024 * 1024


# ----------------------------------------------------------------------------
# fused RCA kernel: 3x (Conv3x3 + folded-BN + PReLU) + squeeze-excite tail
# ----------------------------------------------------------------------------
def _rca_fused_kernel(x_ref, wk_ref, b_ref, a_ref, m_ref,
                      w1_ref, b1_ref, a1_ref, w2_ref, b2_ref, o_ref, *, W):
    """
    x_ref  : (1, C, HW)        one batch element, channel-major, lane-dense
    wk_ref : (L, KH, C, KW*C)  BN-scale-folded conv weights, wk[l,kh][co, kw*C+ci]
    b_ref  : (L, C, 1)         folded conv-bias + BatchNorm shift
    a_ref  : (L, C, 1)         PReLU slope per conv layer
    m_ref  : (KH*KW, 1, HW)    0/1 validity mask per tap (zero padding)
    w1_ref : (Cb, C)  b1_ref/a1_ref: (Cb, 1)  bottleneck Linear + PReLU (column form)
    w2_ref : (C, Cb)  b2_ref       : (C, 1)   unravel Linear (+ sigmoid)
    o_ref  : (1, C, HW)
    """
    C, HW = x_ref.shape[1], x_ref.shape[2]
    n_layers, KH = wk_ref.shape[0], wk_ref.shape[1]
    KW = wk_ref.shape[3] // C

    feat = x_ref[0]                                   # (C, HW), layer-0 input
    for li in range(n_layers):                        # static unroll (3 layers)
        # Doubled map: every spatial tap is a static lane window of f2; lanes
        # that wrapped around (or read across a row edge) are zeroed by the
        # precomputed masks, reproducing the conv's zero padding exactly.
        f2 = jnp.concatenate([feat, feat], axis=1)    # (C, 2*HW), aligned concat
        acc = jnp.zeros((C, HW), jnp.float32)
        for kh in range(KH):                          # static unroll
            taps = []
            for kw in range(KW):
                dm = (kh - KH // 2) * W + (kw - KW // 2)
                if dm == 0:
                    taps.append(feat)
                else:
                    start = dm if dm > 0 else HW + dm
                    tap = f2[:, start:start + HW]     # value at flat index m+dm
                    taps.append(tap * m_ref[kh * KW + kw])
            # stack the kw taps along sublanes -> one K = KW*C matmul per kh
            a_kh = jnp.concatenate(taps, axis=0)      # (KW*C, HW)
            acc = acc + jnp.dot(wk_ref[li, kh], a_kh,
                                preferred_element_type=jnp.float32)
        y = acc + b_ref[li]                           # folded conv bias + BN shift
        feat = jnp.where(y >= 0.0, y, a_ref[li] * y)  # PReLU

    # ---- squeeze-excite tail (column form: channels on sublanes) ------------
    pooled = jnp.sum(feat, axis=1, keepdims=True) * (1.0 / HW)        # (C, 1)
    h1 = jnp.dot(w1_ref[...], pooled,
                 preferred_element_type=jnp.float32) + b1_ref[...]
    h1 = jnp.where(h1 >= 0.0, h1, a1_ref[...] * h1)                   # PReLU (Cb,1)
    g = jnp.dot(w2_ref[...], h1,
                preferred_element_type=jnp.float32) + b2_ref[...]
    g = 1.0 / (1.0 + jnp.exp(-g))                                     # sigmoid (C,1)

    o_ref[0] = (feat * g + x_ref[0]).astype(o_ref.dtype)   # gate * proc(x) + x


@lru_cache(maxsize=None)
def _build_rca_call(B, C, H, W, Cb, KH, KW, L):
    HW = H * W
    kernel = partial(_rca_fused_kernel, W=W)
    return pl.pallas_call(
        kernel,
        out_shape=jax.ShapeDtypeStruct((B, C, HW), jnp.float32),
        grid_spec=pltpu.PrefetchScalarGridSpec(
            num_scalar_prefetch=0,
            grid=(B,),
            in_specs=[
                pl.BlockSpec((1, C, HW), lambda b: (b, 0, 0)),          # x
                pl.BlockSpec((L, KH, C, KW * C), lambda b: (0, 0, 0, 0)),  # wk
                pl.BlockSpec((L, C, 1), lambda b: (0, 0, 0)),           # bias
                pl.BlockSpec((L, C, 1), lambda b: (0, 0, 0)),           # alpha
                pl.BlockSpec((KH * KW, 1, HW), lambda b: (0, 0, 0)),    # masks
                pl.BlockSpec((Cb, C), lambda b: (0, 0)),                # w1t
                pl.BlockSpec((Cb, 1), lambda b: (0, 0)),                # b1
                pl.BlockSpec((Cb, 1), lambda b: (0, 0)),                # a1
                pl.BlockSpec((C, Cb), lambda b: (0, 0)),                # w2t
                pl.BlockSpec((C, 1), lambda b: (0, 0)),                 # b2
            ],
            out_specs=pl.BlockSpec((1, C, HW), lambda b: (b, 0, 0)),
        ),
        compiler_params=pltpu.CompilerParams(
            dimension_semantics=("parallel",),
            vmem_limit_bytes=_VMEM_LIMIT,
        ),
    )


# ----------------------------------------------------------------------------
# parameter packing for the kernel (BN fold, weight/tap packing, pad masks)
# ----------------------------------------------------------------------------
def pack_rca_params(params, H, W):
    conv_w = params["conv_w"]                         # (L, KH, KW, Ci, Co) HWIO
    conv_b = params["conv_b"]                         # (L, C)
    L, KH, KW, C, _ = conv_w.shape

    s = params["gamma"] / jnp.sqrt(params["var"] + _BN_EPS)           # (L, C)
    w_scaled = conv_w * s[:, None, None, None, :]     # fold BN scale into weights
    # (L, KH, KW, Ci, Co) -> (L, KH, Co, KW*Ci): row co, col kw*C + ci
    wk = jnp.transpose(w_scaled, (0, 1, 4, 2, 3)).reshape(L, KH, C, KW * C)
    bias = ((conv_b - params["mean"]) * s + params["beta"])[:, :, None]   # (L,C,1)
    alpha = params["prelu"][:, :, None]                                   # (L,C,1)

    HW = H * W
    m_idx = jnp.arange(HW)
    h_idx, w_idx = m_idx // W, m_idx % W
    masks = []
    for kh in range(KH):
        for kw in range(KW):
            dh, dw = kh - KH // 2, kw - KW // 2
            ok = ((h_idx + dh >= 0) & (h_idx + dh < H) &
                  (w_idx + dw >= 0) & (w_idx + dw < W))
            masks.append(ok.astype(jnp.float32)[None, :])
    mask = jnp.stack(masks, 0)                        # (KH*KW, 1, HW)

    return dict(
        wk=wk, bias=bias, alpha=alpha, mask=mask,
        w1t=params["w1"].T, b1=params["b1"][:, None], a1=params["a1"][:, None],
        w2t=params["w2"].T, b2=params["b2"][:, None],
    )


# ----------------------------------------------------------------------------
# public wrapper: NCHW in / NCHW out (mirrors PyTorch)
# ----------------------------------------------------------------------------
def rca_forward(packed, x_nchw):
    B, C, H, W = x_nchw.shape
    L, KH = packed["wk"].shape[0], packed["wk"].shape[1]
    KW = packed["wk"].shape[3] // C
    Cb = packed["w1t"].shape[0]
    x = x_nchw.reshape(B, C, H * W)                   # channel-major, lane-dense
    call = _build_rca_call(B, C, H, W, Cb, KH, KW, L)
    y = call(x, packed["wk"], packed["bias"], packed["alpha"], packed["mask"],
             packed["w1t"], packed["b1"], packed["a1"],
             packed["w2t"], packed["b2"])
    return y.reshape(B, C, H, W)


# ----------------------------------------------------------------------------
# deterministic synthetic parameters (shapes from RCA.__init__)
# ----------------------------------------------------------------------------
def init_rca_params(key, nf):
    C, Cb = nf, nf // 4
    L, KH, KW = 3, 3, 3
    keys = jax.random.split(key, 2 * L + 4)

    conv_w, conv_b = [], []
    for li in range(L):
        fan_in = C * KH * KW
        conv_w.append(jax.random.normal(keys[2 * li], (KH, KW, C, C),
                                        jnp.float32) / math.sqrt(fan_in))
        conv_b.append(0.01 * jax.random.normal(keys[2 * li + 1], (C,), jnp.float32))
    conv_w = jnp.stack(conv_w, 0)
    conv_b = jnp.stack(conv_b, 0)

    # eval-mode BatchNorm with fresh-init running stats
    gamma = jnp.ones((L, C), jnp.float32)
    beta = jnp.zeros((L, C), jnp.float32)
    mean = jnp.zeros((L, C), jnp.float32)
    var = jnp.ones((L, C), jnp.float32)
    # nn.PReLU() default: single shared slope 0.25 (broadcast per channel)
    prelu = jnp.full((L, C), 0.25, jnp.float32)

    k = 2 * L
    w1 = jax.random.normal(keys[k], (C, Cb), jnp.float32) / math.sqrt(C)
    b1 = 0.01 * jax.random.normal(keys[k + 1], (Cb,), jnp.float32)
    a1 = jnp.full((Cb,), 0.25, jnp.float32)
    w2 = jax.random.normal(keys[k + 2], (Cb, C), jnp.float32) / math.sqrt(Cb)
    b2 = 0.01 * jax.random.normal(keys[k + 3], (C,), jnp.float32)

    return dict(conv_w=conv_w, conv_b=conv_b, gamma=gamma, beta=beta, mean=mean,
                var=var, prelu=prelu, w1=w1, b1=b1, a1=a1, w2=w2, b2=b2)


# ----------------------------------------------------------------------------
# pure-JAX (XLA) reference for correctness checking
# ----------------------------------------------------------------------------
def rca_reference(params, x_nchw):
    hi = jax.lax.Precision.HIGHEST
    x = jnp.transpose(x_nchw, (0, 2, 3, 1))           # NHWC
    cur = x
    for li in range(params["conv_w"].shape[0]):
        y = jax.lax.conv_general_dilated(
            cur, params["conv_w"][li], window_strides=(1, 1),
            padding=((1, 1), (1, 1)),
            dimension_numbers=("NHWC", "HWIO", "NHWC"), precision=hi)
        y = y + params["conv_b"][li]
        s = params["gamma"][li] / jnp.sqrt(params["var"][li] + _BN_EPS)
        y = (y - params["mean"][li]) * s + params["beta"][li]
        y = jnp.where(y >= 0, y, params["prelu"][li] * y)
        cur = y
    pooled = jnp.mean(cur, axis=(1, 2))               # (B, C)
    h = jnp.dot(pooled, params["w1"], precision=hi) + params["b1"]
    h = jnp.where(h >= 0, h, params["a1"] * h)
    g = jnp.dot(h, params["w2"], precision=hi) + params["b2"]
    g = 1.0 / (1.0 + jnp.exp(-g))
    out = cur * g[:, None, None, :] + x
    return jnp.transpose(out, (0, 3, 1, 2))


# ----------------------------------------------------------------------------
if __name__ == "__main__":
    nf = 32                       # channels (bottleneck nf//4 = 8)
    B, H, W = 2, 16, 16

    key = jax.random.PRNGKey(0)
    kp, kx = jax.random.split(key)
    params = init_rca_params(kp, nf)
    packed = pack_rca_params(params, H, W)
    x = jax.random.normal(kx, (B, nf, H, W), jnp.float32)

    out = jax.jit(rca_forward)(packed, x)
    out = jax.block_until_ready(out)

    assert out.shape == (B, nf, H, W), out.shape
    assert bool(jnp.isfinite(out).all())

    ref = rca_reference(params, x)
    err = float(jnp.max(jnp.abs(out - ref)))
    assert err < 1e-3, f"mismatch vs XLA reference: max abs err = {err}"

    print("KERNEL_OK")
</pallas_src>

<mosaic_0001>
module attributes {stable_mosaic.version = 11 : i64} {
  func.func @_rca_fused_kernel(%arg0: i32, %arg1: memref<1x32x256xf32, #tpu.memory_space<vmem>>, %arg2: memref<3x3x32x96xf32, #tpu.memory_space<vmem>>, %arg3: memref<3x32x1xf32, #tpu.memory_space<vmem>>, %arg4: memref<3x32x1xf32, #tpu.memory_space<vmem>>, %arg5: memref<9x1x256xf32, #tpu.memory_space<vmem>>, %arg6: memref<8x32xf32, #tpu.memory_space<vmem>>, %arg7: memref<8x1xf32, #tpu.memory_space<vmem>>, %arg8: memref<8x1xf32, #tpu.memory_space<vmem>>, %arg9: memref<32x8xf32, #tpu.memory_space<vmem>>, %arg10: memref<32x1xf32, #tpu.memory_space<vmem>>, %arg11: memref<1x32x256xf32, #tpu.memory_space<vmem>>) attributes {dimension_semantics = [#tpu.dimension_semantics<parallel>], iteration_bounds = array<i64: 2>, scalar_prefetch = 0 : i64, scratch_operands = 0 : i64, tpu.core_type = #tpu.core_type<tc>, window_params = [{transform_indices = @transform_0, window_bounds = array<i64: 1, 32, 256>}, {pipeline_mode = #tpu.pipeline_mode<synchronous>, transform_indices = @transform_1, window_bounds = array<i64: 3, 3, 32, 96>}, {pipeline_mode = #tpu.pipeline_mode<synchronous>, transform_indices = @transform_2, window_bounds = array<i64: 3, 32, 1>}, {pipeline_mode = #tpu.pipeline_mode<synchronous>, transform_indices = @transform_3, window_bounds = array<i64: 3, 32, 1>}, {pipeline_mode = #tpu.pipeline_mode<synchronous>, transform_indices = @transform_4, window_bounds = array<i64: 9, 1, 256>}, {pipeline_mode = #tpu.pipeline_mode<synchronous>, transform_indices = @transform_5, window_bounds = array<i64: 8, 32>}, {pipeline_mode = #tpu.pipeline_mode<synchronous>, transform_indices = @transform_6, window_bounds = array<i64: 8, 1>}, {pipeline_mode = #tpu.pipeline_mode<synchronous>, transform_indices = @transform_7, window_bounds = array<i64: 8, 1>}, {pipeline_mode = #tpu.pipeline_mode<synchronous>, transform_indices = @transform_8, window_bounds = array<i64: 32, 8>}, {pipeline_mode = #tpu.pipeline_mode<synchronous>, transform_indices = @transform_9, window_bounds = array<i64: 32, 1>}, {transform_indices = @transform_10, window_bounds = array<i64: 1, 32, 256>}]} {
    %c0 = arith.constant 0 : index
    %c0_0 = arith.constant 0 : index
    %c0_1 = arith.constant 0 : index
    %0 = vector.load %arg1[%c0, %c0_0, %c0_1] : memref<1x32x256xf32, #tpu.memory_space<vmem>>, vector<1x32x256xf32>
    %1 = vector.shape_cast %0 : vector<1x32x256xf32> to vector<32x256xf32>
    %2 = tpu.concatenate %1, %1 in 1 : vector<32x256xf32>, vector<32x256xf32> -> vector<32x512xf32>
    %cst = arith.constant 0.000000e+00 : f32
    %3 = vector.broadcast %cst : f32 to vector<32x256xf32>
    %4 = vector.extract_strided_slice %2 {offsets = [0, 239], sizes = [32, 256], strides = [1, 1]} : vector<32x512xf32> to vector<32x256xf32>
    %c0_2 = arith.constant 0 : index
    %c0_3 = arith.constant 0 : index
    %c0_4 = arith.constant 0 : index
    %5 = vector.load %arg5[%c0_2, %c0_3, %c0_4] : memref<9x1x256xf32, #tpu.memory_space<vmem>>, vector<1x1x256xf32>
    %6 = vector.shape_cast %5 : vector<1x1x256xf32> to vector<1x256xf32>
    %7 = vector.broadcast %6 : vector<1x256xf32> to vector<32x256xf32>
    %8 = arith.mulf %4, %7 : vector<32x256xf32>
    %9 = vector.extract_strided_slice %2 {offsets = [0, 240], sizes = [32, 256], strides = [1, 1]} : vector<32x512xf32> to vector<32x256xf32>
    %c1 = arith.constant 1 : index
    %c0_5 = arith.constant 0 : index
    %c0_6 = arith.constant 0 : index
    %10 = vector.load %arg5[%c1, %c0_5, %c0_6] : memref<9x1x256xf32, #tpu.memory_space<vmem>>, vector<1x1x256xf32>
    %11 = vector.shape_cast %10 : vector<1x1x256xf32> to vector<1x256xf32>
    %12 = vector.broadcast %11 : vector<1x256xf32> to vector<32x256xf32>
    %13 = arith.mulf %9, %12 : vector<32x256xf32>
    %14 = vector.extract_strided_slice %2 {offsets = [0, 241], sizes = [32, 256], strides = [1, 1]} : vector<32x512xf32> to vector<32x256xf32>
    %c2 = arith.constant 2 : index
    %c0_7 = arith.constant 0 : index
    %c0_8 = arith.constant 0 : index
    %15 = vector.load %arg5[%c2, %c0_7, %c0_8] : memref<9x1x256xf32, #tpu.memory_space<vmem>>, vector<1x1x256xf32>
    %16 = vector.shape_cast %15 : vector<1x1x256xf32> to vector<1x256xf32>
    %17 = vector.broadcast %16 : vector<1x256xf32> to vector<32x256xf32>
    %18 = arith.mulf %14, %17 : vector<32x256xf32>
    %19 = tpu.concatenate %8, %13, %18 in 0 : vector<32x256xf32>, vector<32x256xf32>, vector<32x256xf32> -> vector<96x256xf32>
    %c0_9 = arith.constant 0 : index
    %c0_10 = arith.constant 0 : index
    %c0_11 = arith.constant 0 : index
    %c0_12 = arith.constant 0 : index
    %20 = vector.load %arg2[%c0_9, %c0_10, %c0_11, %c0_12] : memref<3x3x32x96xf32, #tpu.memory_space<vmem>>, vector<1x1x32x96xf32>
    %21 = vector.shape_cast %20 : vector<1x1x32x96xf32> to vector<32x96xf32>
    %cst_13 = arith.constant dense<0.000000e+00> : vector<32x256xf32>
    %22 = tpu.matmul %21, %19, %cst_13 {dimension_numbers = #tpu.dot_dimension_numbers<[1], [0], [0], [1], [0, 0, 1, 1], [], []>} : vector<32x96xf32>, vector<96x256xf32>, vector<32x256xf32> -> vector<32x256xf32>
    %23 = arith.addf %3, %22 : vector<32x256xf32>
    %24 = vector.extract_strided_slice %2 {offsets = [0, 255], sizes = [32, 256], strides = [1, 1]} : vector<32x512xf32> to vector<32x256xf32>
    %c3 = arith.constant 3 : index
    %c0_14 = arith.constant 0 : index
    %c0_15 = arith.constant 0 : index
    %25 = vector.load %arg5[%c3, %c0_14, %c0_15] : memref<9x1x256xf32, #tpu.memory_space<vmem>>, vector<1x1x256xf32>
    %26 = vector.shape_cast %25 : vector<1x1x256xf32> to vector<1x256xf32>
    %27 = vector.broadcast %26 : vector<1x256xf32> to vector<32x256xf32>
    %28 = arith.mulf %24, %27 : vector<32x256xf32>
    %29 = vector.extract_strided_slice %2 {offsets = [0, 1], sizes = [32, 256], strides = [1, 1]} : vector<32x512xf32> to vector<32x256xf32>
    %c5 = arith.constant 5 : index
    %c0_16 = arith.constant 0 : index
    %c0_17 = arith.constant 0 : index
    %30 = vector.load %arg5[%c5, %c0_16, %c0_17] : memref<9x1x256xf32, #tpu.memory_space<vmem>>, vector<1x1x256xf32>
    %31 = vector.shape_cast %30 : vector<1x1x256xf32> to vector<1x256xf32>
    %32 = vector.broadcast %31 : vector<1x256xf32> to vector<32x256xf32>
    %33 = arith.mulf %29, %32 : vector<32x256xf32>
    %34 = tpu.concatenate %28, %1, %33 in 0 : vector<32x256xf32>, vector<32x256xf32>, vector<32x256xf32> -> vector<96x256xf32>
    %c0_18 = arith.constant 0 : index
    %c1_19 = arith.constant 1 : index
    %c0_20 = arith.constant 0 : index
    %c0_21 = arith.constant 0 : index
    %35 = vector.load %arg2[%c0_18, %c1_19, %c0_20, %c0_21] : memref<3x3x32x96xf32, #tpu.memory_space<vmem>>, vector<1x1x32x96xf32>
    %36 = vector.shape_cast %35 : vector<1x1x32x96xf32> to vector<32x96xf32>
    %cst_22 = arith.constant dense<0.000000e+00> : vector<32x256xf32>
    %37 = tpu.matmul %36, %34, %cst_22 {dimension_numbers = #tpu.dot_dimension_numbers<[1], [0], [0], [1], [0, 0, 1, 1], [], []>} : vector<32x96xf32>, vector<96x256xf32>, vector<32x256xf32> -> vector<32x256xf32>
    %38 = arith.addf %23, %37 : vector<32x256xf32>
    %39 = vector.extract_strided_slice %2 {offsets = [0, 15], sizes = [32, 256], strides = [1, 1]} : vector<32x512xf32> to vector<32x256xf32>
    %c6 = arith.constant 6 : index
    %c0_23 = arith.constant 0 : index
    %c0_24 = arith.constant 0 : index
    %40 = vector.load %arg5[%c6, %c0_23, %c0_24] : memref<9x1x256xf32, #tpu.memory_space<vmem>>, vector<1x1x256xf32>
    %41 = vector.shape_cast %40 : vector<1x1x256xf32> to vector<1x256xf32>
    %42 = vector.broadcast %41 : vector<1x256xf32> to vector<32x256xf32>
    %43 = arith.mulf %39, %42 : vector<32x256xf32>
    %44 = vector.extract_strided_slice %2 {offsets = [0, 16], sizes = [32, 256], strides = [1, 1]} : vector<32x512xf32> to vector<32x256xf32>
    %c7 = arith.constant 7 : index
    %c0_25 = arith.constant 0 : index
    %c0_26 = arith.constant 0 : index
    %45 = vector.load %arg5[%c7, %c0_25, %c0_26] : memref<9x1x256xf32, #tpu.memory_space<vmem>>, vector<1x1x256xf32>
    %46 = vector.shape_cast %45 : vector<1x1x256xf32> to vector<1x256xf32>
    %47 = vector.broadcast %46 : vector<1x256xf32> to vector<32x256xf32>
    %48 = arith.mulf %44, %47 : vector<32x256xf32>
    %49 = vector.extract_strided_slice %2 {offsets = [0, 17], sizes = [32, 256], strides = [1, 1]} : vector<32x512xf32> to vector<32x256xf32>
    %c8 = arith.constant 8 : index
    %c0_27 = arith.constant 0 : index
    %c0_28 = arith.constant 0 : index
    %50 = vector.load %arg5[%c8, %c0_27, %c0_28] : memref<9x1x256xf32, #tpu.memory_space<vmem>>, vector<1x1x256xf32>
    %51 = vector.shape_cast %50 : vector<1x1x256xf32> to vector<1x256xf32>
    %52 = vector.broadcast %51 : vector<1x256xf32> to vector<32x256xf32>
    %53 = arith.mulf %49, %52 : vector<32x256xf32>
    %54 = tpu.concatenate %43, %48, %53 in 0 : vector<32x256xf32>, vector<32x256xf32>, vector<32x256xf32> -> vector<96x256xf32>
    %c0_29 = arith.constant 0 : index
    %c2_30 = arith.constant 2 : index
    %c0_31 = arith.constant 0 : index
    %c0_32 = arith.constant 0 : index
    %55 = vector.load %arg2[%c0_29, %c2_30, %c0_31, %c0_32] : memref<3x3x32x96xf32, #tpu.memory_space<vmem>>, vector<1x1x32x96xf32>
    %56 = vector.shape_cast %55 : vector<1x1x32x96xf32> to vector<32x96xf32>
    %cst_33 = arith.constant dense<0.000000e+00> : vector<32x256xf32>
    %57 = tpu.matmul %56, %54, %cst_33 {dimension_numbers = #tpu.dot_dimension_numbers<[1], [0], [0], [1], [0, 0, 1, 1], [], []>} : vector<32x96xf32>, vector<96x256xf32>, vector<32x256xf32> -> vector<32x256xf32>
    %58 = arith.addf %38, %57 : vector<32x256xf32>
    %c0_34 = arith.constant 0 : index
    %c0_35 = arith.constant 0 : index
    %c0_36 = arith.constant 0 : index
    %59 = vector.load %arg3[%c0_34, %c0_35, %c0_36] : memref<3x32x1xf32, #tpu.memory_space<vmem>>, vector<1x32x1xf32>
    %60 = vector.shape_cast %59 : vector<1x32x1xf32> to vector<32x1xf32>
    %61 = vector.broadcast %60 : vector<32x1xf32> to vector<32x256xf32>
    %62 = arith.addf %58, %61 : vector<32x256xf32>
    %cst_37 = arith.constant 0.000000e+00 : f32
    %63 = vector.broadcast %cst_37 : f32 to vector<32x256xf32>
    %64 = arith.cmpf oge, %62, %63 : vector<32x256xf32>
    %c0_38 = arith.constant 0 : index
    %c0_39 = arith.constant 0 : index
    %c0_40 = arith.constant 0 : index
    %65 = vector.load %arg4[%c0_38, %c0_39, %c0_40] : memref<3x32x1xf32, #tpu.memory_space<vmem>>, vector<1x32x1xf32>
    %66 = vector.shape_cast %65 : vector<1x32x1xf32> to vector<32x1xf32>
    %67 = vector.broadcast %66 : vector<32x1xf32> to vector<32x256xf32>
    %68 = arith.mulf %67, %62 : vector<32x256xf32>
    %69 = arith.select %64, %62, %68 : vector<32x256xi1>, vector<32x256xf32>
    %70 = tpu.concatenate %69, %69 in 1 : vector<32x256xf32>, vector<32x256xf32> -> vector<32x512xf32>
    %cst_41 = arith.constant 0.000000e+00 : f32
    %71 = vector.broadcast %cst_41 : f32 to vector<32x256xf32>
    %72 = vector.extract_strided_slice %70 {offsets = [0, 239], sizes = [32, 256], strides = [1, 1]} : vector<32x512xf32> to vector<32x256xf32>
    %c0_42 = arith.constant 0 : index
    %c0_43 = arith.constant 0 : index
    %c0_44 = arith.constant 0 : index
    %73 = vector.load %arg5[%c0_42, %c0_43, %c0_44] : memref<9x1x256xf32, #tpu.memory_space<vmem>>, vector<1x1x256xf32>
    %74 = vector.shape_cast %73 : vector<1x1x256xf32> to vector<1x256xf32>
    %75 = vector.broadcast %74 : vector<1x256xf32> to vector<32x256xf32>
    %76 = arith.mulf %72, %75 : vector<32x256xf32>
    %77 = vector.extract_strided_slice %70 {offsets = [0, 240], sizes = [32, 256], strides = [1, 1]} : vector<32x512xf32> to vector<32x256xf32>
    %c1_45 = arith.constant 1 : index
    %c0_46 = arith.constant 0 : index
    %c0_47 = arith.constant 0 : index
    %78 = vector.load %arg5[%c1_45, %c0_46, %c0_47] : memref<9x1x256xf32, #tpu.memory_space<vmem>>, vector<1x1x256xf32>
    %79 = vector.shape_cast %78 : vector<1x1x256xf32> to vector<1x256xf32>
    %80 = vector.broadcast %79 : vector<1x256xf32> to vector<32x256xf32>
    %81 = arith.mulf %77, %80 : vector<32x256xf32>
    %82 = vector.extract_strided_slice %70 {offsets = [0, 241], sizes = [32, 256], strides = [1, 1]} : vector<32x512xf32> to vector<32x256xf32>
    %c2_48 = arith.constant 2 : index
    %c0_49 = arith.constant 0 : index
    %c0_50 = arith.constant 0 : index
    %83 = vector.load %arg5[%c2_48, %c0_49, %c0_50] : memref<9x1x256xf32, #tpu.memory_space<vmem>>, vector<1x1x256xf32>
    %84 = vector.shape_cast %83 : vector<1x1x256xf32> to vector<1x256xf32>
    %85 = vector.broadcast %84 : vector<1x256xf32> to vector<32x256xf32>
    %86 = arith.mulf %82, %85 : vector<32x256xf32>
    %87 = tpu.concatenate %76, %81, %86 in 0 : vector<32x256xf32>, vector<32x256xf32>, vector<32x256xf32> -> vector<96x256xf32>
    %c1_51 = arith.constant 1 : index
    %c0_52 = arith.constant 0 : index
    %c0_53 = arith.constant 0 : index
    %c0_54 = arith.constant 0 : index
    %88 = vector.load %arg2[%c1_51, %c0_52, %c0_53, %c0_54] : memref<3x3x32x96xf32, #tpu.memory_space<vmem>>, vector<1x1x32x96xf32>
    %89 = vector.shape_cast %88 : vector<1x1x32x96xf32> to vector<32x96xf32>
    %cst_55 = arith.constant dense<0.000000e+00> : vector<32x256xf32>
    %90 = tpu.matmul %89, %87, %cst_55 {dimension_numbers = #tpu.dot_dimension_numbers<[1], [0], [0], [1], [0, 0, 1, 1], [], []>} : vector<32x96xf32>, vector<96x256xf32>, vector<32x256xf32> -> vector<32x256xf32>
    %91 = arith.addf %71, %90 : vector<32x256xf32>
    %92 = vector.extract_strided_slice %70 {offsets = [0, 255], sizes = [32, 256], strides = [1, 1]} : vector<32x512xf32> to vector<32x256xf32>
    %c3_56 = arith.constant 3 : index
    %c0_57 = arith.constant 0 : index
    %c0_58 = arith.constant 0 : index
    %93 = vector.load %arg5[%c3_56, %c0_57, %c0_58] : memref<9x1x256xf32, #tpu.memory_space<vmem>>, vector<1x1x256xf32>
    %94 = vector.shape_cast %93 : vector<1x1x256xf32> to vector<1x256xf32>
    %95 = vector.broadcast %94 : vector<1x256xf32> to vector<32x256xf32>
    %96 = arith.mulf %92, %95 : vector<32x256xf32>
    %97 = vector.extract_strided_slice %70 {offsets = [0, 1], sizes = [32, 256], strides = [1, 1]} : vector<32x512xf32> to vector<32x256xf32>
    %c5_59 = arith.constant 5 : index
    %c0_60 = arith.constant 0 : index
    %c0_61 = arith.constant 0 : index
    %98 = vector.load %arg5[%c5_59, %c0_60, %c0_61] : memref<9x1x256xf32, #tpu.memory_space<vmem>>, vector<1x1x256xf32>
    %99 = vector.shape_cast %98 : vector<1x1x256xf32> to vector<1x256xf32>
    %100 = vector.broadcast %99 : vector<1x256xf32> to vector<32x256xf32>
    %101 = arith.mulf %97, %100 : vector<32x256xf32>
    %102 = tpu.concatenate %96, %69, %101 in 0 : vector<32x256xf32>, vector<32x256xf32>, vector<32x256xf32> -> vector<96x256xf32>
    %c1_62 = arith.constant 1 : index
    %c1_63 = arith.constant 1 : index
    %c0_64 = arith.constant 0 : index
    %c0_65 = arith.constant 0 : index
    %103 = vector.load %arg2[%c1_62, %c1_63, %c0_64, %c0_65] : memref<3x3x32x96xf32, #tpu.memory_space<vmem>>, vector<1x1x32x96xf32>
    %104 = vector.shape_cast %103 : vector<1x1x32x96xf32> to vector<32x96xf32>
    %cst_66 = arith.constant dense<0.000000e+00> : vector<32x256xf32>
    %105 = tpu.matmul %104, %102, %cst_66 {dimension_numbers = #tpu.dot_dimension_numbers<[1], [0], [0], [1], [0, 0, 1, 1], [], []>} : vector<32x96xf32>, vector<96x256xf32>, vector<32x256xf32> -> vector<32x256xf32>
    %106 = arith.addf %91, %105 : vector<32x256xf32>
    %107 = vector.extract_strided_slice %70 {offsets = [0, 15], sizes = [32, 256], strides = [1, 1]} : vector<32x512xf32> to vector<32x256xf32>
    %c6_67 = arith.constant 6 : index
    %c0_68 = arith.constant 0 : index
    %c0_69 = arith.constant 0 : index
    %108 = vector.load %arg5[%c6_67, %c0_68, %c0_69] : memref<9x1x256xf32, #tpu.memory_space<vmem>>, vector<1x1x256xf32>
    %109 = vector.shape_cast %108 : vector<1x1x256xf32> to vector<1x256xf32>
    %110 = vector.broadcast %109 : vector<1x256xf32> to vector<32x256xf32>
    %111 = arith.mulf %107, %110 : vector<32x256xf32>
    %112 = vector.extract_strided_slice %70 {offsets = [0, 16], sizes = [32, 256], strides = [1, 1]} : vector<32x512xf32> to vector<32x256xf32>
    %c7_70 = arith.constant 7 : index
    %c0_71 = arith.constant 0 : index
    %c0_72 = arith.constant 0 : index
    %113 = vector.load %arg5[%c7_70, %c0_71, %c0_72] : memref<9x1x256xf32, #tpu.memory_space<vmem>>, vector<1x1x256xf32>
    %114 = vector.shape_cast %113 : vector<1x1x256xf32> to vector<1x256xf32>
    %115 = vector.broadcast %114 : vector<1x256xf32> to vector<32x256xf32>
    %116 = arith.mulf %112, %115 : vector<32x256xf32>
    %117 = vector.extract_strided_slice %70 {offsets = [0, 17], sizes = [32, 256], strides = [1, 1]} : vector<32x512xf32> to vector<32x256xf32>
    %c8_73 = arith.constant 8 : index
    %c0_74 = arith.constant 0 : index
    %c0_75 = arith.constant 0 : index
    %118 = vector.load %arg5[%c8_73, %c0_74, %c0_75] : memref<9x1x256xf32, #tpu.memory_space<vmem>>, vector<1x1x256xf32>
    %119 = vector.shape_cast %118 : vector<1x1x256xf32> to vector<1x256xf32>
    %120 = vector.broadcast %119 : vector<1x256xf32> to vector<32x256xf32>
    %121 = arith.mulf %117, %120 : vector<32x256xf32>
    %122 = tpu.concatenate %111, %116, %121 in 0 : vector<32x256xf32>, vector<32x256xf32>, vector<32x256xf32> -> vector<96x256xf32>
    %c1_76 = arith.constant 1 : index
    %c2_77 = arith.constant 2 : index
    %c0_78 = arith.constant 0 : index
    %c0_79 = arith.constant 0 : index
    %123 = vector.load %arg2[%c1_76, %c2_77, %c0_78, %c0_79] : memref<3x3x32x96xf32, #tpu.memory_space<vmem>>, vector<1x1x32x96xf32>
    %124 = vector.shape_cast %123 : vector<1x1x32x96xf32> to vector<32x96xf32>
    %cst_80 = arith.constant dense<0.000000e+00> : vector<32x256xf32>
    %125 = tpu.matmul %124, %122, %cst_80 {dimension_numbers = #tpu.dot_dimension_numbers<[1], [0], [0], [1], [0, 0, 1, 1], [], []>} : vector<32x96xf32>, vector<96x256xf32>, vector<32x256xf32> -> vector<32x256xf32>
    %126 = arith.addf %106, %125 : vector<32x256xf32>
    %c1_81 = arith.constant 1 : index
    %c0_82 = arith.constant 0 : index
    %c0_83 = arith.constant 0 : index
    %127 = vector.load %arg3[%c1_81, %c0_82, %c0_83] : memref<3x32x1xf32, #tpu.memory_space<vmem>>, vector<1x32x1xf32>
    %128 = vector.shape_cast %127 : vector<1x32x1xf32> to vector<32x1xf32>
    %129 = vector.broadcast %128 : vector<32x1xf32> to vector<32x256xf32>
    %130 = arith.addf %126, %129 : vector<32x256xf32>
    %cst_84 = arith.constant 0.000000e+00 : f32
    %131 = vector.broadcast %cst_84 : f32 to vector<32x256xf32>
    %132 = arith.cmpf oge, %130, %131 : vector<32x256xf32>
    %c1_85 = arith.constant 1 : index
    %c0_86 = arith.constant 0 : index
    %c0_87 = arith.constant 0 : index
    %133 = vector.load %arg4[%c1_85, %c0_86, %c0_87] : memref<3x32x1xf32, #tpu.memory_space<vmem>>, vector<1x32x1xf32>
    %134 = vector.shape_cast %133 : vector<1x32x1xf32> to vector<32x1xf32>
    %135 = vector.broadcast %134 : vector<32x1xf32> to vector<32x256xf32>
    %136 = arith.mulf %135, %130 : vector<32x256xf32>
    %137 = arith.select %132, %130, %136 : vector<32x256xi1>, vector<32x256xf32>
    %138 = tpu.concatenate %137, %137 in 1 : vector<32x256xf32>, vector<32x256xf32> -> vector<32x512xf32>
    %cst_88 = arith.constant 0.000000e+00 : f32
    %139 = vector.broadcast %cst_88 : f32 to vector<32x256xf32>
    %140 = vector.extract_strided_slice %138 {offsets = [0, 239], sizes = [32, 256], strides = [1, 1]} : vector<32x512xf32> to vector<32x256xf32>
    %c0_89 = arith.constant 0 : index
    %c0_90 = arith.constant 0 : index
    %c0_91 = arith.constant 0 : index
    %141 = vector.load %arg5[%c0_89, %c0_90, %c0_91] : memref<9x1x256xf32, #tpu.memory_space<vmem>>, vector<1x1x256xf32>
    %142 = vector.shape_cast %141 : vector<1x1x256xf32> to vector<1x256xf32>
    %143 = vector.broadcast %142 : vector<1x256xf32> to vector<32x256xf32>
    %144 = arith.mulf %140, %143 : vector<32x256xf32>
    %145 = vector.extract_strided_slice %138 {offsets = [0, 240], sizes = [32, 256], strides = [1, 1]} : vector<32x512xf32> to vector<32x256xf32>
    %c1_92 = arith.constant 1 : index
    %c0_93 = arith.constant 0 : index
    %c0_94 = arith.constant 0 : index
    %146 = vector.load %arg5[%c1_92, %c0_93, %c0_94] : memref<9x1x256xf32, #tpu.memory_space<vmem>>, vector<1x1x256xf32>
    %147 = vector.shape_cast %146 : vector<1x1x256xf32> to vector<1x256xf32>
    %148 = vector.broadcast %147 : vector<1x256xf32> to vector<32x256xf32>
    %149 = arith.mulf %145, %148 : vector<32x256xf32>
    %150 = vector.extract_strided_slice %138 {offsets = [0, 241], sizes = [32, 256], strides = [1, 1]} : vector<32x512xf32> to vector<32x256xf32>
    %c2_95 = arith.constant 2 : index
    %c0_96 = arith.constant 0 : index
    %c0_97 = arith.constant 0 : index
    %151 = vector.load %arg5[%c2_95, %c0_96, %c0_97] : memref<9x1x256xf32, #tpu.memory_space<vmem>>, vector<1x1x256xf32>
    %152 = vector.shape_cast %151 : vector<1x1x256xf32> to vector<1x256xf32>
    %153 = vector.broadcast %152 : vector<1x256xf32> to vector<32x256xf32>
    %154 = arith.mulf %150, %153 : vector<32x256xf32>
    %155 = tpu.concatenate %144, %149, %154 in 0 : vector<32x256xf32>, vector<32x256xf32>, vector<32x256xf32> -> vector<96x256xf32>
    %c2_98 = arith.constant 2 : index
    %c0_99 = arith.constant 0 : index
    %c0_100 = arith.constant 0 : index
    %c0_101 = arith.constant 0 : index
    %156 = vector.load %arg2[%c2_98, %c0_99, %c0_100, %c0_101] : memref<3x3x32x96xf32, #tpu.memory_space<vmem>>, vector<1x1x32x96xf32>
    %157 = vector.shape_cast %156 : vector<1x1x32x96xf32> to vector<32x96xf32>
    %cst_102 = arith.constant dense<0.000000e+00> : vector<32x256xf32>
    %158 = tpu.matmul %157, %155, %cst_102 {dimension_numbers = #tpu.dot_dimension_numbers<[1], [0], [0], [1], [0, 0, 1, 1], [], []>} : vector<32x96xf32>, vector<96x256xf32>, vector<32x256xf32> -> vector<32x256xf32>
    %159 = arith.addf %139, %158 : vector<32x256xf32>
    %160 = vector.extract_strided_slice %138 {offsets = [0, 255], sizes = [32, 256], strides = [1, 1]} : vector<32x512xf32> to vector<32x256xf32>
    %c3_103 = arith.constant 3 : index
    %c0_104 = arith.constant 0 : index
    %c0_105 = arith.constant 0 : index
    %161 = vector.load %arg5[%c3_103, %c0_104, %c0_105] : memref<9x1x256xf32, #tpu.memory_space<vmem>>, vector<1x1x256xf32>
    %162 = vector.shape_cast %161 : vector<1x1x256xf32> to vector<1x256xf32>
    %163 = vector.broadcast %162 : vector<1x256xf32> to vector<32x256xf32>
    %164 = arith.mulf %160, %163 : vector<32x256xf32>
    %165 = vector.extract_strided_slice %138 {offsets = [0, 1], sizes = [32, 256], strides = [1, 1]} : vector<32x512xf32> to vector<32x256xf32>
    %c5_106 = arith.constant 5 : index
    %c0_107 = arith.constant 0 : index
    %c0_108 = arith.constant 0 : index
    %166 = vector.load %arg5[%c5_106, %c0_107, %c0_108] : memref<9x1x256xf32, #tpu.memory_space<vmem>>, vector<1x1x256xf32>
    %167 = vector.shape_cast %166 : vector<1x1x256xf32> to vector<1x256xf32>
    %168 = vector.broadcast %167 : vector<1x256xf32> to vector<32x256xf32>
    %169 = arith.mulf %165, %168 : vector<32x256xf32>
    %170 = tpu.concatenate %164, %137, %169 in 0 : vector<32x256xf32>, vector<32x256xf32>, vector<32x256xf32> -> vector<96x256xf32>
    %c2_109 = arith.constant 2 : index
    %c1_110 = arith.constant 1 : index
    %c0_111 = arith.constant 0 : index
    %c0_112 = arith.constant 0 : index
    %171 = vector.load %arg2[%c2_109, %c1_110, %c0_111, %c0_112] : memref<3x3x32x96xf32, #tpu.memory_space<vmem>>, vector<1x1x32x96xf32>
    %172 = vector.shape_cast %171 : vector<1x1x32x96xf32> to vector<32x96xf32>
    %cst_113 = arith.constant dense<0.000000e+00> : vector<32x256xf32>
    %173 = tpu.matmul %172, %170, %cst_113 {dimension_numbers = #tpu.dot_dimension_numbers<[1], [0], [0], [1], [0, 0, 1, 1], [], []>} : vector<32x96xf32>, vector<96x256xf32>, vector<32x256xf32> -> vector<32x256xf32>
    %174 = arith.addf %159, %173 : vector<32x256xf32>
    %175 = vector.extract_strided_slice %138 {offsets = [0, 15], sizes = [32, 256], strides = [1, 1]} : vector<32x512xf32> to vector<32x256xf32>
    %c6_114 = arith.constant 6 : index
    %c0_115 = arith.constant 0 : index
    %c0_116 = arith.constant 0 : index
    %176 = vector.load %arg5[%c6_114, %c0_115, %c0_116] : memref<9x1x256xf32, #tpu.memory_space<vmem>>, vector<1x1x256xf32>
    %177 = vector.shape_cast %176 : vector<1x1x256xf32> to vector<1x256xf32>
    %178 = vector.broadcast %177 : vector<1x256xf32> to vector<32x256xf32>
    %179 = arith.mulf %175, %178 : vector<32x256xf32>
    %180 = vector.extract_strided_slice %138 {offsets = [0, 16], sizes = [32, 256], strides = [1, 1]} : vector<32x512xf32> to vector<32x256xf32>
    %c7_117 = arith.constant 7 : index
    %c0_118 = arith.constant 0 : index
    %c0_119 = arith.constant 0 : index
    %181 = vector.load %arg5[%c7_117, %c0_118, %c0_119] : memref<9x1x256xf32, #tpu.memory_space<vmem>>, vector<1x1x256xf32>
    %182 = vector.shape_cast %181 : vector<1x1x256xf32> to vector<1x256xf32>
    %183 = vector.broadcast %182 : vector<1x256xf32> to vector<32x256xf32>
    %184 = arith.mulf %180, %183 : vector<32x256xf32>
    %185 = vector.extract_strided_slice %138 {offsets = [0, 17], sizes = [32, 256], strides = [1, 1]} : vector<32x512xf32> to vector<32x256xf32>
    %c8_120 = arith.constant 8 : index
    %c0_121 = arith.constant 0 : index
    %c0_122 = arith.constant 0 : index
    %186 = vector.load %arg5[%c8_120, %c0_121, %c0_122] : memref<9x1x256xf32, #tpu.memory_space<vmem>>, vector<1x1x256xf32>
    %187 = vector.shape_cast %186 : vector<1x1x256xf32> to vector<1x256xf32>
    %188 = vector.broadcast %187 : vector<1x256xf32> to vector<32x256xf32>
    %189 = arith.mulf %185, %188 : vector<32x256xf32>
    %190 = tpu.concatenate %179, %184, %189 in 0 : vector<32x256xf32>, vector<32x256xf32>, vector<32x256xf32> -> vector<96x256xf32>
    %c2_123 = arith.constant 2 : index
    %c2_124 = arith.constant 2 : index
    %c0_125 = arith.constant 0 : index
    %c0_126 = arith.constant 0 : index
    %191 = vector.load %arg2[%c2_123, %c2_124, %c0_125, %c0_126] : memref<3x3x32x96xf32, #tpu.memory_space<vmem>>, vector<1x1x32x96xf32>
    %192 = vector.shape_cast %191 : vector<1x1x32x96xf32> to vector<32x96xf32>
    %cst_127 = arith.constant dense<0.000000e+00> : vector<32x256xf32>
    %193 = tpu.matmul %192, %190, %cst_127 {dimension_numbers = #tpu.dot_dimension_numbers<[1], [0], [0], [1], [0, 0, 1, 1], [], []>} : vector<32x96xf32>, vector<96x256xf32>, vector<32x256xf32> -> vector<32x256xf32>
    %194 = arith.addf %174, %193 : vector<32x256xf32>
    %c2_128 = arith.constant 2 : index
    %c0_129 = arith.constant 0 : index
    %c0_130 = arith.constant 0 : index
    %195 = vector.load %arg3[%c2_128, %c0_129, %c0_130] : memref<3x32x1xf32, #tpu.memory_space<vmem>>, vector<1x32x1xf32>
    %196 = vector.shape_cast %195 : vector<1x32x1xf32> to vector<32x1xf32>
    %197 = vector.broadcast %196 : vector<32x1xf32> to vector<32x256xf32>
    %198 = arith.addf %194, %197 : vector<32x256xf32>
    %cst_131 = arith.constant 0.000000e+00 : f32
    %199 = vector.broadcast %cst_131 : f32 to vector<32x256xf32>
    %200 = arith.cmpf oge, %198, %199 : vector<32x256xf32>
    %c2_132 = arith.constant 2 : index
    %c0_133 = arith.constant 0 : index
    %c0_134 = arith.constant 0 : index
    %201 = vector.load %arg4[%c2_132, %c0_133, %c0_134] : memref<3x32x1xf32, #tpu.memory_space<vmem>>, vector<1x32x1xf32>
    %202 = vector.shape_cast %201 : vector<1x32x1xf32> to vector<32x1xf32>
    %203 = vector.broadcast %202 : vector<32x1xf32> to vector<32x256xf32>
    %204 = arith.mulf %203, %198 : vector<32x256xf32>
    %205 = arith.select %200, %198, %204 : vector<32x256xi1>, vector<32x256xf32>
    %cst_135 = arith.constant dense<0.000000e+00> : vector<32xf32>
    %206 = vector.multi_reduction <add>, %205, %cst_135 [1] : vector<32x256xf32> to vector<32xf32>
    %207 = vector.shape_cast %206 : vector<32xf32> to vector<32x1xf32>
    %cst_136 = arith.constant 3.906250e-03 : f32
    %208 = vector.broadcast %cst_136 : f32 to vector<32x1xf32>
    %209 = arith.mulf %207, %208 : vector<32x1xf32>
    %c0_137 = arith.constant 0 : index
    %c0_138 = arith.constant 0 : index
    %210 = vector.load %arg6[%c0_137, %c0_138] : memref<8x32xf32, #tpu.memory_space<vmem>>, vector<8x32xf32>
    %cst_139 = arith.constant dense<0.000000e+00> : vector<8x1xf32>
    %211 = tpu.matmul %210, %209, %cst_139 {dimension_numbers = #tpu.dot_dimension_numbers<[1], [0], [0], [1], [0, 0, 1, 1], [], []>} : vector<8x32xf32>, vector<32x1xf32>, vector<8x1xf32> -> vector<8x1xf32>
    %c0_140 = arith.constant 0 : index
    %c0_141 = arith.constant 0 : index
    %212 = vector.load %arg7[%c0_140, %c0_141] : memref<8x1xf32, #tpu.memory_space<vmem>>, vector<8x1xf32>
    %213 = arith.addf %211, %212 : vector<8x1xf32>
    %cst_142 = arith.constant 0.000000e+00 : f32
    %214 = vector.broadcast %cst_142 : f32 to vector<8x1xf32>
    %215 = arith.cmpf oge, %213, %214 : vector<8x1xf32>
    %c0_143 = arith.constant 0 : index
    %c0_144 = arith.constant 0 : index
    %216 = vector.load %arg8[%c0_143, %c0_144] : memref<8x1xf32, #tpu.memory_space<vmem>>, vector<8x1xf32>
    %217 = arith.mulf %216, %213 : vector<8x1xf32>
    %218 = arith.select %215, %213, %217 : vector<8x1xi1>, vector<8x1xf32>
    %c0_145 = arith.constant 0 : index
    %c0_146 = arith.constant 0 : index
    %219 = vector.load %arg9[%c0_145, %c0_146] : memref<32x8xf32, #tpu.memory_space<vmem>>, vector<32x8xf32>
    %cst_147 = arith.constant dense<0.000000e+00> : vector<32x1xf32>
    %220 = tpu.matmul %219, %218, %cst_147 {dimension_numbers = #tpu.dot_dimension_numbers<[1], [0], [0], [1], [0, 0, 1, 1], [], []>} : vector<32x8xf32>, vector<8x1xf32>, vector<32x1xf32> -> vector<32x1xf32>
    %c0_148 = arith.constant 0 : index
    %c0_149 = arith.constant 0 : index
    %221 = vector.load %arg10[%c0_148, %c0_149] : memref<32x1xf32, #tpu.memory_space<vmem>>, vector<32x1xf32>
    %222 = arith.addf %220, %221 : vector<32x1xf32>
    %cst_150 = arith.constant 0.000000e+00 : f32
    %223 = vector.broadcast %cst_150 : f32 to vector<32x1xf32>
    %224 = arith.subf %223, %222 : vector<32x1xf32>
    %225 = math.exp %224 : vector<32x1xf32>
    %cst_151 = arith.constant 1.000000e+00 : f32
    %226 = vector.broadcast %cst_151 : f32 to vector<32x1xf32>
    %227 = arith.addf %226, %225 : vector<32x1xf32>
    %cst_152 = arith.constant 1.000000e+00 : f32
    %228 = vector.broadcast %cst_152 : f32 to vector<32x1xf32>
    %229 = arith.divf %228, %227 : vector<32x1xf32>
    %230 = vector.broadcast %229 : vector<32x1xf32> to vector<32x256xf32>
    %231 = arith.mulf %205, %230 : vector<32x256xf32>
    %c0_153 = arith.constant 0 : index
    %c0_154 = arith.constant 0 : index
    %c0_155 = arith.constant 0 : index
    %232 = vector.load %arg1[%c0_153, %c0_154, %c0_155] : memref<1x32x256xf32, #tpu.memory_space<vmem>>, vector<1x32x256xf32>
    %233 = vector.shape_cast %232 : vector<1x32x256xf32> to vector<32x256xf32>
    %234 = arith.addf %231, %233 : vector<32x256xf32>
    %c0_156 = arith.constant 0 : index
    %c0_157 = arith.constant 0 : index
    %c0_158 = arith.constant 0 : index
    %235 = vector.load %arg11[%c0_156, %c0_157, %c0_158] : memref<1x32x256xf32, #tpu.memory_space<vmem>>, vector<1x32x256xf32>
    %236 = vector.shape_cast %235 : vector<1x32x256xf32> to vector<32x256xf32>
    %237 = vector.shape_cast %234 : vector<32x256xf32> to vector<1x32x256xf32>
    tpu.vector_store %arg11[%c0_156, %c0_157, %c0_158], %237 {strides = array<i32>} : memref<1x32x256xf32, #tpu.memory_space<vmem>>, vector<1x32x256xf32>,
    return
  }
  func.func @transform_0(%arg0: i32) -> (i32, i32, i32) {
    %c0_i32 = arith.constant 0 : i32
    %c0_i32_0 = arith.constant 0 : i32
    %c0_i32_1 = arith.constant 0 : i32
    return %arg0, %c0_i32, %c0_i32_0 : i32, i32, i32
  }
  func.func @transform_1(%arg0: i32) -> (i32, i32, i32, i32) {
    %c0_i32 = arith.constant 0 : i32
    %c0_i32_0 = arith.constant 0 : i32
    %c0_i32_1 = arith.constant 0 : i32
    %c0_i32_2 = arith.constant 0 : i32
    %c0_i32_3 = arith.constant 0 : i32
    return %c0_i32, %c0_i32_0, %c0_i32_1, %c0_i32_2 : i32, i32, i32, i32
  }
  func.func @transform_2(%arg0: i32) -> (i32, i32, i32) {
    %c0_i32 = arith.constant 0 : i32
    %c0_i32_0 = arith.constant 0 : i32
    %c0_i32_1 = arith.constant 0 : i32
    %c0_i32_2 = arith.constant 0 : i32
    return %c0_i32, %c0_i32_0, %c0_i32_1 : i32, i32, i32
  }
  func.func @transform_3(%arg0: i32) -> (i32, i32, i32) {
    %c0_i32 = arith.constant 0 : i32
    %c0_i32_0 = arith.constant 0 : i32
    %c0_i32_1 = arith.constant 0 : i32
    %c0_i32_2 = arith.constant 0 : i32
    return %c0_i32, %c0_i32_0, %c0_i32_1 : i32, i32, i32
  }
  func.func @transform_4(%arg0: i32) -> (i32, i32, i32) {
    %c0_i32 = arith.constant 0 : i32
    %c0_i32_0 = arith.constant 0 : i32
    %c0_i32_1 = arith.constant 0 : i32
    %c0_i32_2 = arith.constant 0 : i32
    return %c0_i32, %c0_i32_0, %c0_i32_1 : i32, i32, i32
  }
  func.func @transform_5(%arg0: i32) -> (i32, i32) {
    %c0_i32 = arith.constant 0 : i32
    %c0_i32_0 = arith.constant 0 : i32
    %c0_i32_1 = arith.constant 0 : i32
    return %c0_i32, %c0_i32_0 : i32, i32
  }
  func.func @transform_6(%arg0: i32) -> (i32, i32) {
    %c0_i32 = arith.constant 0 : i32
    %c0_i32_0 = arith.constant 0 : i32
    %c0_i32_1 = arith.constant 0 : i32
    return %c0_i32, %c0_i32_0 : i32, i32
  }
  func.func @transform_7(%arg0: i32) -> (i32, i32) {
    %c0_i32 = arith.constant 0 : i32
    %c0_i32_0 = arith.constant 0 : i32
    %c0_i32_1 = arith.constant 0 : i32
    return %c0_i32, %c0_i32_0 : i32, i32
  }
  func.func @transform_8(%arg0: i32) -> (i32, i32) {
    %c0_i32 = arith.constant 0 : i32
    %c0_i32_0 = arith.constant 0 : i32
    %c0_i32_1 = arith.constant 0 : i32
    return %c0_i32, %c0_i32_0 : i32, i32
  }
  func.func @transform_9(%arg0: i32) -> (i32, i32) {
    %c0_i32 = arith.constant 0 : i32
    %c0_i32_0 = arith.constant 0 : i32
    %c0_i32_1 = arith.constant 0 : i32
    return %c0_i32, %c0_i32_0 : i32, i32
  }
  func.func @transform_10(%arg0: i32) -> (i32, i32, i32) {
    %c0_i32 = arith.constant 0 : i32
    %c0_i32_0 = arith.constant 0 : i32
    %c0_i32_1 = arith.constant 0 : i32
    return %arg0, %c0_i32, %c0_i32_0 : i32, i32, i32
  }
}

</mosaic_0001>

<bundles_post_ra>
// kernel: rca_forward.1
= control target key start
LH: loop header
LB: loop body
LE: loop exit
PB: predicated region body
PF: predicated region fallthrough
CT: control target
= control target key end

     0   :  { %s4558_s13 = smov 0   ;;  %s7878_s0 = inlined_call_operand.vmem [shape: f32[2,32,256], index: 0, kind: input, shape index: {}]   ;;  %s7879_s1 = inlined_call_operand.vmem [shape: f32[3,3,32,96], index: 1, kind: input, shape index: {}]   ;;  %s7880_s2 = inlined_call_operand.vmem [shape: f32[3,32,1], index: 2, kind: input, shape index: {}]   ;;  %s7881_s3 = inlined_call_operand.vmem [shape: f32[3,32,1], index: 3, kind: input, shape index: {}]   ;;  %s7882_s4 = inlined_call_operand.vmem [shape: f32[9,1,256], index: 4, kind: input, shape index: {}]   ;;  %s7883_s5 = inlined_call_operand.vmem [shape: f32[8,32], index: 5, kind: input, shape index: {}]   ;;  %s7884_s6 = inlined_call_operand.vmem [shape: f32[8,1], index: 6, kind: input, shape index: {}]   ;;  %s7885_s7 = inlined_call_operand.vmem [shape: f32[8,1], index: 7, kind: input, shape index: {}]   ;;  %s7886_s8 = inlined_call_operand.vmem [shape: f32[32,8], index: 8, kind: input, shape index: {}]   ;;  %s7887_s9 = inlined_call_operand.vmem [shape: f32[32,1], index: 9, kind: input, shape index: {}]   ;;  %s7888_s10 = inlined_call_operand.vmem [shape: f32[2,32,256], index: 10, kind: output, shape index: {}]  }
   0x1 LB: > { %s4295_s14 = sadd.s32 4294967295, %s4489_s13   ;;  %p4299_p0 = scmp.ge.s32.totalorder %s4489_s13, 1  ;;  %s4489_s13 = sphi %s4558_s13, %s20_s13  }
   0x2   : > { %p312_p1 = scmp.lt.s32.totalorder %s4489_s13, 3 }
   0x4   : > { %p313_p2 = pnand %p4299_p0, %p312_p1 }
   0x6   : > { %316 = sbr.rel (%p313_p2) target bundleno = 2863 (0xb2f), region = 60 }
   0xb   : > { %v370_v0 = vlaneseq  ;;  %v4307_v2 = vld [vmem:[%s7882_s4 + $0xa] sm:$0x3]  ;;  %v4305_v3 = vld [vmem:[%s7882_s4 + $0x4] sm:$0x3]  ;;  %s4491_s19 = smov 1   ;;  %s4492_s20 = smov 113  }
   0xc   : > { %v4322_v10 = vld [vmem:[%s7882_s4 + $0x10] sm:$0x3]  ;;  %p350_p3 = scmp.lt.s32.totalorder %s4295_s14, 1  ;;  %v4304_v13 = vld [vmem:[%s7882_s4 + $0x2] sm:$0x3]  ;;  %s4493_s25 = smov 17  }
   0xd   : > { %v371_v1 = vshrl.u32 %v370_v0, 7  ;;  %v4321_v16 = vld [vmem:[%s7882_s4 + $0xe] sm:$0x3]  ;;  %s4494_s29 = smov 112   ;;  %s4495_s15 = smov 16   ;;  %vm603_vm0 = vcmask 7168  }
   0xe   : > { %s8118_s14 = smov (!%p350_p3, %s4295_s14), 1  ;;  %s4496_s16 = smov 127   ;;  %v4306_v25 = vld [vmem:[%s7882_s4 + $0x6] sm:$0x3]  ;;  %vm446_vm1 = vcmask 924672   ;;  %vm1015_vm2 = vcmask 138240  }
   0xf   : > { %v4572_v4 = vsub.s32 0, %v371_v1  ;;  %v4574_v5 = vsub.s32 1, %v371_v1  ;;  %s4402_s28 = sshll.u32 %s8118_s14, 6  ;;  %s4497_s21 = smov 126   ;;  %vm414_vm3 = vcmask 916480   ;;  %vm1212_vm4 = vcmask 130048  }
  0x10   : > { %s4609_s12 = scalar_lea.vmem %s7878_s0, %s4402_s28  ;;  %s4498_s24 = smov 111   ;;  %vm499_vm5 = vcmask 1039360   ;;  %vm544_vm6 = vcmask 1031168   ;;  %vm382_vm7 = vcmask 908288   ;;  %vm1180_vm8 = vcmask 121856  }
  0x11   : > { %v594_v6 = vrot.slane %v4307_v2, %v4572_v4  ;;  %v437_v7 = vrot.slane %v4305_v3, %v4572_v4  ;;  %v598_v8 = vrot.slane %v4307_v2, %v4574_v5  ;;  %v441_v9 = vrot.slane %v4305_v3, %v4574_v5  ;;  %v4612_v19 = vld [vmem:[%s4609_s12 + $0x38] sm:$0xff]  ;;  %v4615_v20 = vld [vmem:[%s4609_s12 + $0x30] sm:$0xff]  ;;  %v4622_v21 = vld [vmem:[%s4609_s12 + $0x28] sm:$0xff] }
  0x12   : > { %v1235_v11 = vrot.slane %v4322_v10, %v4572_v4  ;;  %v1239_v12 = vrot.slane %v4322_v10, %v4574_v5  ;;  %v405_v14 = vrot.slane %v4304_v13, %v4572_v4  ;;  %v409_v15 = vrot.slane %v4304_v13, %v4574_v5  ;;  %v4625_v22 = vld [vmem:[%s4609_s12 + $0x20] sm:$0xff]  ;;  %v4632_v23 = vld [vmem:[%s4609_s12 + $0x18] sm:$0xff]  ;;  %v4635_v24 = vld [vmem:[%s4609_s12 + $0x10] sm:$0xff] }
  0x13   : > { %599 = vrot.lane.b32.xlu0 %v594_v6, %s4491_s19  ;;  %442 = vrot.lane.b32.xlu1 %v437_v7, %s4492_s20  ;;  %v1207_v17 = vrot.slane %v4321_v16, %v4574_v5  ;;  %v1203_v18 = vrot.slane %v4321_v16, %v4572_v4  ;;  %v567_v26 = vrot.slane %v4306_v25, %v4574_v5  ;;  %v4649_v28 = vld [vmem:[%s4609_s12 + $0x8] sm:$0xff]  ;;  %v4652_v29 = vld [vmem:[%s4609_s12] sm:$0xff]  ;;  %vm829_vm9 = vcmask 785408  }
  0x14   : > { %v563_v27 = vrot.slane %v4306_v25, %v4572_v4 }
  0x17   : > { %601 = vrot.lane.b32.xlu0 %v598_v8, %s4491_s19  ;;  %444 = vrot.lane.b32.xlu1 %v441_v9, %s4492_s20 }
  0x1b   : > { %1240 = vrot.lane.b32.xlu0 %v1235_v11, %s4493_s25  ;;  %1242 = vrot.lane.b32.xlu1 %v1239_v12, %s4493_s25 }
  0x1f   : > { %410 = vrot.lane.b32.xlu0 %v405_v14, %s4494_s29  ;;  %412 = vrot.lane.b32.xlu1 %v409_v15, %s4494_s29  ;;  %s4499_s29 = smov 15  }
  0x23   : > { %1210 = vrot.lane.b32.xlu1 %v1207_v17, %s4495_s15  ;;  %1208 = vrot.lane.b32.xlu0 %v1203_v18, %s4495_s15 }
  0x27   : > { %642 = vrot.lane.b32.xlu1 %v4612_v19, %s4496_s16  ;;  %640 = vrot.lane.b32.xlu0 %v4615_v20, %s4496_s16 }
  0x2b   : > { %638 = vrot.lane.b32.xlu1 %v4622_v21, %s4496_s16  ;;  %636 = vrot.lane.b32.xlu0 %v4625_v22, %s4496_s16 }
  0x2f   : > { %634 = vrot.lane.b32.xlu1 %v4632_v23, %s4496_s16  ;;  %632 = vrot.lane.b32.xlu0 %v4635_v24, %s4496_s16 }
  0x33   : > { %570 = vrot.lane.b32.xlu1 %v567_v26, %s4496_s16  ;;  %568 = vrot.lane.b32.xlu0 %v563_v27, %s4496_s16 }
  0x37   : > { %630 = vrot.lane.b32.xlu1 %v4649_v28, %s4496_s16  ;;  %628 = vrot.lane.b32.xlu0 %v4652_v29, %s4496_s16 }
  0x85   : > { %v4658_v30 = vpop.permute.xlu0 %599  ;;  %v4672_v36 = vpop.permute.xlu1 %442 }
  0x86   : > { %7962 = vst [vmem:[#allocation2_spill] sm:$0xff] %v4658_v30  ;;  %v614_v31 = vmul.f32 %v4658_v30, %v4625_v22  ;;  %v617_v32 = vmul.f32 %v4658_v30, %v4615_v20  ;;  %7964 = vst [vmem:[#allocation4_spill] sm:$0xff] %v4672_v36  ;;  %v611_v37 = vmul.f32 %v4658_v30, %v4635_v24 }
  0x87   : > { %v608_v38 = vmul.f32 %v4658_v30, %v4652_v29  ;;  %v460_v42 = vmul.f32 %v4672_v36, %v4612_v19  ;;  %v457_v46 = vmul.f32 %v4672_v36, %v4622_v21  ;;  %v454_v49 = vmul.f32 %v4672_v36, %v4632_v23 }
  0x88   : > { %672 = vrot.lane.b32.xlu1 %v614_v31, %s4497_s21  ;;  %678 = vrot.lane.b32.xlu0 %v617_v32, %s4497_s21  ;;  %v451_v52 = vmul.f32 %v4672_v36, %v4649_v28 }
  0x89   : > { %v4666_v33 = vpop.permute.xlu0 %601  ;;  %v4682_v39 = vpop.permute.xlu1 %444 }
  0x8a   : > { %7963 = vst [vmem:[#allocation3_spill] sm:$0xff] %v4666_v33  ;;  %v616_v34 = vmul.f32 %v4666_v33, %v4625_v22  ;;  %v619_v35 = vmul.f32 %v4666_v33, %v4615_v20  ;;  %7965 = vst [vmem:[#allocation5_spill] sm:$0xff] %v4682_v39  ;;  %v613_v40 = vmul.f32 %v4666_v33, %v4635_v24 }
  0x8b   : > { %v610_v41 = vmul.f32 %v4666_v33, %v4652_v29  ;;  %v462_v43 = vmul.f32 %v4682_v39, %v4612_v19  ;;  %v459_v44 = vmul.f32 %v4682_v39, %v4622_v21  ;;  %v456_v54 = vmul.f32 %v4682_v39, %v4632_v23 }
  0x8c   : > { %676 = vrot.lane.b32.xlu1 %v616_v34, %s4497_s21  ;;  %682 = vrot.lane.b32.xlu0 %v619_v35, %s4497_s21  ;;  %v4733_v57 = vsel %vm603_vm0, %v4658_v30, %v4666_v33  ;;  %v453_v60 = vmul.f32 %v4682_v39, %v4649_v28  ;;  %v4750_v62 = vsel %vm446_vm1, %v4672_v36, %v4682_v39 }
  0x8d   : > { %v4698_v45 = vpop.permute.xlu1 %1242  ;;  %v4706_v48 = vpop.permute.xlu0 %1240  ;;  %7969 = vst [vmem:[#allocation9_spill] sm:$0xff] %v4733_v57  ;;  %v618_v59 = vmul.f32 %v4733_v57, %v4612_v19  ;;  %v612_v61 = vmul.f32 %v4733_v57, %v4632_v23  ;;  %7970 = vst [vmem:[#allocation10_spill] sm:$0xff] %v4750_v62  ;;  %v458_v0 = vmul.f32 %v4750_v62, %v4625_v22 }
  0x8e   : > { %7966 = vst [vmem:[#allocation6_spill] sm:$0xff] %v4698_v45  ;;  %v1259_v47 = vmul.f32 %v4698_v45, %v4615_v20  ;;  %7967 = vst [vmem:[#allocation7_spill] sm:$0xff] %v4706_v48  ;;  %v1257_v50 = vmul.f32 %v4706_v48, %v4615_v20  ;;  %v1256_v56 = vmul.f32 %v4698_v45, %v4625_v22 }
  0x8f   : > { %v1254_v58 = vmul.f32 %v4706_v48, %v4625_v22  ;;  %v1253_v63 = vmul.f32 %v4698_v45, %v4635_v24  ;;  %v4761_v1 = vsel %vm1015_vm2, %v4706_v48, %v4698_v45  ;;  %v1251_v2 = vmul.f32 %v4706_v48, %v4635_v24 }
  0x90   : > { %666 = vrot.lane.b32.xlu0 %v611_v37, %s4497_s21  ;;  %660 = vrot.lane.b32.xlu1 %v608_v38, %s4497_s21  ;;  %7971 = vst [vmem:[#allocation11_spill] sm:$0xff] %v4761_v1  ;;  %v1258_v3 = vmul.f32 %v4761_v1, %v4612_v19  ;;  %v455_v8 = vmul.f32 %v4750_v62, %v4635_v24 }
  0x91   : > { %v4714_v51 = vpop.permute.xlu0 %410  ;;  %v4769_v6 = vpop.permute.xlu1 %412  ;;  %v1250_v9 = vmul.f32 %v4698_v45, %v4652_v29  ;;  %v1255_v10 = vmul.f32 %v4761_v1, %v4622_v21  ;;  %v1248_v11 = vmul.f32 %v4706_v48, %v4652_v29  ;;  %v452_v12 = vmul.f32 %v4750_v62, %v4652_v29 }
  0x92   : > { %7968 = vst [vmem:[#allocation8_spill] sm:$0xff] %v4714_v51  ;;  %v428_v53 = vmul.f32 %v4714_v51, %v4612_v19  ;;  %v425_v55 = vmul.f32 %v4714_v51, %v4622_v21  ;;  %7972 = vst [vmem:[#allocation12_spill] sm:$0xff] %v4769_v6  ;;  %v430_v7 = vmul.f32 %v4769_v6, %v4612_v19 }
  0x93   : > { %v427_v14 = vmul.f32 %v4769_v6, %v4622_v21  ;;  %v1252_v15 = vmul.f32 %v4761_v1, %v4632_v23  ;;  %v4799_v16 = vsel %vm414_vm3, %v4714_v51, %v4769_v6  ;;  %v615_v25 = vmul.f32 %v4733_v57, %v4622_v21 }
  0x94   : > { %670 = vrot.lane.b32.xlu0 %v613_v40, %s4497_s21  ;;  %664 = vrot.lane.b32.xlu1 %v610_v41, %s4497_s21  ;;  %7974 = vst [vmem:[#allocation14_spill] sm:$0xff] %v4799_v16  ;;  %v429_v18 = vmul.f32 %v4799_v16, %v4615_v20  ;;  %v1249_v26 = vmul.f32 %v4761_v1, %v4649_v28 }
  0x95   : > { %v4791_v13 = vpop.permute.xlu1 %1210  ;;  %v4813_v27 = vpop.permute.xlu0 %1208  ;;  %v609_v31 = vmul.f32 %v4733_v57, %v4649_v28  ;;  %v426_v32 = vmul.f32 %v4799_v16, %v4625_v22  ;;  %v461_v35 = vmul.f32 %v4750_v62, %v4615_v20 }
  0x96   : > { %7973 = vst [vmem:[#allocation13_spill] sm:$0xff] %v4791_v13  ;;  %v1228_v17 = vmul.f32 %v4791_v13, %v4615_v20  ;;  %7975 = vst [vmem:[#allocation15_spill] sm:$0xff] %v4813_v27  ;;  %v4823_v34 = vsel %vm1212_vm4, %v4813_v27, %v4791_v13  ;;  %v1226_v38 = vmul.f32 %v4813_v27, %v4615_v20 }
  0x97   : > { %7976 = vst [vmem:[#allocation16_spill] sm:$0xff] %v4823_v34  ;;  %v1227_v37 = vmul.f32 %v4823_v34, %v4612_v19 }
  0x98   : > { %538 = vrot.lane.b32.xlu0 %v460_v42, %s4497_s21  ;;  %542 = vrot.lane.b32.xlu1 %v462_v43, %s4497_s21  ;;  %v423_v42 = vmul.f32 %v4799_v16, %v4635_v24  ;;  %v424_v43 = vmul.f32 %v4769_v6, %v4632_v23 }
  0x99   : > { %v4835_v40 = vpop.permute.xlu1 %642  ;;  %v4837_v41 = vpop.permute.xlu0 %640 }
  0x9c   : > { %536 = vrot.lane.b32.xlu0 %v459_v44, %s4497_s21  ;;  %532 = vrot.lane.b32.xlu1 %v457_v46, %s4497_s21  ;;  %v1224_v44 = vmul.f32 %v4823_v34, %v4622_v21 }
  0x9d   : > { %v4847_v46 = vpop.permute.xlu1 %638 }
  0xa0   : > { %1338 = vrot.lane.b32.xlu0 %v1259_v47, %s4497_s21  ;;  %526 = vrot.lane.b32.xlu1 %v454_v49, %s4497_s21  ;;  %v4849_v47 = vpop.permute.xlu0 %636  ;;  %v368_v49 = vld [vmem:[%s7882_s4] sm:$0x3] }
  0xa4   : > { %1334 = vrot.lane.b32.xlu0 %v1257_v50, %s4497_s21  ;;  %520 = vrot.lane.b32.xlu1 %v451_v52, %s4497_s21  ;;  %v1225_v50 = vmul.f32 %v4791_v13, %v4625_v22  ;;  %v422_v52 = vmul.f32 %v4714_v51, %v4632_v23 }
  0xa8   : > { %530 = vrot.lane.b32.xlu0 %v456_v54, %s4497_s21  ;;  %493 = vrot.lane.b32.xlu1 %v428_v53, %s4496_s16  ;;  %v373_v53 = vrot.slane %v368_v49, %v4572_v4  ;;  %v635_v54 = vpop.permute.xlu1 %634 }
  0xac   : > { %1332 = vrot.lane.b32.xlu0 %v1256_v56, %s4497_s21  ;;  %487 = vrot.lane.b32.xlu1 %v425_v55, %s4496_s16  ;;  %v4863_v55 = vpop.permute.xlu0 %632  ;;  %v1223_v56 = vmul.f32 %v4813_v27, %v4625_v22 }
  0xb0   : > { %1328 = vrot.lane.b32.xlu0 %v1254_v58, %s4497_s21  ;;  %680 = vrot.lane.b32.xlu1 %v618_v59, %s4497_s21  ;;  %v377_v58 = vrot.slane %v368_v49, %v4574_v5  ;;  %v420_v59 = vmul.f32 %v4799_v16, %v4652_v29 }
  0xb4   : > { %524 = vrot.lane.b32.xlu0 %v453_v60, %s4497_s21  ;;  %668 = vrot.lane.b32.xlu1 %v612_v61, %s4497_s21  ;;  %v4871_v60 = vpop.permute.xlu1 %570  ;;  %v4873_v61 = vpop.permute.xlu0 %568 }
  0xb5   : > { %7977 = vst [vmem:[#allocation17_spill] sm:$0xff] %v4871_v60  ;;  %7978 = vst [vmem:[#allocation18_spill] sm:$0xff] %v4873_v61 }
  0xb8   : > { %1326 = vrot.lane.b32.xlu0 %v1253_v63, %s4497_s21  ;;  %534 = vrot.lane.b32.xlu1 %v458_v0, %s4497_s21  ;;  %v421_v63 = vmul.f32 %v4769_v6, %v4649_v28  ;;  %v1221_v0 = vmul.f32 %v4823_v34, %v4632_v23 }
  0xbc   : > { %1322 = vrot.lane.b32.xlu0 %v1251_v2, %s4497_s21  ;;  %1336 = vrot.lane.b32.xlu1 %v1258_v3, %s4497_s21  ;;  %v631_v2 = vpop.permute.xlu1 %630  ;;  %v629_v3 = vpop.permute.xlu0 %628 }
  0xc0   : > { %497 = vrot.lane.b32.xlu0 %v430_v7, %s4496_s16  ;;  %528 = vrot.lane.b32.xlu1 %v455_v8, %s4497_s21  ;;  %v4320_v7 = vld [vmem:[%s7882_s4 + $0xc] sm:$0x3]  ;;  %v1222_v8 = vmul.f32 %v4791_v13, %v4635_v24 }
  0xc4   : > { %1320 = vrot.lane.b32.xlu0 %v1250_v9, %s4497_s21  ;;  %1330 = vrot.lane.b32.xlu1 %v1255_v10, %s4497_s21  ;;  %v419_v9 = vmul.f32 %v4714_v51, %v4649_v28  ;;  %v1171_v10 = vrot.slane %v4320_v7, %v4572_v4  ;;  %v1218_v4 = vmul.f32 %v4823_v34, %v4649_v28 }
  0xc8   : > { %1316 = vrot.lane.b32.xlu0 %v1248_v11, %s4497_s21  ;;  %522 = vrot.lane.b32.xlu1 %v452_v12, %s4497_s21 }
  0xcc   : > { %491 = vrot.lane.b32.xlu0 %v427_v14, %s4496_s16  ;;  %1324 = vrot.lane.b32.xlu1 %v1252_v15, %s4497_s21  ;;  %v1220_v14 = vmul.f32 %v4813_v27, %v4635_v24  ;;  %v1175_v15 = vrot.slane %v4320_v7, %v4574_v5  ;;  %v1217_v5 = vmul.f32 %v4813_v27, %v4652_v29 }
  0xd0   : > { %1294 = vrot.lane.b32.xlu0 %v1228_v17, %s4496_s16  ;;  %495 = vrot.lane.b32.xlu1 %v429_v18, %s4496_s16 }
  0xd4   : > { %674 = vrot.lane.b32.xlu0 %v615_v25, %s4497_s21  ;;  %1318 = vrot.lane.b32.xlu1 %v1249_v26, %s4497_s21 }
  0xd8   : > { %662 = vrot.lane.b32.xlu0 %v609_v31, %s4497_s21  ;;  %489 = vrot.lane.b32.xlu1 %v426_v32, %s4496_s16  ;;  %v1219_v31 = vmul.f32 %v4791_v13, %v4652_v29 }
  0xdc   : > { %540 = vrot.lane.b32.xlu0 %v461_v35, %s4497_s21  ;;  %1292 = vrot.lane.b32.xlu1 %v1227_v37, %s4496_s16  ;;  %v647_v37 = vsel %vm499_vm5, %v4837_v41, %v4835_v40 }
  0xe0   : > { %1290 = vrot.lane.b32.xlu0 %v1226_v38, %s4496_s16  ;;  %483 = vrot.lane.b32.xlu1 %v423_v42, %s4496_s16 }
  0xe4   : > { %485 = vrot.lane.b32.xlu0 %v424_v43, %s4496_s16  ;;  %1286 = vrot.lane.b32.xlu1 %v1224_v44, %s4496_s16  ;;  %v646_v43 = vsel %vm499_vm5, %v4849_v47, %v4847_v46 }
  0xe8   : > { %1288 = vrot.lane.b32.xlu0 %v1225_v50, %s4496_s16  ;;  %481 = vrot.lane.b32.xlu1 %v422_v52, %s4496_s16  ;;  %v645_v52 = vsel %vm499_vm5, %v4863_v55, %v635_v54 }
  0xec   : > { %1284 = vrot.lane.b32.xlu0 %v1223_v56, %s4496_s16  ;;  %378 = vrot.lane.b32.xlu1 %v373_v53, %s4498_s24 }
  0xf0   : > { %380 = vrot.lane.b32.xlu0 %v377_v58, %s4498_s24  ;;  %477 = vrot.lane.b32.xlu1 %v420_v59, %s4496_s16  ;;  %v4968_v58 = vsel %vm499_vm5, %v4873_v61, %v4871_v60 }
  0xf1   : > { %7979 = vst [vmem:[#allocation19_spill] sm:$0xff] %v4968_v58 }
  0xf4   : > { %479 = vrot.lane.b32.xlu0 %v421_v63, %s4496_s16  ;;  %1280 = vrot.lane.b32.xlu1 %v1221_v0, %s4496_s16  ;;  %v587_v63 = vmul.f32 %v4871_v60, %v4612_v19 }
  0xf8   : > { %1282 = vrot.lane.b32.xlu0 %v1222_v8, %s4496_s16  ;;  %475 = vrot.lane.b32.xlu1 %v419_v9, %s4496_s16 }
  0xfa   : > { %v4892_v11 = vpop.permute.xlu1 %672  ;;  %v4894_v12 = vpop.permute.xlu0 %678 }
  0xfc   : > { %1278 = vrot.lane.b32.xlu0 %v1220_v14, %s4496_s16  ;;  %1176 = vrot.lane.b32.xlu1 %v1171_v10, %s4499_s29  ;;  %v584_v10 = vmul.f32 %v4871_v60, %v4622_v21  ;;  %v582_v14 = vmul.f32 %v4873_v61, %v4622_v21 }
  0xfe   : > { %v4900_v17 = vpop.permute.xlu1 %676  ;;  %v4902_v18 = vpop.permute.xlu0 %682 }
 0x100   : > { %1178 = vrot.lane.b32.xlu0 %v1175_v15, %s4499_s29  ;;  %1274 = vrot.lane.b32.xlu1 %v1218_v4, %s4496_s16 }
 0x102   : > { %v4907_v25 = vpop.permute.xlu0 %666  ;;  %v4909_v26 = vpop.permute.xlu1 %660 }
 0x104   : > { %1276 = vrot.lane.b32.xlu0 %v1219_v31, %s4496_s16  ;;  %1272 = vrot.lane.b32.xlu1 %v1217_v5, %s4496_s16  ;;  %v580_v31 = vmul.f32 %v4968_v58, %v4635_v24  ;;  %v581_v5 = vmul.f32 %v4871_v60, %v4632_v23 }
 0x106   : > { %v4917_v32 = vpop.permute.xlu0 %670  ;;  %v4919_v35 = vpop.permute.xlu1 %664 }
 0x108   : > { %753 = vrot.lane.b32.xlu0 %v647_v37, %s4491_s19  ;;  %755 = vrot.lane.b32.xlu1 %v4835_v40, %s4491_s19 }
 0x10a   : > { %v4927_v38 = vpop.permute.xlu0 %538  ;;  %v4929_v42 = vpop.permute.xlu1 %542 }
 0x10c   : > { %751 = vrot.lane.b32.xlu0 %v4837_v41, %s4491_s19  ;;  %747 = vrot.lane.b32.xlu1 %v646_v43, %s4491_s19 }
 0x10e   : > { %v4937_v44 = vpop.permute.xlu0 %536  ;;  %v4939_v49 = vpop.permute.xlu1 %532 }
 0x110   : > { %749 = vrot.lane.b32.xlu0 %v4847_v46, %s4491_s19  ;;  %745 = vrot.lane.b32.xlu1 %v4849_v47, %s4491_s19  ;;  %v644_v46 = vsel %vm499_vm5, %v629_v3, %v631_v2 }
 0x112   : > { %v4945_v40 = vpop.permute.xlu0 %1338  ;;  %v4947_v50 = vpop.permute.xlu1 %526 }
 0x114   : > { %741 = vrot.lane.b32.xlu0 %v645_v52, %s4491_s19  ;;  %743 = vrot.lane.b32.xlu1 %v635_v54, %s4491_s19  ;;  %v579_v52 = vmul.f32 %v4873_v61, %v4632_v23 }
 0x116   : > { %v4953_v41 = vpop.permute.xlu0 %1334  ;;  %v4955_v53 = vpop.permute.xlu1 %520 }
 0x118   : > { %739 = vrot.lane.b32.xlu0 %v4863_v55, %s4491_s19  ;;  %735 = vrot.lane.b32.xlu1 %v644_v46, %s4491_s19  ;;  %v586_v55 = vmul.f32 %v4968_v58, %v4615_v20  ;;  %v577_v46 = vmul.f32 %v4968_v58, %v4652_v29 }
 0x11a   : > { %v4961_v47 = vpop.permute.xlu0 %530  ;;  %v4963_v56 = vpop.permute.xlu1 %493 }
 0x11c   : > { %737 = vrot.lane.b32.xlu0 %v631_v2, %s4491_s19  ;;  %733 = vrot.lane.b32.xlu1 %v629_v3, %s4491_s19  ;;  %v585_v2 = vmul.f32 %v4873_v61, %v4612_v19  ;;  %v583_v3 = vmul.f32 %v4968_v58, %v4625_v22 }
 0x11e   : > { %v4972_v54 = vpop.permute.xlu0 %1332  ;;  %v4974_v59 = vpop.permute.xlu1 %487 }
 0x120   : > { %729 = vrot.lane.b32.xlu0 %v586_v55, %s4491_s19  ;;  %731 = vrot.lane.b32.xlu1 %v587_v63, %s4491_s19 }
 0x122   : > { %v4982_v0 = vpop.permute.xlu0 %1328  ;;  %v681_v7 = vpop.permute.xlu1 %680 }
 0x123   : > { %v690_v34 = vsel %vm544_vm6, %v4894_v12, %v681_v7 }
 0x124   : > { %727 = vrot.lane.b32.xlu0 %v585_v2, %s4491_s19  ;;  %723 = vrot.lane.b32.xlu1 %v583_v3, %s4491_s19  ;;  %v578_v2 = vmul.f32 %v4871_v60, %v4649_v28  ;;  %v576_v3 = vmul.f32 %v4873_v61, %v4649_v28 }
 0x126   : > { %v4990_v8 = vpop.permute.xlu0 %524  ;;  %v669_v9 = vpop.permute.xlu1 %668 }
 0x128   : > { %725 = vrot.lane.b32.xlu0 %v584_v10, %s4491_s19  ;;  %721 = vrot.lane.b32.xlu1 %v582_v14, %s4491_s19 }
 0x12a   : > { %v4998_v15 = vpop.permute.xlu0 %1326  ;;  %v5000_v4 = vpop.permute.xlu1 %534 }
 0x12c   : > { %717 = vrot.lane.b32.xlu0 %v580_v31, %s4491_s19  ;;  %719 = vrot.lane.b32.xlu1 %v581_v5, %s4491_s19 }
 0x12e   : > { %v5008_v37 = vpop.permute.xlu0 %1322  ;;  %v5010_v43 = vpop.permute.xlu1 %1336 }
 0x130   : > { %715 = vrot.lane.b32.xlu0 %v579_v52, %s4491_s19  ;;  %711 = vrot.lane.b32.xlu1 %v577_v46, %s4491_s19 }
 0x132   : > { %v5018_v55 = vpop.permute.xlu0 %497  ;;  %v5020_v63 = vpop.permute.xlu1 %528 }
 0x134   : > { %713 = vrot.lane.b32.xlu0 %v578_v2, %s4491_s19  ;;  %709 = vrot.lane.b32.xlu1 %v576_v3, %s4491_s19  ;;  %v691_v2 = vsel %vm544_vm6, %v681_v7, %v4902_v18 }
 0x136   : > { %v5028_v10 = vpop.permute.xlu0 %1320  ;;  %v5030_v14 = vpop.permute.xlu1 %1330 }
 0x138   : > { %775 = vrot.lane.b32.xlu0 %v4894_v12, %s4491_s19  ;;  %769 = vrot.lane.b32.xlu1 %v4892_v11, %s4491_s19  ;;  %v686_v12 = vsel %vm544_vm6, %v4907_v25, %v669_v9 }
 0x13a   : > { %v5036_v31 = vpop.permute.xlu0 %1316  ;;  %v5038_v5 = vpop.permute.xlu1 %522 }
 0x13c   : > { %763 = vrot.lane.b32.xlu0 %v4907_v25, %s4491_s19  ;;  %757 = vrot.lane.b32.xlu1 %v4909_v26, %s4491_s19 }
 0x13e   : > { %v5044_v52 = vpop.permute.xlu0 %491  ;;  %v5046_v46 = vpop.permute.xlu1 %1324 }
 0x140   : > { %1013 = vrot.lane.b32.xlu0 %v4929_v42, %s4493_s25  ;;  %779 = vrot.lane.b32.xlu1 %v691_v2, %s4491_s19 }
 0x142   : > { %v5053_v3 = vpop.permute.xlu0 %1294  ;;  %v5055_v61 = vpop.permute.xlu1 %495 }
 0x144   : > { %777 = vrot.lane.b32.xlu0 %v690_v34, %s4491_s19  ;;  %v687_v34 = vsel %vm544_vm6, %v669_v9, %v4917_v32 }
 0x146   : > { %v675_v51 = vpop.permute.xlu0 %674  ;;  %v5060_v1 = vpop.permute.xlu1 %1318 }
 0x147   : > { %v689_v18 = vsel %vm544_vm6, %v675_v51, %v4900_v17  ;;  %v688_v60 = vsel %vm544_vm6, %v4892_v11, %v675_v51 }
 0x148   : > { %773 = vrot.lane.b32.xlu0 %v689_v18, %s4491_s19  ;;  %771 = vrot.lane.b32.xlu1 %v688_v60, %s4491_s19  ;;  %v550_v18 = vsel %vm544_vm6, %v5000_v4, %v4937_v44 }
 0x14a   : > { %v663_v2 = vpop.permute.xlu0 %662  ;;  %v5068_v36 = vpop.permute.xlu1 %489 }
 0x14b   : > { %v685_v51 = vsel %vm544_vm6, %v663_v2, %v4919_v35  ;;  %v684_v60 = vsel %vm544_vm6, %v4909_v26, %v663_v2  ;;  %v7901_v2 = vmov 0.0  }
 0x14c   : > { %765 = vrot.lane.b32.xlu0 %v686_v12, %s4491_s19  ;;  %767 = vrot.lane.b32.xlu1 %v687_v34, %s4491_s19  ;;  %v1347_v12 = vsel %vm544_vm6, %v5010_v43, %v4945_v40 }
 0x14d   : > { %906 = vmatprep.mubr.f32.mxu0 %v7901_v2  ;;  %1140 = vmatprep.mubr.f32.mxu1 %v7901_v2 }
 0x14e   : > { %v541_v17 = vpop.permute.xlu0 %540  ;;  %v5076_v7 = vpop.permute.xlu1 %1292 }
 0x14f   : > { %v551_v32 = vsel %vm544_vm6, %v4927_v38, %v541_v17  ;;  %v552_v9 = vsel %vm544_vm6, %v541_v17, %v4929_v42 }
 0x150   : > { %761 = vrot.lane.b32.xlu0 %v685_v51, %s4491_s19  ;;  %759 = vrot.lane.b32.xlu1 %v684_v60, %s4491_s19  ;;  %v549_v51 = vsel %vm544_vm6, %v4939_v49, %v5000_v4  ;;  %v1345_v4 = vsel %vm544_vm6, %v5030_v14, %v4972_v54 }
 0x152   : > { %v5084_v11 = vpop.permute.xlu0 %1290  ;;  %v5086_v25 = vpop.permute.xlu1 %483 }
 0x154   : > { %1009 = vrot.lane.b32.xlu0 %v551_v32, %s4493_s25  ;;  %1011 = vrot.lane.b32.xlu1 %v552_v9, %s4493_s25  ;;  %v548_v32 = vsel %vm544_vm6, %v5020_v63, %v4961_v47 }
 0x156   : > { %v5094_v35 = vpop.permute.xlu0 %485  ;;  %v5096_v26 = vpop.permute.xlu1 %1286 }
 0x158   : > { %1007 = vrot.lane.b32.xlu0 %v4937_v44, %s4493_s25  ;;  %1005 = vrot.lane.b32.xlu1 %v550_v18, %s4493_s25  ;;  %v1346_v44 = vsel %vm544_vm6, %v4953_v41, %v5010_v43  ;;  %v547_v18 = vsel %vm544_vm6, %v4947_v50, %v5020_v63  ;;  %v1343_v63 = vsel %vm544_vm6, %v5046_v46, %v4998_v15 }
 0x15a   : > { %v5106_v38 = vpop.permute.xlu0 %1288  ;;  %v5108_v42 = vpop.permute.xlu1 %481 }
 0x15c   : > { %1435 = vrot.lane.b32.xlu0 %v4945_v40, %s4492_s20  ;;  %1433 = vrot.lane.b32.xlu1 %v1347_v12, %s4492_s20 }
 0x15e   : > { %v5116_v34 = vpop.permute.xlu0 %1284  ;;  %v5118_v17 = vpop.permute.xlu1 %378 }
 0x15f   : > { %7980 = vst [vmem:[#allocation20_spill] sm:$0xff] %v5118_v17 }
 0x160   : > { %1431 = vrot.lane.b32.xlu0 %v1346_v44, %s4492_s20  ;;  %1003 = vrot.lane.b32.xlu1 %v549_v51, %s4493_s25  ;;  %v546_v44 = vsel %vm544_vm6, %v5038_v5, %v4990_v8 }
 0x162   : > { %v5128_v60 = vpop.permute.xlu0 %380  ;;  %v5130_v40 = vpop.permute.xlu1 %477 }
 0x163   : > { %7981 = vst [vmem:[#allocation21_spill] sm:$0xff] %v5128_v60 }
 0x164   : > { %1001 = vrot.lane.b32.xlu0 %v4961_v47, %s4493_s25  ;;  %999 = vrot.lane.b32.xlu1 %v548_v32, %s4493_s25  ;;  %v1344_v47 = vsel %vm544_vm6, %v4982_v0, %v5030_v14  ;;  %v545_v32 = vsel %vm544_vm6, %v4955_v53, %v5038_v5  ;;  %v1341_v5 = vsel %vm544_vm6, %v5060_v1, %v5028_v10 }
 0x166   : > { %v5138_v41 = vpop.permute.xlu0 %479  ;;  %v5140_v49 = vpop.permute.xlu1 %1280 }
 0x168   : > { %1429 = vrot.lane.b32.xlu0 %v4972_v54, %s4492_s20  ;;  %1427 = vrot.lane.b32.xlu1 %v1345_v4, %s4492_s20 }
 0x16a   : > { %v5148_v43 = vpop.permute.xlu0 %1282  ;;  %v5150_v9 = vpop.permute.xlu1 %475 }
 0x16c   : > { %1425 = vrot.lane.b32.xlu0 %v1344_v47, %s4492_s20  ;;  %997 = vrot.lane.b32.xlu1 %v547_v18, %s4493_s25  ;;  %v507_v47 = vsel %vm499_vm5, %v5055_v61, %v5018_v55 }
 0x16e   : > { %v5160_v12 = vpop.permute.xlu0 %1278  ;;  %v5162_v54 = vpop.permute.xlu1 %1176 }
 0x16f   : > { %7982 = vst [vmem:[#allocation22_spill] sm:$0xff] %v5162_v54 }
 0x170   : > { %995 = vrot.lane.b32.xlu0 %v4990_v8, %s4493_s25  ;;  %993 = vrot.lane.b32.xlu1 %v546_v44, %s4493_s25  ;;  %v1342_v8 = vsel %vm544_vm6, %v5008_v37, %v5046_v46  ;;  %v506_v44 = vsel %vm499_vm5, %v4963_v56, %v5055_v61  ;;  %v1303_v56 = vsel %vm499_vm5, %v5076_v7, %v5053_v3 }
 0x172   : > { %v5170_v0 = vpop.permute.xlu0 %1178  ;;  %v5172_v50 = vpop.permute.xlu1 %1274 }
 0x173   : > { %7983 = vst [vmem:[#allocation23_spill] sm:$0xff] %v5170_v0 }
 0x174   : > { %1423 = vrot.lane.b32.xlu0 %v4998_v15, %s4492_s20  ;;  %1421 = vrot.lane.b32.xlu1 %v1343_v63, %s4492_s20 }
 0x176   : > { %v5180_v14 = vpop.permute.xlu0 %1276  ;;  %v5182_v51 = vpop.permute.xlu1 %1272 }
 0x178   : > { %1419 = vrot.lane.b32.xlu0 %v1342_v8, %s4492_s20  ;;  %991 = vrot.lane.b32.xlu1 %v545_v32, %s4493_s25  ;;  %v505_v8 = vsel %vm499_vm5, %v5068_v36, %v5044_v52 }
 0x17a   : > { %v5192_v4 = vpop.permute.xlu0 %753  ;;  %v5194_v15 = vpop.permute.xlu1 %755 }
 0x17c   : > { %989 = vrot.lane.b32.xlu0 %v5018_v55, %s4493_s25  ;;  %987 = vrot.lane.b32.xlu1 %v507_v47, %s4493_s25  ;;  %v1340_v55 = vsel %vm544_vm6, %v5036_v31, %v5060_v1  ;;  %v504_v47 = vsel %vm499_vm5, %v4974_v59, %v5068_v36  ;;  %v1301_v59 = vsel %vm499_vm5, %v5096_v26, %v5106_v38 }
 0x17e   : > { %v5202_v37 = vpop.permute.xlu0 %751  ;;  %v5204_v53 = vpop.permute.xlu1 %747 }
 0x180   : > { %1417 = vrot.lane.b32.xlu0 %v5028_v10, %s4492_s20  ;;  %1415 = vrot.lane.b32.xlu1 %v1341_v5, %s4492_s20 }
 0x182   : > { %v5212_v46 = vpop.permute.xlu0 %749  ;;  %v5214_v18 = vpop.permute.xlu1 %745 }
 0x184   : > { %1413 = vrot.lane.b32.xlu0 %v1340_v55, %s4492_s20  ;;  %985 = vrot.lane.b32.xlu1 %v506_v44, %s4493_s25  ;;  %v503_v55 = vsel %vm499_vm5, %v5086_v25, %v5094_v35 }
 0x186   : > { %v5224_v63 = vpop.permute.xlu0 %741  ;;  %v5226_v10 = vpop.permute.xlu1 %743 }
 0x188   : > { %983 = vrot.lane.b32.xlu0 %v5044_v52, %s4493_s25  ;;  %981 = vrot.lane.b32.xlu1 %v505_v8, %s4493_s25  ;;  %v1302_v52 = vsel %vm499_vm5, %v5084_v11, %v5076_v7  ;;  %v1300_v8 = vsel %vm499_vm5, %v5116_v34, %v5096_v26 }
 0x18a   : > { %v5234_v1 = vpop.permute.xlu0 %739  ;;  %v5236_v61 = vpop.permute.xlu1 %735 }
 0x18c   : > { %1411 = vrot.lane.b32.xlu0 %v5053_v3, %s4492_s20  ;;  %1409 = vrot.lane.b32.xlu1 %v1303_v56, %s4492_s20 }
 0x18e   : > { %v5244_v31 = vpop.permute.xlu0 %737  ;;  %v5246_v32 = vpop.permute.xlu1 %733 }
 0x190   : > { %1407 = vrot.lane.b32.xlu0 %v1302_v52, %s4492_s20  ;;  %979 = vrot.lane.b32.xlu1 %v504_v47, %s4493_s25  ;;  %v501_v52 = vsel %vm499_vm5, %v5130_v40, %v5138_v41 }
 0x192   : > { %v5256_v5 = vpop.permute.xlu0 %729  ;;  %v5258_v3 = vpop.permute.xlu1 %731 }
 0x194   : > { %977 = vrot.lane.b32.xlu0 %v5094_v35, %s4493_s25  ;;  %975 = vrot.lane.b32.xlu1 %v503_v55, %s4493_s25  ;;  %v502_v35 = vsel %vm499_vm5, %v5108_v42, %v5086_v25  ;;  %v1299_v42 = vsel %vm499_vm5, %v5140_v49, %v5148_v43  ;;  %v1298_v55 = vsel %vm499_vm5, %v5160_v12, %v5140_v49 }
 0x196   : > { %v5266_v7 = vpop.permute.xlu0 %727  ;;  %v5268_v36 = vpop.permute.xlu1 %723 }
 0x198   : > { %1405 = vrot.lane.b32.xlu0 %v5106_v38, %s4492_s20  ;;  %1403 = vrot.lane.b32.xlu1 %v1301_v59, %s4492_s20  ;;  %v5320_v59 = vsel %vm382_vm7, %v5118_v17, %v5128_v60 }
 0x199   : > { %7984 = vst [vmem:[#allocation24_spill] sm:$0xff] %v5320_v59 }
 0x19a   : > { %v5276_v11 = vpop.permute.xlu0 %725  ;;  %v5278_v44 = vpop.permute.xlu1 %721 }
 0x19c   : > { %1401 = vrot.lane.b32.xlu0 %v1300_v8, %s4492_s20  ;;  %973 = vrot.lane.b32.xlu1 %v502_v35, %s4493_s25  ;;  %v398_v8 = vmul.f32 %v5128_v60, %v4612_v19 }
 0x19e   : > { %v5288_v56 = vpop.permute.xlu0 %717  ;;  %v5290_v38 = vpop.permute.xlu1 %719 }
 0x1a0   : > { %971 = vrot.lane.b32.xlu0 %v5138_v41, %s4493_s25  ;;  %969 = vrot.lane.b32.xlu1 %v501_v52, %s4493_s25  ;;  %v500_v41 = vsel %vm499_vm5, %v5150_v9, %v5130_v40  ;;  %v397_v40 = vmul.f32 %v5320_v59, %v4615_v20  ;;  %v1297_v9 = vsel %vm499_vm5, %v5172_v50, %v5180_v14 }
 0x1a2   : > { %v5298_v25 = vpop.permute.xlu0 %715  ;;  %v5300_v26 = vpop.permute.xlu1 %711 }
 0x1a4   : > { %1399 = vrot.lane.b32.xlu0 %v5148_v43, %s4492_s20  ;;  %1397 = vrot.lane.b32.xlu1 %v1299_v42, %s4492_s20  ;;  %v396_v42 = vmul.f32 %v5118_v17, %v4612_v19 }
 0x1a6   : > { %v5308_v34 = vpop.permute.xlu0 %713  ;;  %v5310_v47 = vpop.permute.xlu1 %709 }
 0x1a8   : > { %1395 = vrot.lane.b32.xlu0 %v1298_v55, %s4492_s20  ;;  %967 = vrot.lane.b32.xlu1 %v500_v41, %s4493_s25  ;;  %v1296_v41 = vsel %vm499_vm5, %v5182_v51, %v5172_v50  ;;  %v5351_v50 = vsel %vm1180_vm8, %v5162_v54, %v5170_v0 }
 0x1a9   : > { %7985 = vst [vmem:[#allocation25_spill] sm:$0xff] %v5351_v50 }
 0x1aa   : > { %v776_v43 = vpop.permute.xlu0 %775  ;;  %v770_v35 = vpop.permute.xlu1 %769 }
 0x1ac   : > { %965 = vrot.lane.b32.xlu0 %v398_v8, %s4493_s25  ;;  %963 = vrot.lane.b32.xlu1 %v397_v40, %s4493_s25  ;;  %v395_v40 = vmul.f32 %v5128_v60, %v4622_v21 }
 0x1ae   : > { %v764_v49 = vpop.permute.xlu0 %763  ;;  %v758_v12 = vpop.permute.xlu1 %757 }
 0x1b0   : > { %1393 = vrot.lane.b32.xlu0 %v5180_v14, %s4492_s20  ;;  %1391 = vrot.lane.b32.xlu1 %v1297_v9, %s4492_s20  ;;  %v394_v14 = vmul.f32 %v5320_v59, %v4625_v22 }
 0x1b2   : > { %v1014_v52 = vpop.permute.xlu0 %1013  ;;  %v780_v55 = vpop.permute.xlu1 %779 }
 0x1b4   : > { %961 = vrot.lane.b32.xlu1 %v396_v42, %s4493_s25  ;;  %1389 = vrot.lane.b32.xlu0 %v1296_v41, %s4492_s20  ;;  %v1195_v41 = vmul.f32 %v5351_v50, %v4612_v19  ;;  %v1194_v19 = vmul.f32 %v5162_v54, %v4615_v20 }
 0x1b6   : > { %v778_v8 = vpop.permute.xlu0 %777 }
 0x1b7   : > { %v804_v9 = vsel %vm603_vm0, %v778_v8, %v780_v55  ;;  %v803_v2 = vsel %vm603_vm0, %v776_v43, %v778_v8  ;;  %v1196_v55 = vmul.f32 %v5170_v0, %v4615_v20 }
 0x1b8   : > { %957 = vrot.lane.b32.xlu1 %v394_v14, %s4493_s25  ;;  %959 = vrot.lane.b32.xlu0 %v395_v40, %s4493_s25  ;;  %v393_v40 = vmul.f32 %v5118_v17, %v4622_v21 }
 0x1b9   : > { %850 = vmatprep.subr.mxu0 %v804_v9 }
 0x1ba   : > { %851 = vmatpush1.msra.mxu0 %v803_v2  ;;  %v774_v51 = vpop.permute.xlu0 %773  ;;  %v772_v42 = vpop.permute.xlu1 %771 }
 0x1bb   : > { %v802_v43 = vsel %vm603_vm0, %v772_v42, %v774_v51  ;;  %v801_v8 = vsel %vm603_vm0, %v770_v35, %v772_v42 }
 0x1bc   : > { %1385 = vrot.lane.b32.xlu1 %v1195_v41, %s4492_s20  ;;  %1387 = vrot.lane.b32.xlu0 %v1196_v55, %s4492_s20  ;;  %v391_v41 = vmul.f32 %v5320_v59, %v4635_v24  ;;  %v392_v55 = vmul.f32 %v5128_v60, %v4632_v23  ;;  %v1192_v24 = vmul.f32 %v5351_v50, %v4622_v21 }
 0x1bd   : > { %852 = vmatprep.subr.mxu0 %v802_v43  ;;  %v793_v21 = vsel %vm603_vm0, %v5214_v18, %v5204_v53 }
 0x1be   : > { %853 = vmatpush1.msra.mxu0 %v801_v8  ;;  %v766_v14 = vpop.permute.xlu0 %765  ;;  %v768_v2 = vpop.permute.xlu1 %767  ;;  %v796_v8 = vsel %vm603_vm0, %v5192_v4, %v5194_v15  ;;  %v794_v15 = vsel %vm603_vm0, %v5204_v53, %v5212_v46  ;;  %v390_v46 = vmul.f32 %v5118_v17, %v4632_v23  ;;  %v1191_v53 = vmul.f32 %v5162_v54, %v4625_v22 }
 0x1bf   : > { %v800_v9 = vsel %vm603_vm0, %v766_v14, %v768_v2  ;;  %v799_v51 = vsel %vm603_vm0, %v764_v49, %v766_v14  ;;  %v1193_v2 = vmul.f32 %v5170_v0, %v4625_v22  ;;  %v789_v23 = vsel %vm603_vm0, %v5246_v32, %v5236_v61 }
 0x1c0   : > { %955 = vrot.lane.b32.xlu1 %v393_v40, %s4493_s25  ;;  %1383 = vrot.lane.b32.xlu0 %v1194_v19, %s4492_s20  ;;  %v788_v22 = vsel %vm603_vm0, %v5256_v5, %v5258_v3  ;;  %v786_v32 = vsel %vm603_vm0, %v5268_v36, %v5276_v11  ;;  %v783_v11 = vsel %vm603_vm0, %v5298_v25, %v5288_v56 }
 0x1c1   : > { %854 = vmatprep.subr.mxu0 %v800_v9  ;;  %v791_v9 = vsel %vm603_vm0, %v5234_v1, %v5224_v63 }
 0x1c2   : > { %855 = vmatpush1.msra.mxu0 %v799_v51  ;;  %v762_v35 = vpop.permute.xlu0 %761  ;;  %v760_v42 = vpop.permute.xlu1 %759  ;;  %v388_v51 = vmul.f32 %v5320_v59, %v4652_v29  ;;  %v785_v29 = vsel %vm603_vm0, %v5278_v44, %v5268_v36  ;;  %v782_v44 = vsel %vm603_vm0, %v5300_v26, %v5308_v34 }
 0x1c3   : > { %v798_v20 = vsel %vm603_vm0, %v760_v42, %v762_v35  ;;  %v797_v43 = vsel %vm603_vm0, %v758_v12, %v760_v42  ;;  %v795_v12 = vsel %vm603_vm0, %v5202_v37, %v5192_v4  ;;  %v792_v37 = vsel %vm603_vm0, %v5224_v63, %v5226_v10  ;;  %v4472_v42 = vld [vmem:[%s4609_s12 + $0x10] sm:$0xff] }
 0x1c4   : > { %951 = vrot.lane.b32.xlu1 %v391_v41, %s4493_s25  ;;  %953 = vrot.lane.b32.xlu0 %v392_v55, %s4493_s25  ;;  %v790_v10 = vsel %vm603_vm0, %v5236_v61, %v5244_v31  ;;  %v787_v31 = vsel %vm603_vm0, %v5266_v7, %v5256_v5  ;;  %v389_v61 = vmul.f32 %v5128_v60, %v4649_v28  ;;  %v4471_v7 = vld [vmem:[%s4609_s12 + $0x18] sm:$0xff] }
 0x1c5   : > { %856 = vmatprep.subr.mxu0 %v798_v20  ;;  %v784_v28 = vsel %vm603_vm0, %v5288_v56, %v5290_v38  ;;  %v1189_v35 = vmul.f32 %v4471_v7, %v5351_v50  ;;  %v1190_v41 = vmul.f32 %v4472_v42, %v5170_v0  ;;  %v4308_v38 = vld [vmem:[%s7879_s1 + $0x20] sm:$0xff]  ;;  %v781_v56 = vsel %vm603_vm0, %v5310_v47, %v5300_v26  ;;  %v4309_v26 = vld [vmem:[%s7879_s1 + $0x28] sm:$0xff]  ;;  %v1636_v7 = vld [vmem:[%s7881_s3 + $0x10] sm:$0xff] }
 0x1c6   : > { %857 = vmatpush1.msra.mxu0 %v797_v43  ;;  %v1010_v49 = vpop.permute.xlu0 %1009  ;;  %v1012_v14 = vpop.permute.xlu1 %1011  ;;  %v4473_v43 = vld [vmem:[%s4609_s12 + $0x8] sm:$0xff] }
 0x1c7   : > { %858 = vmatprep.subr.mxu0 %v796_v8  ;;  %v1039_v40 = vsel %vm1015_vm2, %v1012_v14, %v1014_v52  ;;  %v1038_v19 = vsel %vm1015_vm2, %v1010_v49, %v1012_v14  ;;  %v387_v34 = vmul.f32 %v4473_v43, %v5118_v17  ;;  %v1188_v8 = vmul.f32 %v4472_v42, %v5162_v54  ;;  %v1634_v42 = vld [vmem:[%s7881_s3] sm:$0xff] }
 0x1c8   : > { %859 = vmatpush1.msra.mxu0 %v795_v12  ;;  %1379 = vrot.lane.b32.xlu1 %v1192_v24, %s4492_s20  ;;  %v1186_v12 = vmul.f32 %v4473_v43, %v5351_v50 }
 0x1c9   : > { %1381 = vrot.lane.b32.xlu0 %v1193_v2, %s4492_s20  ;;  %860 = vmatprep.subr.mxu0 %v794_v15  ;;  %v7986_v2 = vmov 0.0  }
 0x1ca   : > { %1084 = vmatprep.subr.mxu1 %v1039_v40  ;;  %861 = vmatpush1.msra.mxu0 %v793_v21  ;;  %v1008_v4 = vpop.permute.xlu0 %1007  ;;  %v1006_v52 = vpop.permute.xlu1 %1005  ;;  %v4474_v40 = vld [vmem:[%s4609_s12] sm:$0xff]  ;;  %v4310_v21 = vld [vmem:[%s7879_s1 + $0x30] sm:$0xff] }
 0x1cb   : > { %1085 = vmatpush1.msra.mxu1 %v1038_v19  ;;  %862 = vmatprep.subr.mxu0 %v792_v37  ;;  %v1037_v18 = vsel %vm1015_vm2, %v1006_v52, %v1008_v4  ;;  %v1187_v15 = vmul.f32 %v4474_v40, %v5170_v0 }
 0x1cc   : > { %863 = vmatpush1.msra.mxu0 %v791_v9  ;;  %949 = vrot.lane.b32.xlu1 %v390_v46, %s4493_s25 }
 0x1cd   : > { %1377 = vrot.lane.b32.xlu0 %v1191_v53, %s4492_s20  ;;  %864 = vmatprep.subr.mxu0 %v790_v10  ;;  %v4311_v53 = vld [vmem:[%s7879_s1 + $0x38] sm:$0xff] }
 0x1ce   : > { %1086 = vmatprep.subr.mxu1 %v1037_v18  ;;  %865 = vmatpush1.msra.mxu0 %v789_v23  ;;  %v1436_v63 = vpop.permute.xlu0 %1435  ;;  %v1434_v1 = vpop.permute.xlu1 %1433  ;;  %v1597_v18 = vld [vmem:[%s7880_s2 + $0x18] sm:$0xff] }
 0x1cf   : > { %866 = vmatprep.subr.mxu0 %v788_v22  ;;  %v1460_v55 = vsel %vm446_vm1, %v1434_v1, %v1436_v63  ;;  %v4501_v63 = vmov 0   ;;  %v1596_v22 = vld [vmem:[%s7880_s2 + $0x10] sm:$0xff] }
 0x1d0   : > { %867 = vmatpush1.msra.mxu0 %v787_v31  ;;  %945 = vrot.lane.b32.xlu1 %v388_v51, %s4493_s25  ;;  %v1595_v51 = vld [vmem:[%s7880_s2 + $0x8] sm:$0xff] }
 0x1d1   : > { %947 = vrot.lane.b32.xlu0 %v389_v61, %s4493_s25  ;;  %868 = vmatprep.subr.mxu0 %v786_v32  ;;  %v1637_v32 = vld [vmem:[%s7881_s3 + $0x18] sm:$0xff] }
 0x1d2   : > { %869 = vmatpush1.msra.mxu0 %v785_v29  ;;  %v1432_v5 = vpop.permute.xlu0 %1431  ;;  %v1004_v3 = vpop.permute.xlu1 %1003  ;;  %4453 = vset.pattern.permute.xlu0 %v4501_v63 }
 0x1d3   : > { %870 = vmatprep.subr.mxu0 %v784_v28  ;;  %v1036_v36 = vsel %vm1015_vm2, %v1004_v3, %v1006_v52  ;;  %v1459_v49 = vsel %vm446_vm1, %v1432_v5, %v1434_v1  ;;  %v1185_v52 = vmul.f32 %v4474_v40, %v5162_v54  ;;  %4454 = vset.pattern.permute.xlu1 %v4501_v63  ;;  %v1594_v5 = vld [vmem:[%s7880_s2] sm:$0xff] }
 0x1d4   : > { %871 = vmatpush1.msra.mxu0 %v783_v11  ;;  %1373 = vrot.lane.b32.xlu1 %v1189_v35, %s4492_s20 }
 0x1d5   : > { %1375 = vrot.lane.b32.xlu0 %v1190_v41, %s4492_s20  ;;  %872 = vmatprep.subr.mxu0 %v782_v44  ;;  %v1635_v44 = vld [vmem:[%s7881_s3 + $0x8] sm:$0xff] }
 0x1d6   : > { %1087 = vmatpush1.msra.mxu1 %v1036_v36  ;;  %873 = vmatpush1.msra.mxu0 %v781_v56  ;;  %v1002_v25 = vpop.permute.xlu0 %1001  ;;  %v1000_v20 = vpop.permute.xlu1 %999 }
 0x1d7   : > { %1505 = vmatprep.subr.mxu0 %v1460_v55  ;;  %4312 = vmatmul.mubr.msk.f32.vlgmr.msra.gmra.mxu0 %vm829_vm9, %v4308_v38  ;;  %v1035_v14 = vsel %vm1015_vm2, %v1000_v20, %v1002_v25 }
 0x1d8   : > { %1506 = vmatpush1.msra.mxu0 %v1459_v49  ;;  %943 = vrot.lane.b32.xlu1 %v387_v34, %s4493_s25 }
 0x1d9   : > { %1371 = vrot.lane.b32.xlu0 %v1188_v8, %s4492_s20  ;;  %1088 = vmatprep.subr.mxu1 %v1035_v14 }
 0x1da   : > { %v1430_v47 = vpop.permute.xlu0 %1429  ;;  %v1428_v24 = vpop.permute.xlu1 %1427  ;;  %912 = vmatprep.mubr.f32.mxu0 %v7986_v2 }
 0x1db   : > { %v1458_v19 = vsel %vm446_vm1, %v1428_v24, %v1430_v47  ;;  %4313 = vmatmul.mubr.msk.f32.gmra.mxu0 %vm829_vm9, %v4309_v26 }
 0x1dc   : > { %1367 = vrot.lane.b32.xlu1 %v1186_v12, %s4492_s20  ;;  %1507 = vmatprep.subr.mxu0 %v1458_v19 }
 0x1dd   : > { %1369 = vrot.lane.b32.xlu0 %v1187_v15, %s4492_s20  ;;  %918 = vmatprep.mubr.f32.mxu0 %v7986_v2 }
 0x1de   : > { %v1426_v4 = vpop.permute.xlu0 %1425  ;;  %v998_v37 = vpop.permute.xlu1 %997 }
 0x1df   : > { %v1457_v46 = vsel %vm446_vm1, %v1426_v4, %v1428_v24  ;;  %v1034_v9 = vsel %vm1015_vm2, %v998_v37, %v1000_v20  ;;  %4314 = vmatmul.mubr.msk.f32.gmra.mxu0 %vm829_vm9, %v4310_v21 }
 0x1e0   : > { %1365 = vrot.lane.b32.xlu1 %v1185_v52, %s4492_s20  ;;  %1089 = vmatpush1.msra.mxu1 %v1034_v9 }
 0x1e1   : > { %1508 = vmatpush1.msra.mxu0 %v1457_v46  ;;  %924 = vmatprep.mubr.f32.mxu0 %v7986_v2 }
 0x1e2   : > { %v996_v10 = vpop.permute.xlu0 %995  ;;  %v994_v23 = vpop.permute.xlu1 %993  ;;  %1615 = vperm.xlu0 %4453, %v1597_v18  }
 0x1e3   : > { %v1033_v1 = vsel %vm1015_vm2, %v994_v23, %v996_v10  ;;  %4315 = vmatmul.mubr.msk.f32.gmra.mxu0 %vm829_vm9, %v4311_v53 }
 0x1e4   : > { %1090 = vmatprep.subr.mxu1 %v1033_v1  ;;  %1561 = vmatprep.mubr.f32.mxu0 %v7986_v2 }
 0x1e5   : > { %1610 = vperm.xlu1 %4454, %v1596_v22  }
 0x1e6   : > { %v1424_v31 = vpop.permute.xlu0 %1423  ;;  %v1422_v61 = vpop.permute.xlu1 %1421  ;;  %1605 = vperm.xlu0 %4453, %v1595_v51  }
 0x1e7   : > { %v1456_v29 = vsel %vm446_vm1, %v1422_v61, %v1424_v31 }
 0x1e8   : > { %1509 = vmatprep.subr.mxu0 %v1456_v29 }
 0x1e9   : > { %1655 = vperm.xlu1 %4454, %v1637_v32  }
 0x1ea   : > { %v1420_v28 = vpop.permute.xlu0 %1419  ;;  %v992_v3 = vpop.permute.xlu1 %991  ;;  %1600 = vperm.xlu0 %4453, %v1594_v5  }
 0x1eb   : > { %v1455_v35 = vsel %vm446_vm1, %v1420_v28, %v1422_v61  ;;  %v1032_v11 = vsel %vm1015_vm2, %v992_v3, %v994_v23 }
 0x1ec   : > { %1091 = vmatpush1.msra.mxu1 %v1032_v11  ;;  %1510 = vmatpush1.msra.mxu0 %v1455_v35 }
 0x1ed   : > { %1650 = vperm.xlu1 %4454, %v1636_v7  }
 0x1ee   : > { %v990_v41 = vpop.permute.xlu0 %989  ;;  %v988_v36 = vpop.permute.xlu1 %987  ;;  %1640 = vperm.xlu0 %4453, %v1634_v42  }
 0x1ef   : > { %v1031_v38 = vsel %vm1015_vm2, %v988_v36, %v990_v41 }
 0x1f0   : > { %1092 = vmatprep.subr.mxu1 %v1031_v38 }
 0x1f1   : > { %1645 = vperm.xlu1 %4454, %v1635_v44  }
 0x1f2   : > { %v1418_v56 = vpop.permute.xlu0 %1417  ;;  %v1416_v25 = vpop.permute.xlu1 %1415 }
 0x1f3   : > { %v1454_v55 = vsel %vm446_vm1, %v1416_v25, %v1418_v56 }
 0x1f4   : > { %1511 = vmatprep.subr.mxu0 %v1454_v55 }
 0x1f6   : > { %v1414_v20 = vpop.permute.xlu0 %1413  ;;  %v986_v43 = vpop.permute.xlu1 %985 }
 0x1f7   : > { %v1453_v34 = vsel %vm446_vm1, %v1414_v20, %v1416_v25  ;;  %v1030_v49 = vsel %vm1015_vm2, %v986_v43, %v988_v36 }
 0x1f8   : > { %1093 = vmatpush1.msra.mxu1 %v1030_v49  ;;  %1512 = vmatpush1.msra.mxu0 %v1453_v34 }
 0x1fa   : > { %v984_v8 = vpop.permute.xlu0 %983  ;;  %v982_v14 = vpop.permute.xlu1 %981 }
 0x1fb   : > { %v1029_v26 = vsel %vm1015_vm2, %v982_v14, %v984_v8 }
 0x1fc   : > { %1094 = vmatprep.subr.mxu1 %v1029_v26 }
 0x1fe   : > { %v1412_v47 = vpop.permute.xlu0 %1411  ;;  %v1410_v24 = vpop.permute.xlu1 %1409 }
 0x1ff   : > { %v1452_v12 = vsel %vm446_vm1, %v1410_v24, %v1412_v47 }
 0x200   : > { %1513 = vmatprep.subr.mxu0 %v1452_v12 }
 0x202   : > { %v1408_v40 = vpop.permute.xlu0 %1407  ;;  %v980_v15 = vpop.permute.xlu1 %979 }
 0x203   : > { %v1451_v19 = vsel %vm446_vm1, %v1408_v40, %v1410_v24  ;;  %v1028_v21 = vsel %vm1015_vm2, %v980_v15, %v982_v14 }
 0x204   : > { %1095 = vmatpush1.msra.mxu1 %v1028_v21  ;;  %1514 = vmatpush1.msra.mxu0 %v1451_v19 }
 0x206   : > { %v978_v4 = vpop.permute.xlu0 %977  ;;  %v976_v37 = vpop.permute.xlu1 %975 }
 0x207   : > { %v1027_v52 = vsel %vm1015_vm2, %v976_v37, %v978_v4 }
 0x208   : > { %1096 = vmatprep.subr.mxu1 %v1027_v52 }
 0x20a   : > { %v1406_v46 = vpop.permute.xlu0 %1405  ;;  %v1404_v9 = vpop.permute.xlu1 %1403 }
 0x20b   : > { %v1450_v53 = vsel %vm446_vm1, %v1404_v9, %v1406_v46 }
 0x20c   : > { %1515 = vmatprep.subr.mxu0 %v1450_v53 }
 0x20e   : > { %v1402_v18 = vpop.permute.xlu0 %1401  ;;  %v974_v10 = vpop.permute.xlu1 %973 }
 0x20f   : > { %v1449_v23 = vsel %vm446_vm1, %v1402_v18, %v1404_v9  ;;  %v1026_v63 = vsel %vm1015_vm2, %v974_v10, %v976_v37 }
 0x210   : > { %1097 = vmatpush1.msra.mxu1 %v1026_v63  ;;  %1516 = vmatpush1.msra.mxu0 %v1449_v23 }
 0x212   : > { %v972_v22 = vpop.permute.xlu0 %971  ;;  %v970_v1 = vpop.permute.xlu1 %969 }
 0x213   : > { %v1025_v51 = vsel %vm1015_vm2, %v970_v1, %v972_v22 }
 0x214   : > { %1098 = vmatprep.subr.mxu1 %v1025_v51  ;;  %v553_v51 = vld [vmem:[%s7879_s1] sm:$0xff] }
 0x216   : > { %v1400_v31 = vpop.permute.xlu0 %1399  ;;  %v1398_v61 = vpop.permute.xlu1 %1397 }
 0x217   : > { %v1448_v32 = vsel %vm446_vm1, %v1398_v61, %v1400_v31 }
 0x218   : > { %1517 = vmatprep.subr.mxu0 %v1448_v32 }
 0x21a   : > { %v1396_v29 = vpop.permute.xlu0 %1395  ;;  %v968_v5 = vpop.permute.xlu1 %967 }
 0x21b   : > { %v1447_v28 = vsel %vm446_vm1, %v1396_v29, %v1398_v61  ;;  %v1024_v3 = vsel %vm1015_vm2, %v968_v5, %v970_v1  ;;  %v554_v5 = vld [vmem:[%s7879_s1 + $0x8] sm:$0xff] }
 0x21c   : > { %1099 = vmatpush1.msra.mxu1 %v1024_v3  ;;  %1518 = vmatpush1.msra.mxu0 %v1447_v28 }
 0x21e   : > { %v966_v7 = vpop.permute.xlu0 %965  ;;  %v964_v35 = vpop.permute.xlu1 %963 }
 0x21f   : > { %v1023_v11 = vsel %vm1015_vm2, %v964_v35, %v966_v7 }
 0x220   : > { %1100 = vmatprep.subr.mxu1 %v1023_v11  ;;  %v4323_v11 = vld [vmem:[%s7879_s1 + $0x40] sm:$0xff] }
 0x222   : > { %v1394_v42 = vpop.permute.xlu0 %1393  ;;  %v1392_v41 = vpop.permute.xlu1 %1391 }
 0x223   : > { %v1446_v36 = vsel %vm446_vm1, %v1392_v41, %v1394_v42 }
 0x224   : > { %1519 = vmatprep.subr.mxu0 %v1446_v36  ;;  %v4324_v36 = vld [vmem:[%s7879_s1 + $0x48] sm:$0xff] }
 0x226   : > { %v1390_v44 = vpop.permute.xlu0 %1389  ;;  %v962_v38 = vpop.permute.xlu1 %961 }
 0x227   : > { %v1445_v56 = vsel %vm446_vm1, %v1390_v44, %v1392_v41  ;;  %v1022_v25 = vsel %vm1015_vm2, %v962_v38, %v964_v35  ;;  %v555_v35 = vld [vmem:[%s7879_s1 + $0x10] sm:$0xff]  ;;  %v556_v41 = vld [vmem:[%s7879_s1 + $0x18] sm:$0xff] }
 0x228   : > { %1101 = vmatpush1.msra.mxu1 %v1022_v25  ;;  %1520 = vmatpush1.msra.mxu0 %v1445_v56  ;;  %v4325_v44 = vld [vmem:[%s7879_s1 + $0x50] sm:$0xff]  ;;  %v4326_v38 = vld [vmem:[%s7879_s1 + $0x58] sm:$0xff] }
 0x22a   : > { %v960_v55 = vpop.permute.xlu0 %959  ;;  %v958_v20 = vpop.permute.xlu1 %957 }
 0x22b   : > { %v1021_v43 = vsel %vm1015_vm2, %v958_v20, %v960_v55 }
 0x22c   : > { %1102 = vmatprep.subr.mxu1 %v1021_v43 }
 0x22e   : > { %v1388_v34 = vpop.permute.xlu0 %1387  ;;  %v1386_v49 = vpop.permute.xlu1 %1385 }
 0x22f   : > { %v1444_v8 = vsel %vm446_vm1, %v1386_v49, %v1388_v34 }
 0x230   : > { %1521 = vmatprep.subr.mxu0 %v1444_v8 }
 0x232   : > { %v1384_v14 = vpop.permute.xlu0 %1383  ;;  %v956_v26 = vpop.permute.xlu1 %955 }
 0x233   : > { %v1443_v47 = vsel %vm446_vm1, %v1384_v14, %v1386_v49  ;;  %v1020_v24 = vsel %vm1015_vm2, %v956_v26, %v958_v20 }
 0x234   : > { %1103 = vmatpush1.msra.mxu1 %v1020_v24  ;;  %1522 = vmatpush1.msra.mxu0 %v1443_v47 }
 0x236   : > { %v954_v12 = vpop.permute.xlu0 %953  ;;  %v952_v40 = vpop.permute.xlu1 %951 }
 0x237   : > { %v1019_v15 = vsel %vm1015_vm2, %v952_v40, %v954_v12 }
 0x238   : > { %1104 = vmatprep.subr.mxu1 %v1019_v15 }
 0x23a   : > { %v1380_v19 = vpop.permute.xlu1 %1379 }
 0x23b   : > { %v1382_v21 = vpop.permute.xlu0 %1381 }
 0x23c   : > { %v1442_v4 = vsel %vm446_vm1, %v1380_v19, %v1382_v21 }
 0x23d   : > { %1523 = vmatprep.subr.mxu0 %v1442_v4 }
 0x23e   : > { %v950_v37 = vpop.permute.xlu1 %949 }
 0x23f   : > { %v1378_v52 = vpop.permute.xlu0 %1377  ;;  %v1018_v46 = vsel %vm1015_vm2, %v950_v37, %v952_v40 }
 0x240   : > { %v1441_v9 = vsel %vm446_vm1, %v1378_v52, %v1380_v19  ;;  %1105 = vmatpush1.msra.mxu1 %v1018_v46 }
 0x241   : > { %1524 = vmatpush1.msra.mxu0 %v1441_v9 }
 0x242   : > { %v946_v53 = vpop.permute.xlu1 %945 }
 0x243   : > { %v948_v18 = vpop.permute.xlu0 %947 }
 0x244   : > { %v1017_v10 = vsel %vm1015_vm2, %v946_v53, %v948_v18 }
 0x245   : > { %1106 = vmatprep.subr.mxu1 %v1017_v10 }
 0x246   : > { %v1374_v23 = vpop.permute.xlu1 %1373 }
 0x247   : > { %v1376_v63 = vpop.permute.xlu0 %1375 }
 0x248   : > { %v1440_v22 = vsel %vm446_vm1, %v1374_v23, %v1376_v63 }
 0x249   : > { %1525 = vmatprep.subr.mxu0 %v1440_v22 }
 0x24a   : > { %v944_v1 = vpop.permute.xlu1 %943 }
 0x24b   : > { %v1372_v31 = vpop.permute.xlu0 %1371  ;;  %v1016_v61 = vsel %vm1015_vm2, %v944_v1, %v946_v53 }
 0x24c   : > { %v1439_v32 = vsel %vm446_vm1, %v1372_v31, %v1374_v23  ;;  %1107 = vmatpush1.msra.mxu1 %v1016_v61 }
 0x24d   : > { %1526 = vmatpush1.msra.mxu0 %v1439_v32  ;;  %4316 = vmatmul.mubr.msk.f32.vlgmr.msra.gmra.mxu1 %vm829_vm9, %v553_v51 }
 0x24e   : > { %v1368_v29 = vpop.permute.xlu1 %1367  ;;  %1146 = vmatprep.mubr.f32.mxu1 %v7986_v2 }
 0x24f   : > { %v1370_v28 = vpop.permute.xlu0 %1369 }
 0x250   : > { %v1438_v3 = vsel %vm446_vm1, %v1368_v29, %v1370_v28 }
 0x251   : > { %1527 = vmatprep.subr.mxu0 %v1438_v3  ;;  %4317 = vmatmul.mubr.msk.f32.gmra.mxu1 %vm829_vm9, %v554_v5 }
 0x252   : > { %v1366_v7 = vpop.permute.xlu1 %1365  ;;  %1152 = vmatprep.mubr.f32.mxu1 %v7986_v2 }
 0x253   : > { %v1437_v42 = vsel %vm446_vm1, %v1366_v7, %v1368_v29 }
 0x254   : > { %1528 = vmatpush1.msra.mxu0 %v1437_v42 }
 0x255   : > { %4318 = vmatmul.mubr.msk.f32.gmra.mxu1 %vm829_vm9, %v555_v35  ;;  %4327 = vmatmul.mubr.msk.f32.vlgmr.msra.gmra.mxu0 %vm829_vm9, %v4323_v11 }
 0x256   : > { %1158 = vmatprep.mubr.f32.mxu1 %v7986_v2  ;;  %1567 = vmatprep.mubr.f32.mxu0 %v7986_v2 }
 0x259   : > { %4319 = vmatmul.mubr.msk.f32.gmra.mxu1 %vm829_vm9, %v556_v41  ;;  %4328 = vmatmul.mubr.msk.f32.gmra.mxu0 %vm829_vm9, %v4324_v36 }
 0x25a   : > { %1573 = vmatprep.mubr.f32.mxu0 %v7986_v2  ;;  %2112 = vmatprep.mubr.f32.mxu1 %v7986_v2 }
 0x25d   : > { %4329 = vmatmul.mubr.msk.f32.gmra.mxu0 %vm829_vm9, %v4325_v44  ;;  %v5597_v43 = vpop.permute.xlu0 %1615 }
 0x25e   : > { %1579 = vmatprep.mubr.f32.mxu0 %v7986_v2 }
 0x260   : > { %v5609_v21 = vpop.permute.xlu1 %1610 }
 0x261   : > { %4330 = vmatmul.mubr.msk.f32.gmra.mxu0 %vm829_vm9, %v4326_v38  ;;  %v5603_v8 = vpop.permute.xlu0 %1605 }
 0x262   : > { %2345 = vmatprep.mubr.f32.mxu0 %v7986_v2 }
 0x264   : > { %v5613_v10 = vpop.permute.xlu1 %1655 }
 0x265   : > { %v1601_v47 = vpop.permute.xlu0 %1600 }
 0x268   : > { %v5625_v29 = vpop.permute.xlu1 %1650 }
 0x269   : > { %v1641_v46 = vpop.permute.xlu0 %1640 }
 0x26c   : > { %v1646_v11 = vpop.permute.xlu1 %1645 }
 0x297   : > { %v908_v56 = vpop.f32.mrf.mxu0 }
 0x299   : > { %v910_v25 = vpop.f32.mrf.mxu0 }
 0x29b   : > { %v914_v55 = vpop.f32.mrf.mxu0 }
 0x29d   : > { %v5595_v20 = vpop.f32.mrf.mxu0 }
 0x29f   : > { %v5599_v34 = vpop.f32.mrf.mxu0 }
 0x2a1   : > { %v5601_v49 = vpop.f32.mrf.mxu0 }
 0x2a3   : > { %v5605_v14 = vpop.f32.mrf.mxu0 }
 0x2a5   : > { %v5607_v24 = vpop.f32.mrf.mxu0 }
 0x30d   : > { %v1142_v26 = vpop.f32.mrf.mxu1 }
 0x30e   : > { %v1143_v12 = vadd.f32 %v1142_v26, %v908_v56 }
 0x30f   : > { %v1144_v40 = vpop.f32.mrf.mxu1 }
 0x310   : > { %v1145_v37 = vadd.f32 %v1144_v40, %v910_v25  ;;  %v7988_v40 = vld [vmem:[#allocation17_spill] sm:$0xff] }
 0x311   : > { %v1148_v22 = vpop.f32.mrf.mxu1 }
 0x312   : > { %v1149_v61 = vadd.f32 %v1148_v22, %v914_v55 }
 0x315   : > { %v1563_v15 = vpop.f32.mrf.mxu0 }
 0x316   : > { %v1586_v19 = vadd.f32 %v1563_v15, %v1143_v12 }
 0x317   : > { %v1565_v4 = vpop.f32.mrf.mxu0 }
 0x318   : > { %v1618_v52 = vadd.f32 %v1601_v47, %v1586_v19  ;;  %v1587_v53 = vadd.f32 %v1565_v4, %v1145_v37  ;;  %v1150_v19 = vpop.f32.mrf.mxu1  ;;  %v7989_v4 = vld [vmem:[#allocation11_spill] sm:$0xff] }
 0x319   : > { %v1569_v51 = vpop.f32.mrf.mxu0 }
 0x31a   : > { %vm1626_vm10 = vcmp.ge.f32.partialorder %v1618_v52, 0.0  ;;  %v1658_v9 = vmul.f32 %v1641_v46, %v1618_v52  ;;  %v1619_v63 = vadd.f32 %v1601_v47, %v1587_v53  ;;  %v1588_v28 = vadd.f32 %v1569_v51, %v1149_v61  ;;  %v7987_v47 = vld [vmem:[#allocation4_spill] sm:$0xff]  ;;  %v7992_v61 = vld [vmem:[#allocation18_spill] sm:$0xff] }
 0x31b   : > { %v7990_v53 = vld [vmem:[#allocation8_spill] sm:$0xff] }
 0x31c   : > { %v5611_v18 = vsel %vm1626_vm10, %v1618_v52, %v1658_v9  ;;  %v1659_v32 = vmul.f32 %v1641_v46, %v1619_v63  ;;  %vm1627_vm11 = vcmp.ge.f32.partialorder %v1619_v63, 0.0  ;;  %v1620_v35 = vadd.f32 %v5603_v8, %v1588_v28  ;;  %v1571_v52 = vpop.f32.mrf.mxu0  ;;  %v1154_v28 = vpop.f32.mrf.mxu1 }
 0x31d   : > { %1835 = vrot.lane.b32.xlu1 %v5611_v18, %s4496_s16  ;;  %v1815_v23 = vmul.f32 %v5611_v18, %v4658_v30  ;;  %v2396_v1 = vmul.f32 %v5611_v18, %v4698_v45  ;;  %v1817_v31 = vmul.f32 %v5611_v18, %v4666_v33  ;;  %v2394_v5 = vmul.f32 %v5611_v18, %v4706_v48 }
 0x31e   : > { %v5631_v3 = vsel %vm1627_vm11, %v1619_v63, %v1659_v32  ;;  %v2384_v7 = vmul.f32 %v5611_v18, %v4791_v13  ;;  %v1699_v42 = vmul.f32 %v5611_v18, %v4750_v62  ;;  %v1660_v36 = vmul.f32 %v1646_v11, %v1620_v35 }
 0x31f   : > { %1867 = vrot.lane.b32.xlu0 %v1815_v23, %s4497_s21  ;;  %v1816_v41 = vmul.f32 %v5631_v3, %v4733_v57  ;;  %vm1628_vm12 = vcmp.ge.f32.partialorder %v1620_v35, 0.0  ;;  %v1687_v44 = vmul.f32 %v5611_v18, %v4799_v16  ;;  %v2382_v56 = vmul.f32 %v5611_v18, %v4813_v27 }
 0x320   : > { %v5648_v38 = vsel %vm1628_vm12, %v1620_v35, %v1660_v36  ;;  %v1700_v25 = vmul.f32 %v5631_v3, %v4682_v39  ;;  %v1804_v55 = vmul.f32 %v5611_v18, %v4968_v58  ;;  %v1688_v26 = vmul.f32 %v5631_v3, %v4769_v6  ;;  %v1575_v35 = vpop.f32.mrf.mxu0 }
 0x321   : > { %2466 = vrot.lane.b32.xlu1 %v2396_v1, %s4497_s21  ;;  %v1698_v12 = vmul.f32 %v5631_v3, %v7987_v47  ;;  %v1805_v15 = vmul.f32 %v5631_v3, %v7988_v40  ;;  %v2395_v37 = vmul.f32 %v5631_v3, %v7989_v4  ;;  %v1818_v46 = vmul.f32 %v5648_v38, %v4658_v30  ;;  %v7991_v1 = vld [vmem:[#allocation16_spill] sm:$0xff] }
 0x322   : > { %v1151_v9 = vadd.f32 %v1150_v19, %v5595_v20  ;;  %v1686_v23 = vmul.f32 %v5631_v3, %v7990_v53  ;;  %v1820_v22 = vmul.f32 %v5648_v38, %v4666_v33  ;;  %v2383_v51 = vmul.f32 %v5631_v3, %v7991_v1 }
 0x323   : > { %1871 = vrot.lane.b32.xlu0 %v1817_v31, %s4497_s21  ;;  %v2399_v20 = vmul.f32 %v5648_v38, %v4698_v45  ;;  %v1803_v32 = vmul.f32 %v5631_v3, %v7992_v61  ;;  %v1702_v36 = vmul.f32 %v5648_v38, %v4750_v62 }
 0x324   : > { %v1589_v63 = vadd.f32 %v1571_v52, %v1151_v9  ;;  %v1156_v9 = vpop.f32.mrf.mxu1 }
 0x325   : > { %2462 = vrot.lane.b32.xlu1 %v2394_v5, %s4497_s21 }
 0x326   : > { %v1621_v31 = vadd.f32 %v5603_v8, %v1589_v63  ;;  %v1155_v8 = vadd.f32 %v1154_v28, %v5599_v34  ;;  %v1577_v63 = vpop.f32.mrf.mxu0 }
 0x327   : > { %1837 = vrot.lane.b32.xlu0 %v5631_v3, %s4496_s16 }
 0x328   : > { %v1661_v5 = vmul.f32 %v1646_v11, %v1621_v31  ;;  %vm1629_vm13 = vcmp.ge.f32.partialorder %v1621_v31, 0.0  ;;  %v2387_v11 = vmul.f32 %v5648_v38, %v4791_v13 }
 0x329   : > { %2422 = vrot.lane.b32.xlu1 %v2384_v7, %s4496_s16  ;;  %v2397_v7 = vmul.f32 %v5648_v38, %v4706_v48 }
 0x32b   : > { %1768 = vrot.lane.b32.xlu0 %v1699_v42, %s4497_s21  ;;  %v5697_v42 = vsel %vm1629_vm13, %v1621_v31, %v1661_v5  ;;  %v1160_v5 = vpop.f32.mrf.mxu1 }
 0x32c   : > { %v1703_v19 = vmul.f32 %v5697_v42, %v4682_v39  ;;  %v1691_v52 = vmul.f32 %v5697_v42, %v4769_v6 }
 0x32d   : > { %1869 = vrot.lane.b32.xlu1 %v1816_v41, %s4497_s21  ;;  %v1590_v41 = vadd.f32 %v1575_v35, %v1155_v8  ;;  %v1161_v8 = vadd.f32 %v1160_v5, %v5605_v14 }
 0x32f   : > { %1724 = vrot.lane.b32.xlu0 %v1687_v44, %s4496_s16  ;;  %v2385_v44 = vmul.f32 %v5648_v38, %v4813_v27  ;;  %v1622_v34 = vadd.f32 %v5609_v21, %v1590_v41 }
 0x331   : > { %1839 = vrot.lane.b32.xlu1 %v5648_v38, %s4496_s16  ;;  %vm1630_vm14 = vcmp.ge.f32.partialorder %v1622_v34, 0.0 }
 0x333   : > { %2418 = vrot.lane.b32.xlu0 %v2382_v56, %s4496_s16  ;;  %v1690_v56 = vmul.f32 %v5648_v38, %v4799_v16 }
 0x335   : > { %1770 = vrot.lane.b32.xlu1 %v1700_v25, %s4497_s21  ;;  %v1807_v25 = vmul.f32 %v5648_v38, %v4968_v58 }
 0x337   : > { %1918 = vrot.lane.b32.xlu0 %v1804_v55, %s4491_s19  ;;  %v1662_v55 = vmul.f32 %v5625_v29, %v1622_v34 }
 0x339   : > { %1726 = vrot.lane.b32.xlu1 %v1688_v26, %s4496_s16  ;;  %v1819_v26 = vmul.f32 %v5697_v42, %v4733_v57 }
 0x33b   : > { %1766 = vrot.lane.b32.xlu0 %v1698_v12, %s4497_s21  ;;  %v5721_v12 = vsel %vm1630_vm14, %v1622_v34, %v1662_v55 }
 0x33c   : > { %v2402_v31 = vmul.f32 %v5721_v12, %v4698_v45  ;;  %v2400_v28 = vmul.f32 %v5721_v12, %v4706_v48  ;;  %v1821_v35 = vmul.f32 %v5721_v12, %v4658_v30 }
 0x33d   : > { %1920 = vrot.lane.b32.xlu1 %v1805_v15, %s4491_s19  ;;  %v1701_v15 = vmul.f32 %v5697_v42, %v7987_v47 }
 0x33f   : > { %2464 = vrot.lane.b32.xlu0 %v2395_v37, %s4497_s21  ;;  %v2398_v37 = vmul.f32 %v5697_v42, %v7989_v4 }
 0x341   : > { %1873 = vrot.lane.b32.xlu1 %v1818_v46, %s4497_s21  ;;  %v1689_v46 = vmul.f32 %v5697_v42, %v7990_v53 }
 0x343   : > { %1722 = vrot.lane.b32.xlu0 %v1686_v23, %s4496_s16  ;;  %v1806_v23 = vmul.f32 %v5697_v42, %v7992_v61 }
 0x345   : > { %1877 = vrot.lane.b32.xlu1 %v1820_v22, %s4497_s21  ;;  %v2386_v22 = vmul.f32 %v5697_v42, %v7991_v1 }
 0x347   : > { %2420 = vrot.lane.b32.xlu0 %v2383_v51, %s4496_s16  ;;  %v1157_v51 = vadd.f32 %v1156_v9, %v5601_v49  ;;  %v1581_v49 = vpop.f32.mrf.mxu0 }
 0x349   : > { %2472 = vrot.lane.b32.xlu1 %v2399_v20, %s4497_s21  ;;  %v1591_v20 = vadd.f32 %v1577_v63, %v1157_v51 }
 0x34b   : > { %1916 = vrot.lane.b32.xlu0 %v1803_v32, %s4491_s19  ;;  %v1808_v32 = vmul.f32 %v5697_v42, %v7988_v40 }
 0x34d   : > { %2468 = vrot.lane.b32.xlu1 %v2397_v7, %s4497_s21  ;;  %v1623_v7 = vadd.f32 %v5609_v21, %v1591_v20  ;;  %v1823_v21 = vmul.f32 %v5721_v12, %v4666_v33  ;;  %v1583_v20 = vpop.f32.mrf.mxu0 }
 0x34f   : > { %1841 = vrot.lane.b32.xlu0 %v5697_v42, %s4496_s16  ;;  %v1663_v41 = vmul.f32 %v5625_v29, %v1623_v7  ;;  %vm1631_vm15 = vcmp.ge.f32.partialorder %v1623_v7, 0.0 }
 0x351   : > { %2428 = vrot.lane.b32.xlu1 %v2387_v11, %s4496_s16  ;;  %v2390_v11 = vmul.f32 %v5721_v12, %v4791_v13  ;;  %v5770_v14 = vsel %vm1631_vm15, %v1623_v7, %v1663_v41 }
 0x352   : > { %v1822_v29 = vmul.f32 %v5770_v14, %v4733_v57  ;;  %v1704_v9 = vmul.f32 %v5770_v14, %v7987_v47  ;;  %v1682_v63 = vmul.f32 %v5770_v14, %v5128_v60 }
 0x353   : > { %1774 = vrot.lane.b32.xlu0 %v1702_v36, %s4497_s21  ;;  %v1592_v36 = vadd.f32 %v1581_v49, %v1161_v8  ;;  %v1692_v49 = vmul.f32 %v5770_v14, %v7990_v53 }
 0x355   : > { %2424 = vrot.lane.b32.xlu1 %v2385_v44, %s4496_s16  ;;  %v2388_v44 = vmul.f32 %v5721_v12, %v4813_v27  ;;  %v1624_v34 = vadd.f32 %v5597_v43, %v1592_v36 }
 0x357   : > { %1730 = vrot.lane.b32.xlu0 %v1690_v56, %s4496_s16  ;;  %v1664_v56 = vmul.f32 %v5613_v10, %v1624_v34  ;;  %vm1632_vm3 = vcmp.ge.f32.partialorder %v1624_v34, 0.0 }
 0x359   : > { %1924 = vrot.lane.b32.xlu1 %v1807_v25, %s4491_s19  ;;  %v1705_v25 = vmul.f32 %v5721_v12, %v4750_v62  ;;  %v5783_v55 = vsel %vm1632_vm3, %v1624_v34, %v1664_v56 }
 0x35a   : > { %v1824_v5 = vmul.f32 %v5783_v55, %v4658_v30 }
 0x35b   : > { %1875 = vrot.lane.b32.xlu0 %v1819_v26, %s4497_s21  ;;  %v1693_v26 = vmul.f32 %v5721_v12, %v4799_v16 }
 0x35d   : > { %1843 = vrot.lane.b32.xlu1 %v5721_v12, %s4496_s16 }
 0x35f   : > { %1772 = vrot.lane.b32.xlu0 %v1701_v15, %s4497_s21  ;;  %v1706_v15 = vmul.f32 %v5770_v14, %v4682_v39 }
 0x361   : > { %1776 = vrot.lane.b32.xlu1 %v1703_v19, %s4497_s21  ;;  %v1810_v19 = vmul.f32 %v5721_v12, %v4968_v58 }
 0x363   : > { %2470 = vrot.lane.b32.xlu0 %v2398_v37, %s4497_s21  ;;  %v1694_v37 = vmul.f32 %v5770_v14, %v4769_v6 }
 0x365   : > { %1732 = vrot.lane.b32.xlu1 %v1691_v52, %s4496_s16  ;;  %v1681_v52 = vmul.f32 %v5721_v12, %v5320_v59 }
 0x367   : > { %1728 = vrot.lane.b32.xlu0 %v1689_v46, %s4496_s16  ;;  %v1811_v46 = vmul.f32 %v5770_v14, %v7988_v40 }
 0x369   : > { %1922 = vrot.lane.b32.xlu1 %v1806_v23, %s4491_s19 }
 0x36b   : > { %2426 = vrot.lane.b32.xlu0 %v2386_v22, %s4496_s16  ;;  %v1162_v22 = vpop.f32.mrf.mxu1 }
 0x36d   : > { %2478 = vrot.lane.b32.xlu1 %v2402_v31, %s4497_s21  ;;  %v2401_v31 = vmul.f32 %v5770_v14, %v7989_v4 }
 0x36f   : > { %1926 = vrot.lane.b32.xlu0 %v1808_v32, %s4491_s19 }
 0x371   : > { %2474 = vrot.lane.b32.xlu1 %v2400_v28, %s4497_s21  ;;  %v1163_v28 = vadd.f32 %v1162_v22, %v5607_v24  ;;  %v2389_v24 = vmul.f32 %v5770_v14, %v7991_v1  ;;  %v1684_v22 = vmul.f32 %v5783_v55, %v5320_v59 }
 0x373   : > { %1879 = vrot.lane.b32.xlu0 %v1821_v35, %s4497_s21  ;;  %v1593_v35 = vadd.f32 %v1583_v20, %v1163_v28  ;;  %v2391_v20 = vmul.f32 %v5783_v55, %v4813_v27 }
 0x375   : > { %2434 = vrot.lane.b32.xlu1 %v2390_v11, %s4496_s16  ;;  %v1826_v11 = vmul.f32 %v5783_v55, %v4666_v33  ;;  %v1625_v36 = vadd.f32 %v5597_v43, %v1593_v35  ;;  %v1813_v35 = vmul.f32 %v5783_v55, %v4968_v58 }
 0x377   : > { %1883 = vrot.lane.b32.xlu0 %v1823_v21, %s4497_s21  ;;  %v1665_v56 = vmul.f32 %v5613_v10, %v1625_v36  ;;  %vm1633_vm4 = vcmp.ge.f32.partialorder %v1625_v36, 0.0  ;;  %v2403_v10 = vmul.f32 %v5783_v55, %v4706_v48 }
 0x379   : > { %2430 = vrot.lane.b32.xlu1 %v2388_v44, %s4496_s16  ;;  %v1708_v44 = vmul.f32 %v5783_v55, %v4750_v62 }
 0x37b   : > { %1845 = vrot.lane.b32.xlu0 %v5770_v14, %s4496_s16 }
 0x37d   : > { %1881 = vrot.lane.b32.xlu1 %v1822_v29, %s4497_s21  ;;  %v1809_v29 = vmul.f32 %v5770_v14, %v7992_v61 }
 0x37f   : > { %1780 = vrot.lane.b32.xlu0 %v1705_v25, %s4497_s21  ;;  %v2405_v25 = vmul.f32 %v5783_v55, %v4698_v45  ;;  %v1675_v45 = vmul.f32 %v5611_v18, %v5320_v59 }
 0x381   : > { %1847 = vrot.lane.b32.xlu1 %v5783_v55, %s4496_s16 }
 0x383   : > { %1736 = vrot.lane.b32.xlu0 %v1693_v26, %s4496_s16 }
 0x385   : > { %1782 = vrot.lane.b32.xlu1 %v1706_v15, %s4497_s21  ;;  %v1673_v15 = vsel %vm1633_vm4, %v1625_v36, %v1665_v56 }
 0x386   : > { %v1825_v28 = vmul.f32 %v1673_v15, %v4733_v57  ;;  %v2404_v56 = vmul.f32 %v1673_v15, %v7989_v4 }
 0x387   : > { %1930 = vrot.lane.b32.xlu0 %v1810_v19, %s4491_s19 }
 0x389   : > { %1738 = vrot.lane.b32.xlu1 %v1694_v37, %s4496_s16 }
 0x38b   : > { %2163 = vrot.lane.b32.xlu0 %v1681_v52, %s4493_s25  ;;  %v1696_v52 = vmul.f32 %v5783_v55, %v4799_v16 }
 0x38d   : > { %1932 = vrot.lane.b32.xlu1 %v1811_v46, %s4491_s19 }
 0x38f   : > { %1778 = vrot.lane.b32.xlu0 %v1704_v9, %s4497_s21  ;;  %v5808_v23 = vpop.permute.xlu1 %1835  ;;  %v2393_v9 = vmul.f32 %v5783_v55, %v4791_v13  ;;  %v2381_v13 = vmul.f32 %v5783_v55, %v5170_v0 }
 0x391   : > { %v5812_v51 = vpop.permute.xlu0 %1867  ;;  %2165 = vrot.lane.b32.xlu1 %v1682_v63, %s4493_s25 }
 0x393   : > { %2476 = vrot.lane.b32.xlu0 %v2401_v31, %s4497_s21  ;;  %v5818_v32 = vpop.permute.xlu1 %2466 }
 0x395   : > { %v5823_v7 = vpop.permute.xlu0 %1871  ;;  %1885 = vrot.lane.b32.xlu1 %v1824_v5, %s4497_s21 }
 0x397   : > { %1734 = vrot.lane.b32.xlu0 %v1692_v49, %s4496_s16  ;;  %v5829_v8 = vpop.permute.xlu1 %2462 }
 0x399   : > { %v5833_v41 = vpop.permute.xlu0 %1837  ;;  %1889 = vrot.lane.b32.xlu1 %v1826_v11, %s4497_s21 }
 0x39b   : > { %2432 = vrot.lane.b32.xlu0 %v2389_v24, %s4496_s16  ;;  %v5840_v21 = vpop.permute.xlu1 %2422  ;;  %v1709_v24 = vmul.f32 %v1673_v15, %v4682_v39 }
 0x39d   : > { %v5844_v34 = vpop.permute.xlu0 %1768  ;;  %1786 = vrot.lane.b32.xlu1 %v1708_v44, %s4497_s21  ;;  %v1707_v44 = vmul.f32 %v1673_v15, %v7987_v47 }
 0x39f   : > { %1928 = vrot.lane.b32.xlu0 %v1809_v29, %s4491_s19  ;;  %v5851_v43 = vpop.permute.xlu1 %1869 }
 0x3a0   : > { %v1891_v58 = vsel %vm544_vm6, %v5812_v51, %v5851_v43 }
 0x3a1   : > { %v5855_v26 = vpop.permute.xlu0 %1724  ;;  %2484 = vrot.lane.b32.xlu1 %v2405_v25, %s4497_s21 }
 0x3a3   : > { %1849 = vrot.lane.b32.xlu0 %v1673_v15, %s4496_s16  ;;  %v5859_v19 = vpop.permute.xlu1 %1839 }
 0x3a5   : > { %v5863_v37 = vpop.permute.xlu0 %2418  ;;  %2480 = vrot.lane.b32.xlu1 %v2403_v10, %s4497_s21  ;;  %v1697_v10 = vmul.f32 %v1673_v15, %v4769_v6 }
 0x3a7   : > { %1742 = vrot.lane.b32.xlu0 %v1696_v52, %s4496_s16  ;;  %v5869_v46 = vpop.permute.xlu1 %1770 }
 0x3a9   : > { %v5873_v63 = vpop.permute.xlu0 %1918  ;;  %2440 = vrot.lane.b32.xlu1 %v2393_v9, %s4496_s16  ;;  %v1695_v9 = vmul.f32 %v1673_v15, %v7990_v53 }
 0x3ab   : > { %2169 = vrot.lane.b32.xlu0 %v1684_v22, %s4493_s25  ;;  %v5879_v31 = vpop.permute.xlu1 %1726 }
 0x3ad   : > { %v5883_v5 = vpop.permute.xlu0 %1766  ;;  %2436 = vrot.lane.b32.xlu1 %v2391_v20, %s4496_s16  ;;  %v1812_v20 = vmul.f32 %v1673_v15, %v7992_v61 }
 0x3af   : > { %1887 = vrot.lane.b32.xlu0 %v1825_v28, %s4497_s21  ;;  %v5888_v49 = vpop.permute.xlu1 %1920 }
 0x3b1   : > { %v5892_v11 = vpop.permute.xlu0 %2464  ;;  %1936 = vrot.lane.b32.xlu1 %v1813_v35, %s4491_s19  ;;  %v2392_v35 = vmul.f32 %v1673_v15, %v7991_v1 }
 0x3b3   : > { %1788 = vrot.lane.b32.xlu0 %v1709_v24, %s4497_s21  ;;  %v5897_v36 = vpop.permute.xlu1 %1873 }
 0x3b5   : > { %v5900_v29 = vpop.permute.xlu0 %1722  ;;  %1784 = vrot.lane.b32.xlu1 %v1707_v44, %s4497_s21  ;;  %v1685_v44 = vmul.f32 %v1673_v15, %v5128_v60 }
 0x3b7   : > { %2482 = vrot.lane.b32.xlu0 %v2404_v56, %s4497_s21  ;;  %v5905_v25 = vpop.permute.xlu1 %1877 }
 0x3b9   : > { %v5908_v52 = vpop.permute.xlu0 %2420  ;;  %1744 = vrot.lane.b32.xlu1 %v1697_v10, %s4496_s16  ;;  %v1814_v10 = vmul.f32 %v1673_v15, %v7988_v40  ;;  %v1851_v40 = vsel %vm499_vm5, %v5808_v23, %v5833_v41 }
 0x3bb   : > { %1740 = vrot.lane.b32.xlu0 %v1695_v9, %s4496_s16  ;;  %v5913_v22 = vpop.permute.xlu1 %2472 }
 0x3bd   : > { %v5916_v28 = vpop.permute.xlu0 %1916  ;;  %1934 = vrot.lane.b32.xlu1 %v1812_v20, %s4491_s19 }
 0x3bf   : > { %2438 = vrot.lane.b32.xlu0 %v2392_v35, %s4496_s16  ;;  %v5921_v24 = vpop.permute.xlu1 %2468  ;;  %v1683_v35 = vmul.f32 %v1673_v15, %v5118_v17 }
 0x3c1   : > { %v5924_v56 = vpop.permute.xlu0 %1841  ;;  %2171 = vrot.lane.b32.xlu1 %v1685_v44, %s4493_s25  ;;  %v2380_v44 = vmul.f32 %v1673_v15, %v5351_v50 }
 0x3c3   : > { %1938 = vrot.lane.b32.xlu0 %v1814_v10, %s4491_s19  ;;  %v5929_v9 = vpop.permute.xlu1 %2428 }
 0x3c5   : > { %1944 = vrot.lane.b32.xlu1 %v5833_v41, %s4491_s19  ;;  %v5933_v20 = vpop.permute.xlu0 %1774  ;;  %v1791_v41 = vsel %vm544_vm6, %v5844_v34, %v5869_v46 }
 0x3c7   : > { %2167 = vrot.lane.b32.xlu0 %v1683_v35, %s4493_s25  ;;  %v5937_v61 = vpop.permute.xlu1 %2424 }
 0x3c9   : > { %v5939_v1 = vpop.permute.xlu0 %1730  ;;  %2563 = vrot.lane.b32.xlu1 %v5818_v32, %s4492_s20 }
 0x3cb   : > { %2531 = vrot.lane.b32.xlu0 %v2380_v44, %s4492_s20  ;;  %v5945_v10 = vpop.permute.xlu1 %1924 }
 0x3cd   : > { %v5947_v53 = vpop.permute.xlu0 %1875  ;;  %2539 = vrot.lane.b32.xlu1 %v5840_v21, %s4492_s20 }
 0x3cf   : > { %1940 = vrot.lane.b32.xlu0 %v5808_v23, %s4491_s19  ;;  %v5953_v35 = vpop.permute.xlu1 %1843  ;;  %v1892_v23 = vsel %vm544_vm6, %v5851_v43, %v5823_v7  ;;  %v1790_v7 = vsel %vm544_vm6, %v5883_v5, %v5844_v34 }
 0x3d1   : > { %v5955_v4 = vpop.permute.xlu0 %1772  ;;  %1946 = vrot.lane.b32.xlu1 %v5859_v19, %s4491_s19 }
 0x3d3   : > { %1964 = vrot.lane.b32.xlu0 %v5812_v51, %s4491_s19  ;;  %v1777_v15 = vpop.permute.xlu1 %1776 }
 0x3d5   : > { %v5961_v44 = vpop.permute.xlu0 %2470  ;;  %2201 = vrot.lane.b32.xlu1 %v5869_v46, %s4493_s25  ;;  %v2442_v46 = vsel %vm499_vm5, %v5863_v37, %v5908_v52  ;;  %v1747_v37 = vsel %vm499_vm5, %v5855_v26, %v5879_v31 }
 0x3d7   : > { %1942 = vrot.lane.b32.xlu0 %v1851_v40, %s4491_s19  ;;  %v5969_v47 = vpop.permute.xlu1 %1732 }
 0x3d9   : > { %v5971_v6 = vpop.permute.xlu0 %1728  ;;  %2177 = vrot.lane.b32.xlu1 %v5879_v31, %s4493_s25  ;;  %v2443_v31 = vsel %vm499_vm5, %v5908_v52, %v5840_v21 }
 0x3db   : > { %1966 = vrot.lane.b32.xlu0 %v1891_v58, %s4491_s19  ;;  %v5979_v39 = vpop.permute.xlu1 %1922  ;;  %v2486_v58 = vsel %vm544_vm6, %v5829_v8, %v5892_v11  ;;  %v2487_v8 = vsel %vm544_vm6, %v5892_v11, %v5818_v32  ;;  %v1746_v32 = vsel %vm499_vm5, %v5900_v29, %v5855_v26  ;;  %v1852_v26 = vsel %vm499_vm5, %v5859_v19, %v5924_v56 }
 0x3dc   : > { %v1894_v19 = vsel %vm544_vm6, %v5947_v53, %v5905_v25  ;;  %v2488_v25 = vsel %vm544_vm6, %v5921_v24, %v5961_v44  ;;  %v2489_v24 = vsel %vm544_vm6, %v5961_v44, %v5913_v22 }
 0x3dd   : > { %v5984_v40 = vpop.permute.xlu0 %2426  ;;  %1968 = vrot.lane.b32.xlu1 %v1892_v23, %s4491_s19 }
 0x3df   : > { %2199 = vrot.lane.b32.xlu0 %v1791_v41, %s4493_s25  ;;  %v5991_v27 = vpop.permute.xlu1 %2478 }
 0x3e1   : > { %v5996_v51 = vpop.permute.xlu0 %1926  ;;  %2559 = vrot.lane.b32.xlu1 %v2486_v58, %s4492_s20 }
 0x3e3   : > { %2197 = vrot.lane.b32.xlu0 %v1790_v7, %s4493_s25  ;;  %v6003_v43 = vpop.permute.xlu1 %2474 }
 0x3e5   : > { %v6008_v23 = vpop.permute.xlu0 %1879  ;;  %2535 = vrot.lane.b32.xlu1 %v2442_v46, %s4492_s20 }
 0x3e7   : > { %2561 = vrot.lane.b32.xlu0 %v2487_v8, %s4492_s20  ;;  %v6015_v41 = vpop.permute.xlu1 %2434 }
 0x3e9   : > { %v6017_v34 = vpop.permute.xlu0 %1883  ;;  %1970 = vrot.lane.b32.xlu1 %v5897_v36, %s4491_s19 }
 0x3eb   : > { %2175 = vrot.lane.b32.xlu0 %v1747_v37, %s4493_s25  ;;  %v6025_v5 = vpop.permute.xlu1 %2430 }
 0x3ed   : > { %v6027_v58 = vpop.permute.xlu0 %1845  ;;  %2569 = vrot.lane.b32.xlu1 %v5913_v22, %s4492_s20  ;;  %v1748_v22 = vsel %vm499_vm5, %v5971_v6, %v5939_v1 }
 0x3ef   : > { %2173 = vrot.lane.b32.xlu0 %v1746_v32, %s4493_s25  ;;  %v6035_v11 = vpop.permute.xlu1 %1881  ;;  %v1893_v32 = vsel %vm544_vm6, %v5897_v36, %v5947_v53  ;;  %v1792_v53 = vsel %vm544_vm6, %v5955_v4, %v5933_v20 }
 0x3f1   : > { %v6037_v7 = vpop.permute.xlu0 %1780  ;;  %2545 = vrot.lane.b32.xlu1 %v5929_v9, %s4492_s20 }
 0x3f3   : > { %2537 = vrot.lane.b32.xlu0 %v2443_v31, %s4492_s20  ;;  %v6045_v46 = vpop.permute.xlu1 %1847 }
 0x3f5   : > { %v6050_v29 = vpop.permute.xlu0 %1736  ;;  %1948 = vrot.lane.b32.xlu1 %v1852_v26, %s4491_s19  ;;  %v1793_v26 = vsel %vm544_vm6, %v5933_v20, %v1777_v15  ;;  %v1749_v20 = vsel %vm499_vm5, %v5939_v1, %v5969_v47 }
 0x3f7   : > { %1950 = vrot.lane.b32.xlu0 %v5924_v56, %s4491_s19  ;;  %v1783_v8 = vpop.permute.xlu1 %1782 }
 0x3f9   : > { %v6055_v37 = vpop.permute.xlu0 %1930  ;;  %2207 = vrot.lane.b32.xlu1 %v1777_v15, %s4493_s25  ;;  %v2444_v15 = vsel %vm499_vm5, %v5937_v61, %v5984_v40 }
 0x3fb   : > { %1952 = vrot.lane.b32.xlu0 %v5953_v35, %s4491_s19  ;;  %v6060_v21 = vpop.permute.xlu1 %1738 }
 0x3fd   : > { %v6062_v52 = vpop.permute.xlu0 %2163  ;;  %2183 = vrot.lane.b32.xlu1 %v5969_v47, %s4493_s25  ;;  %v2445_v47 = vsel %vm499_vm5, %v5984_v40, %v5929_v9  ;;  %v1853_v9 = vsel %vm499_vm5, %v5953_v35, %v6027_v58  ;;  %v1896_v35 = vsel %vm544_vm6, %v6035_v11, %v6017_v34 }
 0x3fe   : > { %7993 = vst [vmem:[#allocation26_spill] sm:$0xff] %v6062_v52 }
 0x3ff   : > { %1974 = vrot.lane.b32.xlu0 %v1894_v19, %s4491_s19  ;;  %v6070_v56 = vpop.permute.xlu1 %1932 }
 0x401   : > { %v1779_v31 = vpop.permute.xlu0 %1778  ;;  %1972 = vrot.lane.b32.xlu1 %v1893_v32, %s4491_s19 }
 0x402   : > { %v1794_v34 = vsel %vm544_vm6, %v1779_v31, %v6037_v7 }
 0x403   : > { %2205 = vrot.lane.b32.xlu0 %v1793_v26, %s4493_s25  ;;  %v6079_v16 = vpop.permute.xlu1 %2165 }
 0x404   : > { %7994 = vst [vmem:[#allocation27_spill] sm:$0xff] %v6079_v16 }
 0x405   : > { %v2477_v19 = vpop.permute.xlu0 %2476  ;;  %2565 = vrot.lane.b32.xlu1 %v2488_v25, %s4492_s20 }
 0x407   : > { %2203 = vrot.lane.b32.xlu0 %v1792_v53, %s4493_s25  ;;  %v6089_v36 = vpop.permute.xlu1 %1885 }
 0x409   : > { %v1735_v32 = vpop.permute.xlu0 %1734  ;;  %2541 = vrot.lane.b32.xlu1 %v2444_v15, %s4492_s20 }
 0x40b   : > { %2567 = vrot.lane.b32.xlu0 %v2489_v24, %s4492_s20  ;;  %v6099_v26 = vpop.permute.xlu1 %1889 }
 0x40d   : > { %v2433_v4 = vpop.permute.xlu0 %2432  ;;  %1956 = vrot.lane.b32.xlu1 %v6027_v58, %s4491_s19 }
 0x40f   : > { %2181 = vrot.lane.b32.xlu0 %v1749_v20, %s4493_s25  ;;  %v6107_v61 = vpop.permute.xlu1 %1786 }
 0x411   : > { %v6109_v25 = vpop.permute.xlu0 %1928  ;;  %2575 = vrot.lane.b32.xlu1 %v5991_v27, %s4492_s20 }
 0x413   : > { %2179 = vrot.lane.b32.xlu0 %v1748_v22, %s4493_s25  ;;  %v6117_v44 = vpop.permute.xlu1 %2484  ;;  %v1895_v22 = vsel %vm544_vm6, %v6008_v23, %v6035_v11 }
 0x415   : > { %v1850_v53 = vpop.permute.xlu0 %1849  ;;  %2551 = vrot.lane.b32.xlu1 %v6015_v41, %s4492_s20 }
 0x417   : > { %2543 = vrot.lane.b32.xlu0 %v2445_v47, %s4492_s20  ;;  %v6125_v15 = vpop.permute.xlu1 %2480 }
 0x419   : > { %v6127_v24 = vpop.permute.xlu0 %1742  ;;  %1958 = vrot.lane.b32.xlu1 %v6045_v46, %s4491_s19 }
 0x41b   : > { %1976 = vrot.lane.b32.xlu0 %v6008_v23, %s4491_s19  ;;  %v6133_v6 = vpop.permute.xlu1 %2440  ;;  %v2490_v23 = vsel %vm544_vm6, %v6003_v43, %v2477_v19  ;;  %v2491_v43 = vsel %vm544_vm6, %v2477_v19, %v5991_v27  ;;  %v1750_v27 = vsel %vm499_vm5, %v1735_v32, %v6050_v29 }
 0x41d   : > { %v6135_v1 = vpop.permute.xlu0 %2169  ;;  %2213 = vrot.lane.b32.xlu1 %v1783_v8, %s4493_s25 }
 0x41e   : > { %7995 = vst [vmem:[#allocation28_spill] sm:$0xff] %v6135_v1 }
 0x41f   : > { %1954 = vrot.lane.b32.xlu0 %v1853_v9, %s4491_s19  ;;  %v6142_v40 = vpop.permute.xlu1 %2436  ;;  %v1795_v9 = vsel %vm544_vm6, %v6037_v7, %v1783_v8  ;;  %v2446_v8 = vsel %vm499_vm5, %v6025_v5, %v2433_v4  ;;  %v1751_v5 = vsel %vm499_vm5, %v6050_v29, %v6060_v21 }
 0x421   : > { %v1888_v20 = vpop.permute.xlu0 %1887  ;;  %2189 = vrot.lane.b32.xlu1 %v6060_v21, %s4493_s25  ;;  %v2447_v21 = vsel %vm499_vm5, %v2433_v4, %v6015_v41  ;;  %v1680_v41 = vmul.f32 %v5770_v14, %v5118_v17 }
 0x423   : > { %1978 = vrot.lane.b32.xlu0 %v1895_v22, %s4491_s19  ;;  %v6150_v47 = vpop.permute.xlu1 %1936 }
 0x425   : > { %v6155_v58 = vpop.permute.xlu0 %1788  ;;  %1980 = vrot.lane.b32.xlu1 %v1896_v35, %s4491_s19 }
 0x427   : > { %2211 = vrot.lane.b32.xlu0 %v1795_v9, %s4493_s25  ;;  %v6161_v57 = vpop.permute.xlu1 %1784 }
 0x429   : > { %v6165_v22 = vpop.permute.xlu0 %2482  ;;  %2571 = vrot.lane.b32.xlu1 %v2490_v23, %s4492_s20 }
 0x42a   : > { %v2493_v33 = vsel %vm544_vm6, %v6165_v22, %v6117_v44 }
 0x42b   : > { %2209 = vrot.lane.b32.xlu0 %v1794_v34, %s4493_s25  ;;  %v6171_v11 = vpop.permute.xlu1 %1744 }
 0x42d   : > { %v6175_v35 = vpop.permute.xlu0 %1740  ;;  %2547 = vrot.lane.b32.xlu1 %v2446_v8, %s4492_s20 }
 0x42f   : > { %2573 = vrot.lane.b32.xlu0 %v2491_v43, %s4492_s20  ;;  %v6181_v9 = vpop.permute.xlu1 %1934  ;;  %v1854_v43 = vsel %vm499_vm5, %v6045_v46, %v1850_v53 }
 0x431   : > { %v6183_v23 = vpop.permute.xlu0 %2438  ;;  %1982 = vrot.lane.b32.xlu1 %v6089_v36, %s4491_s19 }
 0x433   : > { %2187 = vrot.lane.b32.xlu0 %v1751_v5, %s4493_s25  ;;  %v6191_v7 = vpop.permute.xlu1 %2171 }
 0x434   : > { %7996 = vst [vmem:[#allocation29_spill] sm:$0xff] %v6191_v7 }
 0x435   : > { %v6193_v31 = vpop.permute.xlu0 %1938  ;;  %2581 = vrot.lane.b32.xlu1 %v6117_v44, %s4492_s20 }
 0x437   : > { %2185 = vrot.lane.b32.xlu0 %v1750_v27, %s4493_s25  ;;  %v6200_v19 = vpop.permute.xlu1 %1944 }
 0x439   : > { %v6202_v34 = vpop.permute.xlu0 %2167  ;;  %2557 = vrot.lane.b32.xlu1 %v6133_v6, %s4492_s20 }
 0x43a   : > { %7997 = vst [vmem:[#allocation30_spill] sm:$0xff] %v6202_v34 }
 0x43b   : > { %2549 = vrot.lane.b32.xlu0 %v2447_v21, %s4492_s20  ;;  %v6209_v8 = vpop.permute.xlu1 %2563  ;;  %v1897_v21 = vsel %vm544_vm6, %v6089_v36, %v1888_v20  ;;  %v2377_v36 = vmul.f32 %v5770_v14, %v5351_v50  ;;  %v1679_v14 = vmul.f32 %v5697_v42, %v5128_v60 }
 0x43c   : > { %7998 = vst [vmem:[#allocation31_spill] sm:$0xff] %v6209_v8 }
 0x43d   : > { %v6213_v29 = vpop.permute.xlu0 %2531  ;;  %1960 = vrot.lane.b32.xlu1 %v1854_v43, %s4491_s19 }
 0x43e   : > { %7999 = vst [vmem:[#allocation32_spill] sm:$0xff] %v6213_v29 }
 0x43f   : > { %1962 = vrot.lane.b32.xlu0 %v1850_v53, %s4491_s19  ;;  %v6217_v32 = vpop.permute.xlu1 %2539  ;;  %v1678_v53 = vmul.f32 %v5648_v38, %v5320_v59 }
 0x440   : > { %8000 = vst [vmem:[#allocation33_spill] sm:$0xff] %v6217_v32 }
 0x441   : > { %v6219_v5 = vpop.permute.xlu0 %1940  ;;  %2219 = vrot.lane.b32.xlu1 %v6155_v58, %s4493_s25 }
 0x443   : > { %2161 = vrot.lane.b32.xlu0 %v1680_v41, %s4493_s25  ;;  %v6226_v4 = vpop.permute.xlu1 %1946  ;;  %v1898_v41 = vsel %vm544_vm6, %v1888_v20, %v6099_v26  ;;  %v2379_v26 = vmul.f32 %v5783_v55, %v5162_v54  ;;  %v1797_v55 = vsel %vm544_vm6, %v6107_v61, %v6155_v58  ;;  %v1796_v58 = vsel %vm544_vm6, %v6161_v57, %v6107_v61 }
 0x444   : > { %v1753_v57 = vsel %vm499_vm5, %v6127_v24, %v6171_v11 }
 0x445   : > { %v6228_v46 = vpop.permute.xlu0 %1964  ;;  %2195 = vrot.lane.b32.xlu1 %v6171_v11, %s4493_s25  ;;  %v2448_v11 = vsel %vm499_vm5, %v6142_v40, %v6183_v23  ;;  %v2374_v40 = vmul.f32 %v5697_v42, %v5351_v50 }
 0x447   : > { %2157 = vrot.lane.b32.xlu0 %v1678_v53, %s4493_s25  ;;  %v6235_v27 = vpop.permute.xlu1 %2201 }
 0x449   : > { %v6239_v43 = vpop.permute.xlu0 %1942  ;;  %1984 = vrot.lane.b32.xlu1 %v1897_v21, %s4491_s19 }
 0x44b   : > { %1986 = vrot.lane.b32.xlu0 %v1898_v41, %s4491_s19  ;;  %v6245_v62 = vpop.permute.xlu1 %2177  ;;  %v1677_v41 = vmul.f32 %v5697_v42, %v5118_v17  ;;  %v2373_v42 = vmul.f32 %v5648_v38, %v5162_v54 }
 0x44c   : > { %8001 = vst [vmem:[#allocation34_spill] sm:$0xff] %v6245_v62 }
 0x44d   : > { %v6249_v53 = vpop.permute.xlu0 %1966  ;;  %2533 = vrot.lane.b32.xlu1 %v2381_v13, %s4492_s20 }
 0x44f   : > { %2525 = vrot.lane.b32.xlu0 %v2377_v36, %s4492_s20  ;;  %v6255_v21 = vpop.permute.xlu1 %1968 }
 0x451   : > { %v6259_v20 = vpop.permute.xlu0 %2199  ;;  %2529 = vrot.lane.b32.xlu1 %v2379_v26, %s4492_s20 }
 0x453   : > { %2155 = vrot.lane.b32.xlu0 %v1677_v41, %s4493_s25  ;;  %v6265_v13 = vpop.permute.xlu1 %2559  ;;  %v2378_v41 = vmul.f32 %v5721_v12, %v5170_v0 }
 0x454   : > { %8002 = vst [vmem:[#allocation35_spill] sm:$0xff] %v6265_v13 }
 0x455   : > { %v6269_v36 = vpop.permute.xlu0 %2197  ;;  %2159 = vrot.lane.b32.xlu1 %v1679_v14, %s4493_s25 }
 0x457   : > { %2217 = vrot.lane.b32.xlu0 %v1797_v55, %s4493_s25  ;;  %v6276_v26 = vpop.permute.xlu1 %2535 }
 0x458   : > { %8003 = vst [vmem:[#allocation36_spill] sm:$0xff] %v6276_v26 }
 0x459   : > { %v6280_v48 = vpop.permute.xlu0 %2561  ;;  %2527 = vrot.lane.b32.xlu1 %v2378_v41, %s4492_s20 }
 0x45a   : > { %8004 = vst [vmem:[#allocation37_spill] sm:$0xff] %v6280_v48 }
 0x45b   : > { %2579 = vrot.lane.b32.xlu0 %v2493_v33, %s4492_s20  ;;  %v6287_v14 = vpop.permute.xlu1 %1970  ;;  %v2492_v33 = vsel %vm544_vm6, %v6125_v15, %v6165_v22  ;;  %v1752_v15 = vsel %vm499_vm5, %v6175_v35, %v6127_v24  ;;  %v1676_v24 = vmul.f32 %v5631_v3, %v5128_v60  ;;  %v4360_v60 = vld [vmem:[%s7881_s3 + $0x28] sm:$0xff] }
 0x45d   : > { %v6292_v55 = vpop.permute.xlu0 %2175  ;;  %2215 = vrot.lane.b32.xlu1 %v1796_v58, %s4493_s25 }
 0x45e   : > { %8005 = vst [vmem:[#allocation38_spill] sm:$0xff] %v6292_v55 }
 0x45f   : > { %2151 = vrot.lane.b32.xlu0 %v1675_v45, %s4493_s25  ;;  %v6298_v41 = vpop.permute.xlu1 %2569  ;;  %v2376_v45 = vmul.f32 %v5721_v12, %v5162_v54  ;;  %v2449_v12 = vsel %vm499_vm5, %v6183_v23, %v6133_v6  ;;  %v2375_v6 = vmul.f32 %v5648_v38, %v5170_v0  ;;  %v2370_v38 = vmul.f32 %v5611_v18, %v5162_v54 }
 0x461   : > { %v6303_v44 = vpop.permute.xlu0 %2173  ;;  %2577 = vrot.lane.b32.xlu1 %v2492_v33, %s4492_s20 }
 0x462   : > { %8006 = vst [vmem:[#allocation39_spill] sm:$0xff] %v6303_v44 }
 0x463   : > { %2193 = vrot.lane.b32.xlu0 %v1753_v57, %s4493_s25  ;;  %v6310_v61 = vpop.permute.xlu1 %2545 }
 0x464   : > { %8007 = vst [vmem:[#allocation40_spill] sm:$0xff] %v6310_v61 }
 0x465   : > { %v6314_v58 = vpop.permute.xlu0 %2537  ;;  %2523 = vrot.lane.b32.xlu1 %v2376_v45, %s4492_s20 }
 0x466   : > { %8008 = vst [vmem:[#allocation41_spill] sm:$0xff] %v6314_v58 }
 0x467   : > { %2191 = vrot.lane.b32.xlu0 %v1752_v15, %s4493_s25  ;;  %v6321_v22 = vpop.permute.xlu1 %1948  ;;  %v1674_v15 = vmul.f32 %v5631_v3, %v5118_v17 }
 0x469   : > { %v6326_v33 = vpop.permute.xlu0 %1950  ;;  %2553 = vrot.lane.b32.xlu1 %v2448_v11, %s4492_s20 }
 0x46b   : > { %2555 = vrot.lane.b32.xlu0 %v2449_v12, %s4492_s20  ;;  %v6333_v57 = vpop.permute.xlu1 %2207 }
 0x46d   : > { %v6337_v35 = vpop.permute.xlu0 %1952  ;;  %2153 = vrot.lane.b32.xlu1 %v1676_v24, %s4493_s25  ;;  %v2371_v24 = vmul.f32 %v5631_v3, %v5351_v50  ;;  %v4361_v50 = vld [vmem:[%s7881_s3 + $0x30] sm:$0xff] }
 0x46f   : > { %2519 = vrot.lane.b32.xlu0 %v2374_v40, %s4492_s20  ;;  %v6343_v45 = vpop.permute.xlu1 %2183 }
 0x470   : > { %8009 = vst [vmem:[#allocation42_spill] sm:$0xff] %v6343_v45 }
 0x471   : > { %v6347_v23 = vpop.permute.xlu0 %1974  ;;  %2521 = vrot.lane.b32.xlu1 %v2375_v6, %s4492_s20  ;;  %v2372_v6 = vmul.f32 %v5611_v18, %v5170_v0 }
 0x473   : > { %2149 = vrot.lane.b32.xlu0 %v1674_v15, %s4493_s25  ;;  %v6353_v11 = vpop.permute.xlu1 %1972 }
 0x475   : > { %v6357_v12 = vpop.permute.xlu0 %2205  ;;  %2517 = vrot.lane.b32.xlu1 %v2373_v42, %s4492_s20  ;;  %v4358_v42 = vld [vmem:[%s7880_s2 + $0x38] sm:$0xff] }
 0x477   : > { %2513 = vrot.lane.b32.xlu0 %v2371_v24, %s4492_s20  ;;  %v6363_v40 = vpop.permute.xlu1 %2565  ;;  %v4357_v24 = vld [vmem:[%s7880_s2 + $0x30] sm:$0xff] }
 0x478   : > { %8010 = vst [vmem:[#allocation43_spill] sm:$0xff] %v6363_v40 }
 0x479   : > { %v6367_v15 = vpop.permute.xlu0 %2203  ;;  %2515 = vrot.lane.b32.xlu1 %v2372_v6, %s4492_s20  ;;  %v4362_v6 = vld [vmem:[%s7881_s3 + $0x38] sm:$0xff] }
 0x47b   : > { %2511 = vrot.lane.b32.xlu0 %v2370_v38, %s4492_s20  ;;  %v6376_v3 = vpop.permute.xlu1 %2541  ;;  %v4356_v38 = vld [vmem:[%s7880_s2 + $0x28] sm:$0xff] }
 0x47c   : > { %8011 = vst [vmem:[#allocation44_spill] sm:$0xff] %v6376_v3 }
 0x47d   : > { %v6381_v0 = vpop.permute.xlu0 %2567  ;;  %2762 = vperm.xlu1 %4454, %v4358_v42  }
 0x47f   : > { %2757 = vperm.xlu0 %4453, %v4357_v24   ;;  %v6386_v18 = vpop.permute.xlu1 %1956  ;;  %v4355_v24 = vld [vmem:[%s7880_s2 + $0x20] sm:$0xff] }
 0x481   : > { %v6391_v54 = vpop.permute.xlu0 %2181  ;;  %2803 = vperm.xlu1 %4454, %v4362_v6  }
 0x482   : > { %8012 = vst [vmem:[#allocation45_spill] sm:$0xff] %v6391_v54 }
 0x483   : > { %2752 = vperm.xlu0 %4453, %v4356_v38   ;;  %v6396_v42 = vpop.permute.xlu1 %2575  ;;  %v4359_v38 = vld [vmem:[%s7881_s3 + $0x20] sm:$0xff] }
 0x485   : > { %v6401_v17 = vpop.permute.xlu0 %2179  ;;  %2798 = vperm.xlu1 %4454, %v4361_v50  }
 0x486   : > { %8013 = vst [vmem:[#allocation46_spill] sm:$0xff] %v6401_v17 }
 0x487   : > { %2747 = vperm.xlu0 %4453, %v4355_v24   ;;  %v6406_v6 = vpop.permute.xlu1 %2551 }
 0x488   : > { %8014 = vst [vmem:[#allocation47_spill] sm:$0xff] %v6406_v6 }
 0x489   : > { %v6411_v59 = vpop.permute.xlu0 %2543  ;;  %2793 = vperm.xlu1 %4454, %v4360_v60  }
 0x48a   : > { %8015 = vst [vmem:[#allocation48_spill] sm:$0xff] %v6411_v59 }
 0x48b   : > { %2788 = vperm.xlu0 %4453, %v4359_v38   ;;  %v1959_v30 = vpop.permute.xlu1 %1958 }
 0x48d   : > { %v1977_v29 = vpop.permute.xlu0 %1976 }
 0x48f   : > { %v6413_v26 = vpop.permute.xlu1 %2213 }
 0x491   : > { %v1955_v50 = vpop.permute.xlu0 %1954 }
 0x493   : > { %v6415_v58 = vpop.permute.xlu1 %2189 }
 0x495   : > { %v1979_v32 = vpop.permute.xlu0 %1978 }
 0x497   : > { %v1981_v3 = vpop.permute.xlu1 %1980 }
 0x499   : > { %v6417_v24 = vpop.permute.xlu0 %2211 }
 0x49b   : > { %v6419_v52 = vpop.permute.xlu1 %2571 }
 0x49d   : > { %v6421_v16 = vpop.permute.xlu0 %2209 }
 0x49f   : > { %v6423_v61 = vpop.permute.xlu1 %2547 }
 0x4a0   : > { %8016 = vst [vmem:[#allocation49_spill] sm:$0xff] %v6423_v61 }
 0x4a1   : > { %v6425_v59 = vpop.permute.xlu0 %2573 }
 0x4a3   : > { %v1983_v60 = vpop.permute.xlu1 %1982 }
 0x4a5   : > { %v6427_v38 = vpop.permute.xlu0 %2187 }
 0x4a7   : > { %v6429_v34 = vpop.permute.xlu1 %2581 }
 0x4a9   : > { %v6431_v1 = vpop.permute.xlu0 %2185 }
 0x4ab   : > { %v6433_v7 = vpop.permute.xlu1 %2557 }
 0x4ac   : > { %8017 = vst [vmem:[#allocation50_spill] sm:$0xff] %v6433_v7 }
 0x4ad   : > { %v6435_v6 = vpop.permute.xlu0 %2549 }
 0x4ae   : > { %8018 = vst [vmem:[#allocation51_spill] sm:$0xff] %v6435_v6  ;;  %v2009_v6 = vsel %vm603_vm0, %v1979_v32, %v1981_v3 }
 0x4af   : > { %v1961_v44 = vpop.permute.xlu1 %1960 }
 0x4b1   : > { %v1963_v55 = vpop.permute.xlu0 %1962 }
 0x4b3   : > { %v2220_v62 = vpop.permute.xlu1 %2219 }
 0x4b5   : > { %v6437_v17 = vpop.permute.xlu0 %2161 }
 0x4b6   : > { %8019 = vst [vmem:[#allocation52_spill] sm:$0xff] %v6437_v17  ;;  %v2008_v17 = vsel %vm603_vm0, %v1977_v29, %v1979_v32  ;;  %v2003_v29 = vsel %vm603_vm0, %v1961_v44, %v1963_v55 }
 0x4b7   : > { %v6439_v13 = vpop.permute.xlu1 %2195 }
 0x4b9   : > { %v6441_v61 = vpop.permute.xlu0 %2157 }
 0x4ba   : > { %8020 = vst [vmem:[#allocation53_spill] sm:$0xff] %v6441_v61  ;;  %v2007_v61 = vsel %vm603_vm0, %v6353_v11, %v6347_v23  ;;  %v2000_v23 = vsel %vm603_vm0, %v6337_v35, %v1955_v50 }
 0x4bb   : > { %v1985_v54 = vpop.permute.xlu1 %1984 }
 0x4bc   : > { %v2010_v7 = vsel %vm603_vm0, %v1983_v60, %v1985_v54  ;;  %v8024_v60 = vld [vmem:[#allocation42_spill] sm:$0xff] }
 0x4bd   : > { %v1987_v45 = vpop.permute.xlu0 %1986 }
 0x4be   : > { %v2011_v48 = vsel %vm603_vm0, %v1985_v54, %v1987_v45  ;;  %v2005_v54 = vsel %vm603_vm0, %v6249_v53, %v6255_v21 }
 0x4bf   : > { %2056 = vmatprep.subr.mxu1 %v2011_v48  ;;  %v6444_v8 = vpop.permute.xlu1 %2533  ;;  %v2006_v48 = vsel %vm603_vm0, %v6287_v14, %v6353_v11  ;;  %v2002_v14 = vsel %vm603_vm0, %v1959_v30, %v1961_v44  ;;  %v1998_v30 = vsel %vm603_vm0, %v6226_v4, %v6321_v22  ;;  %v1997_v44 = vsel %vm603_vm0, %v6239_v43, %v6200_v19 }
 0x4c0   : > { %2057 = vmatpush1.msra.mxu1 %v2010_v7  ;;  %v1994_v4 = vsel %vm603_vm0, %v6181_v9, %v6150_v47  ;;  %v1993_v19 = vsel %vm603_vm0, %v6055_v37, %v6070_v56  ;;  %v2241_v9 = vsel %vm1015_vm2, %v6421_v16, %v6417_v24  ;;  %v1991_v56 = vsel %vm603_vm0, %v5945_v10, %v5996_v51 }
 0x4c1   : > { %v6448_v40 = vpop.permute.xlu0 %2525  ;;  %2058 = vmatprep.subr.mxu1 %v2009_v6  ;;  %v2239_v16 = vsel %vm1015_vm2, %v6367_v15, %v6357_v12  ;;  %v1989_v51 = vsel %vm603_vm0, %v5873_v63, %v5888_v49  ;;  %v8021_v6 = vld [vmem:[#allocation43_spill] sm:$0xff] }
 0x4c2   : > { %2059 = vmatpush1.msra.mxu1 %v2008_v17  ;;  %v2004_v17 = vsel %vm603_vm0, %v6228_v46, %v6249_v53  ;;  %v1999_v46 = vsel %vm603_vm0, %v6321_v22, %v6326_v33  ;;  %v1996_v33 = vsel %vm603_vm0, %v6219_v5, %v6239_v43  ;;  %v1992_v5 = vsel %vm603_vm0, %v6109_v25, %v6055_v37 }
 0x4c3   : > { %2060 = vmatprep.subr.mxu1 %v2007_v61  ;;  %v6454_v45 = vpop.permute.xlu1 %2529  ;;  %v2001_v61 = vsel %vm603_vm0, %v1955_v50, %v6386_v18  ;;  %v1990_v37 = vsel %vm603_vm0, %v5979_v39, %v5945_v10  ;;  %v4335_v39 = vld [vmem:[%s7879_s1 + $0x80] sm:$0xff]  ;;  %v1988_v10 = vsel %vm603_vm0, %v5916_v28, %v5873_v63  ;;  %v2234_v18 = vsel %vm1015_vm2, %v6427_v38, %v6415_v58  ;;  %v8022_v50 = vld [vmem:[#allocation31_spill] sm:$0xff] }
 0x4c4   : > { %2061 = vmatpush1.msra.mxu1 %v2006_v48  ;;  %v8025_v48 = vld [vmem:[#allocation45_spill] sm:$0xff] }
 0x4c5   : > { %v6462_v7 = vpop.permute.xlu0 %2155  ;;  %2062 = vmatprep.subr.mxu1 %v2005_v54  ;;  %v2232_v58 = vsel %vm1015_vm2, %v8025_v48, %v8024_v60  ;;  %v8026_v54 = vld [vmem:[#allocation35_spill] sm:$0xff] }
 0x4c6   : > { %2063 = vmatpush1.msra.mxu1 %v2004_v17 }
 0x4c7   : > { %2064 = vmatprep.subr.mxu1 %v2003_v29  ;;  %v6468_v32 = vpop.permute.xlu1 %2159 }
 0x4c8   : > { %2065 = vmatpush1.msra.mxu1 %v2002_v14 }
 0x4c9   : > { %v2218_v21 = vpop.permute.xlu0 %2217  ;;  %2066 = vmatprep.subr.mxu1 %v2001_v61 }
 0x4ca   : > { %2067 = vmatpush1.msra.mxu1 %v2000_v23  ;;  %v2244_v53 = vsel %vm1015_vm2, %v2218_v21, %v2220_v62  ;;  %v1995_v62 = vsel %vm603_vm0, %v6150_v47, %v6193_v31  ;;  %v2242_v47 = vsel %vm1015_vm2, %v6417_v24, %v6413_v26  ;;  %v2240_v31 = vsel %vm1015_vm2, %v6357_v12, %v6333_v57  ;;  %v8030_v23 = vld [vmem:[#allocation38_spill] sm:$0xff] }
 0x4cb   : > { %2068 = vmatprep.subr.mxu1 %v1999_v46  ;;  %2289 = vmatprep.subr.mxu0 %v2244_v53  ;;  %v6479_v55 = vpop.permute.xlu1 %2527  ;;  %v2238_v57 = vsel %vm1015_vm2, %v6259_v20, %v6235_v27  ;;  %v2237_v12 = vsel %vm1015_vm2, %v6269_v36, %v6259_v20  ;;  %v2604_v20 = vsel %vm446_vm1, %v6425_v59, %v6396_v42  ;;  %v4336_v53 = vld [vmem:[%s7879_s1 + $0x88] sm:$0xff] }
 0x4cc   : > { %2069 = vmatpush1.msra.mxu1 %v1998_v30  ;;  %v2602_v36 = vsel %vm446_vm1, %v6381_v0, %v6298_v41  ;;  %v2233_v42 = vsel %vm1015_vm2, %v6431_v1, %v6427_v38  ;;  %v8023_v41 = vld [vmem:[#allocation37_spill] sm:$0xff]  ;;  %v8027_v38 = vld [vmem:[#allocation46_spill] sm:$0xff]  ;;  %v8031_v30 = vld [vmem:[#allocation39_spill] sm:$0xff] }
 0x4cd   : > { %v2580_v35 = vpop.permute.xlu0 %2579  ;;  %2070 = vmatprep.subr.mxu1 %v1997_v44  ;;  %v2600_v24 = vsel %vm446_vm1, %v8023_v41, %v8022_v50  ;;  %v2599_v1 = vsel %vm446_vm1, %v8026_v54, %v8023_v41  ;;  %v2231_v17 = vsel %vm1015_vm2, %v8027_v38, %v8025_v48  ;;  %v2229_v44 = vsel %vm1015_vm2, %v8031_v30, %v8030_v23  ;;  %v4333_v38 = vld [vmem:[%s7879_s1 + $0x70] sm:$0xff] }
 0x4ce   : > { %2071 = vmatpush1.msra.mxu1 %v1996_v33  ;;  %v2606_v63 = vsel %vm446_vm1, %v2580_v35, %v6429_v34  ;;  %v2603_v34 = vsel %vm446_vm1, %v6419_v52, %v6425_v59  ;;  %v2601_v59 = vsel %vm446_vm1, %v8021_v6, %v6381_v0  ;;  %v8028_v0 = vld [vmem:[#allocation50_spill] sm:$0xff]  ;;  %v8032_v33 = vld [vmem:[#allocation47_spill] sm:$0xff] }
 0x4cf   : > { %2072 = vmatprep.subr.mxu1 %v1995_v62  ;;  %v2216_v22 = vpop.permute.xlu1 %2215  ;;  %v8033_v62 = vld [vmem:[#allocation51_spill] sm:$0xff] }
 0x4d0   : > { %v2243_v11 = vsel %vm1015_vm2, %v2216_v22, %v2218_v21  ;;  %2073 = vmatpush1.msra.mxu1 %v1994_v4  ;;  %v8029_v21 = vld [vmem:[#allocation34_spill] sm:$0xff]  ;;  %v2596_v4 = vsel %vm446_vm1, %v8033_v62, %v8032_v33  ;;  %v8034_v22 = vld [vmem:[#allocation29_spill] sm:$0xff] }
 0x4d1   : > { %v6503_v43 = vpop.permute.xlu0 %2151  ;;  %2074 = vmatprep.subr.mxu1 %v1993_v19  ;;  %2290 = vmatpush1.msra.mxu0 %v2243_v11  ;;  %v2230_v46 = vsel %vm1015_vm2, %v8030_v23, %v8029_v21  ;;  %v8035_v11 = vld [vmem:[#allocation28_spill] sm:$0xff] }
 0x4d2   : > { %2075 = vmatpush1.msra.mxu1 %v1992_v5  ;;  %2291 = vmatprep.subr.mxu0 %v2242_v47  ;;  %v2228_v19 = vsel %vm1015_vm2, %v8035_v11, %v8034_v22  ;;  %v8036_v5 = vld [vmem:[#allocation49_spill] sm:$0xff] }
 0x4d3   : > { %2076 = vmatprep.subr.mxu1 %v1991_v56  ;;  %2292 = vmatpush1.msra.mxu0 %v2241_v9  ;;  %v2578_v25 = vpop.permute.xlu1 %2577  ;;  %v2595_v47 = vsel %vm446_vm1, %v8036_v5, %v8033_v62  ;;  %v8037_v9 = vld [vmem:[#allocation30_spill] sm:$0xff] }
 0x4d4   : > { %2077 = vmatpush1.msra.mxu1 %v1990_v37  ;;  %2293 = vmatprep.subr.mxu0 %v2240_v31  ;;  %v2605_v15 = vsel %vm446_vm1, %v2578_v25, %v2580_v35  ;;  %v2227_v56 = vsel %vm1015_vm2, %v8037_v9, %v8035_v11  ;;  %v8038_v37 = vld [vmem:[#allocation40_spill] sm:$0xff] }
 0x4d5   : > { %v2194_v26 = vpop.permute.xlu0 %2193  ;;  %2078 = vmatprep.subr.mxu1 %v1989_v51  ;;  %2294 = vmatpush1.msra.mxu0 %v2239_v16  ;;  %v8039_v25 = vld [vmem:[#allocation48_spill] sm:$0xff]  ;;  %v8040_v51 = vld [vmem:[#allocation27_spill] sm:$0xff] }
 0x4d6   : > { %2079 = vmatpush1.msra.mxu1 %v1988_v10  ;;  %2295 = vmatprep.subr.mxu0 %v2238_v57  ;;  %v2236_v49 = vsel %vm1015_vm2, %v2194_v26, %v6439_v13  ;;  %v2594_v31 = vsel %vm446_vm1, %v8039_v25, %v8038_v37 }
 0x4d7   : > { %4339 = vmatmul.mubr.msk.f32.vlgmr.msra.gmra.mxu1 %vm829_vm9, %v4335_v39  ;;  %2296 = vmatpush1.msra.mxu0 %v2237_v12  ;;  %v6543_v28 = vpop.permute.xlu1 %2523  ;;  %v8041_v39 = vld [vmem:[#allocation26_spill] sm:$0xff]  ;;  %v4337_v12 = vld [vmem:[%s7879_s1 + $0x90] sm:$0xff] }
 0x4d8   : > { %2651 = vmatprep.subr.mxu1 %v2606_v63  ;;  %2297 = vmatprep.subr.mxu0 %v2236_v49  ;;  %v2226_v10 = vsel %vm1015_vm2, %v8041_v39, %v8040_v51  ;;  %v8043_v49 = vld [vmem:[#allocation52_spill] sm:$0xff]  ;;  %v2587_v48 = vsel %vm446_vm1, %v6543_v28, %v6448_v40  ;;  %v4347_v28 = vld [vmem:[%s7879_s1 + $0xa0] sm:$0xff] }
 0x4d9   : > { %2652 = vmatpush1.msra.mxu1 %v2605_v15  ;;  %v2192_v27 = vpop.permute.xlu0 %2191  ;;  %2118 = vmatprep.mubr.f32.mxu1 %v7986_v2  ;;  %v2225_v63 = vsel %vm1015_vm2, %v8043_v49, %v8041_v39 }
 0x4da   : > { %v2235_v13 = vsel %vm1015_vm2, %v2192_v27, %v2194_v26  ;;  %2653 = vmatprep.subr.mxu1 %v2604_v20  ;;  %v8042_v26 = vld [vmem:[#allocation44_spill] sm:$0xff]  ;;  %v8044_v27 = vld [vmem:[#allocation33_spill] sm:$0xff] }
 0x4db   : > { %2654 = vmatpush1.msra.mxu1 %v2603_v34  ;;  %2298 = vmatpush1.msra.mxu0 %v2235_v13  ;;  %v2554_v3 = vpop.permute.xlu1 %2553  ;;  %v2593_v57 = vsel %vm446_vm1, %v8042_v26, %v8039_v25  ;;  %v8045_v20 = vld [vmem:[#allocation41_spill] sm:$0xff] }
 0x4dc   : > { %2655 = vmatprep.subr.mxu1 %v2602_v36  ;;  %2299 = vmatprep.subr.mxu0 %v2234_v18  ;;  %v2592_v13 = vsel %vm446_vm1, %v8045_v20, %v8044_v27  ;;  %v8046_v34 = vld [vmem:[#allocation53_spill] sm:$0xff] }
 0x4dd   : > { %2656 = vmatpush1.msra.mxu1 %v2601_v59  ;;  %v2556_v52 = vpop.permute.xlu0 %2555  ;;  %2300 = vmatpush1.msra.mxu0 %v2233_v42  ;;  %v2224_v36 = vsel %vm1015_vm2, %v8046_v34, %v6468_v32  ;;  %v2223_v6 = vsel %vm1015_vm2, %v6462_v7, %v8046_v34  ;;  %v8048_v59 = vld [vmem:[#allocation32_spill] sm:$0xff]  ;;  %v4338_v7 = vld [vmem:[%s7879_s1 + $0x98] sm:$0xff] }
 0x4de   : > { %2657 = vmatprep.subr.mxu1 %v2600_v24  ;;  %2301 = vmatprep.subr.mxu0 %v2232_v58  ;;  %v2598_v29 = vsel %vm446_vm1, %v2556_v52, %v8028_v0  ;;  %v2597_v14 = vsel %vm446_vm1, %v2554_v3, %v2556_v52  ;;  %v8047_v3 = vld [vmem:[#allocation36_spill] sm:$0xff]  ;;  %v2590_v52 = vsel %vm446_vm1, %v8048_v59, %v6444_v8  ;;  %v4331_v8 = vld [vmem:[%s7879_s1 + $0x60] sm:$0xff]  ;;  %v4334_v0 = vld [vmem:[%s7879_s1 + $0x78] sm:$0xff] }
 0x4df   : > { %2658 = vmatpush1.msra.mxu1 %v2599_v1  ;;  %2302 = vmatpush1.msra.mxu0 %v2231_v17  ;;  %v2154_v61 = vpop.permute.xlu1 %2153  ;;  %v2591_v18 = vsel %vm446_vm1, %v8047_v3, %v8045_v20  ;;  %v2589_v50 = vsel %vm446_vm1, %v6454_v45, %v8048_v59  ;;  %v2588_v45 = vsel %vm446_vm1, %v6448_v40, %v6479_v55  ;;  %v4332_v40 = vld [vmem:[%s7879_s1 + $0x68] sm:$0xff] }
 0x4e0   : > { %2659 = vmatprep.subr.mxu1 %v2598_v29  ;;  %2303 = vmatprep.subr.mxu0 %v2230_v46  ;;  %v2222_v32 = vsel %vm1015_vm2, %v6503_v43, %v2154_v61  ;;  %v4348_v17 = vld [vmem:[%s7879_s1 + $0xa8] sm:$0xff]  ;;  %v4349_v29 = vld [vmem:[%s7879_s1 + $0xb0] sm:$0xff] }
 0x4e1   : > { %2660 = vmatpush1.msra.mxu1 %v2597_v14  ;;  %v2520_v35 = vpop.permute.xlu0 %2519  ;;  %2304 = vmatpush1.msra.mxu0 %v2229_v44  ;;  %v4350_v14 = vld [vmem:[%s7879_s1 + $0xb8] sm:$0xff]  ;;  %v8051_v20 = vld [vmem:[#allocation3_spill] sm:$0xff] }
 0x4e2   : > { %2661 = vmatprep.subr.mxu1 %v2596_v4  ;;  %4340 = vmatmul.mubr.msk.f32.gmra.mxu1 %vm829_vm9, %v4336_v53  ;;  %v8052_v3 = vld [vmem:[#allocation7_spill] sm:$0xff] }
 0x4e3   : > { %2305 = vmatprep.subr.mxu0 %v2228_v19  ;;  %2662 = vmatpush1.msra.mxu1 %v2595_v47  ;;  %v2522_v16 = vpop.permute.xlu1 %2521 }
 0x4e4   : > { %2306 = vmatpush1.msra.mxu0 %v2227_v56  ;;  %2663 = vmatprep.subr.mxu1 %v2594_v31 }
 0x4e5   : > { %2307 = vmatprep.subr.mxu0 %v2226_v10  ;;  %2664 = vmatpush1.msra.mxu1 %v2593_v57  ;;  %v2150_v15 = vpop.permute.xlu0 %2149  ;;  %v8049_v10 = vld [vmem:[#allocation2_spill] sm:$0xff] }
 0x4e6   : > { %2124 = vmatprep.mubr.f32.mxu1 %v7986_v2  ;;  %2308 = vmatpush1.msra.mxu0 %v2225_v63  ;;  %v2221_v24 = vsel %vm1015_vm2, %v2150_v15, %v6503_v43  ;;  %v2586_v43 = vsel %vm446_vm1, %v2520_v35, %v2522_v16  ;;  %v8050_v63 = vld [vmem:[#allocation6_spill] sm:$0xff] }
 0x4e7   : > { %2665 = vmatprep.subr.mxu1 %v2592_v13  ;;  %4341 = vmatmul.mubr.msk.f32.gmra.mxu1 %vm829_vm9, %v4337_v12  ;;  %v2518_v42 = vpop.permute.xlu1 %2517 }
 0x4e8   : > { %2309 = vmatprep.subr.mxu0 %v2224_v36  ;;  %2666 = vmatpush1.msra.mxu1 %v2591_v18  ;;  %v2585_v1 = vsel %vm446_vm1, %v2518_v42, %v2520_v35 }
 0x4e9   : > { %2310 = vmatpush1.msra.mxu0 %v2223_v6  ;;  %2667 = vmatprep.subr.mxu1 %v2590_v52  ;;  %v2514_v41 = vpop.permute.xlu0 %2513  ;;  %v8053_v52 = vld [vmem:[#allocation13_spill] sm:$0xff] }
 0x4ea   : > { %2311 = vmatprep.subr.mxu0 %v2222_v32  ;;  %2668 = vmatpush1.msra.mxu1 %v2589_v50 }
 0x4eb   : > { %2130 = vmatprep.mubr.f32.mxu1 %v7986_v2  ;;  %2312 = vmatpush1.msra.mxu0 %v2221_v24  ;;  %v2516_v60 = vpop.permute.xlu1 %2515 }
 0x4ec   : > { %2669 = vmatprep.subr.mxu1 %v2588_v45  ;;  %4342 = vmatmul.mubr.msk.f32.gmra.mxu1 %vm829_vm9, %v4338_v7  ;;  %v2584_v54 = vsel %vm446_vm1, %v2514_v41, %v2516_v60 }
 0x4ed   : > { %4343 = vmatmul.mubr.msk.f32.vlgmr.msra.gmra.mxu0 %vm829_vm9, %v4331_v8  ;;  %2670 = vmatpush1.msra.mxu1 %v2587_v48  ;;  %v2512_v58 = vpop.permute.xlu0 %2511  ;;  %v8055_v8 = vld [vmem:[#allocation9_spill] sm:$0xff]  ;;  %v8056_v48 = vld [vmem:[#allocation14_spill] sm:$0xff] }
 0x4ee   : > { %2671 = vmatprep.subr.mxu1 %v2586_v43  ;;  %v2583_v55 = vsel %vm446_vm1, %v2512_v58, %v2514_v41  ;;  %2351 = vmatprep.mubr.f32.mxu0 %v7986_v2  ;;  %v8054_v41 = vld [vmem:[#allocation10_spill] sm:$0xff] }
 0x4ef   : > { %2672 = vmatpush1.msra.mxu1 %v2585_v1  ;;  %2707 = vmatprep.mubr.f32.mxu1 %v7986_v2 }
 0x4f0   : > { %2673 = vmatprep.subr.mxu1 %v2584_v54  ;;  %v8057_v54 = vld [vmem:[#allocation15_spill] sm:$0xff] }
 0x4f1   : > { %4344 = vmatmul.mubr.msk.f32.gmra.mxu0 %vm829_vm9, %v4332_v40  ;;  %2674 = vmatpush1.msra.mxu1 %v2583_v55  ;;  %v8058_v55 = vld [vmem:[#allocation5_spill] sm:$0xff] }
 0x4f2   : > { %4351 = vmatmul.mubr.msk.f32.vlgmr.msra.gmra.mxu1 %vm829_vm9, %v4347_v28  ;;  %2357 = vmatprep.mubr.f32.mxu0 %v7986_v2  ;;  %v8059_v28 = vld [vmem:[#allocation19_spill] sm:$0xff] }
 0x4f3   : > { %2713 = vmatprep.mubr.f32.mxu1 %v7986_v2 }
 0x4f5   : > { %4345 = vmatmul.mubr.msk.f32.gmra.mxu0 %vm829_vm9, %v4333_v38 }
 0x4f6   : > { %4352 = vmatmul.mubr.msk.f32.gmra.mxu1 %vm829_vm9, %v4348_v17  ;;  %2363 = vmatprep.mubr.f32.mxu0 %v7986_v2  ;;  %v8060_v17 = vld [vmem:[#allocation12_spill] sm:$0xff] }
 0x4f7   : > { %2719 = vmatprep.mubr.f32.mxu1 %v7986_v2 }
 0x4f8   : > { %v6712_v25 = vpop.permute.xlu1 %2762 }
 0x4f9   : > { %4346 = vmatmul.mubr.msk.f32.gmra.mxu0 %vm829_vm9, %v4334_v0 }
 0x4fa   : > { %4353 = vmatmul.mubr.msk.f32.gmra.mxu1 %vm829_vm9, %v4349_v29  ;;  %3260 = vmatprep.mubr.f32.mxu0 %v7986_v2  ;;  %v6698_v46 = vpop.permute.xlu0 %2757  ;;  %v8061_v29 = vld [vmem:[#allocation4_spill] sm:$0xff] }
 0x4fb   : > { %2725 = vmatprep.mubr.f32.mxu1 %v7986_v2 }
 0x4fc   : > { %v6720_v12 = vpop.permute.xlu1 %2803 }
 0x4fe   : > { %4354 = vmatmul.mubr.msk.f32.gmra.mxu1 %vm829_vm9, %v4350_v14  ;;  %v6706_v35 = vpop.permute.xlu0 %2752 }
 0x4ff   : > { %3493 = vmatprep.mubr.f32.mxu1 %v7986_v2 }
 0x500   : > { %v6731_v6 = vpop.permute.xlu1 %2798 }
 0x502   : > { %v2748_v4 = vpop.permute.xlu0 %2747 }
 0x504   : > { %v2794_v24 = vpop.permute.xlu1 %2793 }
 0x506   : > { %v2789_v31 = vpop.permute.xlu0 %2788 }
 0x597   : > { %v2114_v61 = vpop.f32.mrf.mxu1 }
 0x599   : > { %v2116_v21 = vpop.f32.mrf.mxu1 }
 0x5a2   : > { %v2120_v23 = vpop.f32.mrf.mxu1 }
 0x5a4   : > { %v6700_v53 = vpop.f32.mrf.mxu1 }
 0x5a7   : > { %v6702_v30 = vpop.f32.mrf.mxu1 }
 0x5a9   : > { %v6704_v44 = vpop.f32.mrf.mxu1 }
 0x5ac   : > { %v6708_v33 = vpop.f32.mrf.mxu1 }
 0x5ad   : > { %v2347_v62 = vpop.f32.mrf.mxu0 }
 0x5ae   : > { %v6710_v22 = vpop.f32.mrf.mxu1  ;;  %v2348_v11 = vadd.f32 %v2347_v62, %v2114_v61  ;;  %v8062_v61 = vld [vmem:[#allocation17_spill] sm:$0xff]  ;;  %v8063_v62 = vld [vmem:[#allocation11_spill] sm:$0xff] }
 0x5af   : > { %v2349_v19 = vpop.f32.mrf.mxu0 }
 0x5b0   : > { %v2350_v56 = vadd.f32 %v2349_v19, %v2116_v21 }
 0x5b1   : > { %v2353_v49 = vpop.f32.mrf.mxu0 }
 0x5b2   : > { %v2709_v5 = vpop.f32.mrf.mxu1  ;;  %v2354_v34 = vadd.f32 %v2353_v49, %v2120_v23 }
 0x5b3   : > { %v2732_v47 = vadd.f32 %v2709_v5, %v2348_v11  ;;  %v2355_v23 = vpop.f32.mrf.mxu0 }
 0x5b4   : > { %v2711_v9 = vpop.f32.mrf.mxu1  ;;  %v2356_v5 = vadd.f32 %v2355_v23, %v6700_v53 }
 0x5b5   : > { %v2765_v37 = vadd.f32 %v2748_v4, %v2732_v47  ;;  %v2733_v51 = vadd.f32 %v2711_v9, %v2350_v56  ;;  %v8064_v47 = vld [vmem:[#allocation8_spill] sm:$0xff] }
 0x5b6   : > { %v2715_v27 = vpop.f32.mrf.mxu1 }
 0x5b7   : > { %vm2773_vm7 = vcmp.ge.f32.partialorder %v2765_v37, 0.0  ;;  %v2806_v16 = vmul.f32 %v2789_v31, %v2765_v37  ;;  %v2766_v57 = vadd.f32 %v2748_v4, %v2733_v51  ;;  %v2734_v42 = vadd.f32 %v2715_v27, %v2354_v34 }
 0x5b8   : > { %v2717_v11 = vpop.f32.mrf.mxu1 }
 0x5b9   : > { %v6714_v39 = vsel %vm2773_vm7, %v2765_v37, %v2806_v16  ;;  %v2807_v36 = vmul.f32 %v2789_v31, %v2766_v57  ;;  %vm2774_vm8 = vcmp.ge.f32.partialorder %v2766_v57, 0.0  ;;  %v2767_v32 = vadd.f32 %v6706_v35, %v2734_v42  ;;  %v8065_v31 = vld [vmem:[#allocation16_spill] sm:$0xff] }
 0x5ba   : > { %2983 = vrot.lane.b32.xlu1 %v6714_v39, %s4496_s16  ;;  %v2963_v26 = vmul.f32 %v6714_v39, %v8049_v10  ;;  %v3544_v15 = vmul.f32 %v6714_v39, %v8050_v63  ;;  %v2965_v13 = vmul.f32 %v6714_v39, %v8051_v20  ;;  %v3542_v18 = vmul.f32 %v6714_v39, %v8052_v3 }
 0x5bb   : > { %v6734_v59 = vsel %vm2774_vm8, %v2766_v57, %v2807_v36  ;;  %v3532_v50 = vmul.f32 %v6714_v39, %v8053_v52  ;;  %v2847_v7 = vmul.f32 %v6714_v39, %v8054_v41  ;;  %v2808_v60 = vmul.f32 %v2794_v24, %v2767_v32 }
 0x5bc   : > { %3015 = vrot.lane.b32.xlu0 %v2963_v26, %s4497_s21  ;;  %v2964_v45 = vmul.f32 %v6734_v59, %v8055_v8  ;;  %vm2775_vm10 = vcmp.ge.f32.partialorder %v2767_v32, 0.0  ;;  %v2835_v43 = vmul.f32 %v6714_v39, %v8056_v48  ;;  %v3530_v1 = vmul.f32 %v6714_v39, %v8057_v54  ;;  %v8066_v26 = vld [vmem:[#allocation18_spill] sm:$0xff] }
 0x5bd   : > { %v6751_v58 = vsel %vm2775_vm10, %v2767_v32, %v2808_v60  ;;  %v2848_v40 = vmul.f32 %v6734_v59, %v8058_v55  ;;  %v2952_v38 = vmul.f32 %v6714_v39, %v8059_v28  ;;  %v2836_v0 = vmul.f32 %v6734_v59, %v8060_v17 }
 0x5be   : > { %3614 = vrot.lane.b32.xlu1 %v3544_v15, %s4497_s21  ;;  %v2846_v14 = vmul.f32 %v6734_v59, %v8061_v29  ;;  %v2953_v21 = vmul.f32 %v6734_v59, %v8062_v61  ;;  %v3543_v4 = vmul.f32 %v6734_v59, %v8063_v62  ;;  %v2966_v19 = vmul.f32 %v6751_v58, %v8049_v10  ;;  %v2359_v15 = vpop.f32.mrf.mxu0 }
 0x5bf   : > { %v2834_v9 = vmul.f32 %v6734_v59, %v8064_v47  ;;  %v2735_v56 = vadd.f32 %v2717_v11, %v2356_v5  ;;  %v2968_v37 = vmul.f32 %v6751_v58, %v8051_v20  ;;  %v3531_v16 = vmul.f32 %v6734_v59, %v8065_v31 }
 0x5c0   : > { %3019 = vrot.lane.b32.xlu0 %v2965_v13, %s4497_s21  ;;  %v3547_v53 = vmul.f32 %v6751_v58, %v8050_v63  ;;  %v2951_v57 = vmul.f32 %v6734_v59, %v8066_v26  ;;  %v3545_v27 = vmul.f32 %v6751_v58, %v8052_v3  ;;  %v2721_v13 = vpop.f32.mrf.mxu1  ;;  %v3535_v36 = vmul.f32 %v6751_v58, %v8053_v52 }
 0x5c1   : > { %v2768_v51 = vadd.f32 %v6706_v35, %v2735_v56  ;;  %v2360_v35 = vadd.f32 %v2359_v15, %v6702_v30  ;;  %v2850_v42 = vmul.f32 %v6751_v58, %v8054_v41  ;;  %v2838_v32 = vmul.f32 %v6751_v58, %v8056_v48 }
 0x5c2   : > { %3610 = vrot.lane.b32.xlu1 %v3542_v18, %s4497_s21  ;;  %v2723_v23 = vpop.f32.mrf.mxu1  ;;  %vm4502_vm7 = vmmov 0   ;;  %vm3988_vm8 = vcmask 261120   ;;  %vm4074_vm10 = vcmask 64512  }
 0x5c3   : > { %v2809_v49 = vmul.f32 %v2794_v24, %v2768_v51  ;;  %vm2776_vm11 = vcmp.ge.f32.partialorder %v2768_v51, 0.0  ;;  %v2736_v18 = vadd.f32 %v2721_v13, %v2360_v35 }
 0x5c4   : > { %2985 = vrot.lane.b32.xlu0 %v6734_v59, %s4496_s16 }
 0x5c5   : > { %v6800_v34 = vsel %vm2776_vm11, %v2768_v51, %v2809_v49  ;;  %v2769_v30 = vadd.f32 %v6698_v46, %v2736_v18 }
 0x5c6   : > { %3570 = vrot.lane.b32.xlu1 %v3532_v50, %s4496_s16  ;;  %v3533_v50 = vmul.f32 %v6751_v58, %v8057_v54 }
 0x5c7   : > { %v2810_v24 = vmul.f32 %v6731_v6, %v2769_v30  ;;  %vm2777_vm12 = vcmp.ge.f32.partialorder %v2769_v30, 0.0 }
 0x5c8   : > { %2916 = vrot.lane.b32.xlu0 %v2847_v7, %s4497_s21  ;;  %v2955_v7 = vmul.f32 %v6751_v58, %v8059_v28 }
 0x5c9   : > { %v6824_v60 = vsel %vm2777_vm12, %v2769_v30, %v2810_v24 }
 0x5ca   : > { %3017 = vrot.lane.b32.xlu1 %v2964_v45, %s4497_s21  ;;  %v2967_v45 = vmul.f32 %v6800_v34, %v8055_v8  ;;  %v2969_v51 = vmul.f32 %v6824_v60, %v8049_v10  ;;  %v2958_v30 = vmul.f32 %v6824_v60, %v8059_v28 }
 0x5cc   : > { %2872 = vrot.lane.b32.xlu0 %v2835_v43, %s4496_s16  ;;  %v2849_v43 = vmul.f32 %v6800_v34, %v8061_v29 }
 0x5ce   : > { %2987 = vrot.lane.b32.xlu1 %v6751_v58, %s4496_s16 }
 0x5d0   : > { %3566 = vrot.lane.b32.xlu0 %v3530_v1, %s4496_s16  ;;  %v2851_v1 = vmul.f32 %v6800_v34, %v8058_v55 }
 0x5d2   : > { %2918 = vrot.lane.b32.xlu1 %v2848_v40, %s4497_s21  ;;  %v3546_v40 = vmul.f32 %v6800_v34, %v8063_v62 }
 0x5d4   : > { %3066 = vrot.lane.b32.xlu0 %v2952_v38, %s4491_s19  ;;  %v2839_v38 = vmul.f32 %v6800_v34, %v8060_v17 }
 0x5d6   : > { %2874 = vrot.lane.b32.xlu1 %v2836_v0, %s4496_s16  ;;  %v2837_v0 = vmul.f32 %v6800_v34, %v8064_v47 }
 0x5d8   : > { %2914 = vrot.lane.b32.xlu0 %v2846_v14, %s4497_s21  ;;  %v2361_v14 = vpop.f32.mrf.mxu0 }
 0x5d9   : > { %v2362_v11 = vadd.f32 %v2361_v14, %v6704_v44  ;;  %v2727_v44 = vpop.f32.mrf.mxu1 }
 0x5da   : > { %3068 = vrot.lane.b32.xlu1 %v2953_v21, %s4491_s19  ;;  %v2954_v21 = vmul.f32 %v6800_v34, %v8066_v26  ;;  %v2365_v56 = vpop.f32.mrf.mxu0 }
 0x5db   : > { %v2737_v5 = vadd.f32 %v2723_v23, %v2362_v11  ;;  %v2729_v23 = vpop.f32.mrf.mxu1 }
 0x5dc   : > { %3612 = vrot.lane.b32.xlu0 %v3543_v4, %s4497_s21  ;;  %v3534_v4 = vmul.f32 %v6800_v34, %v8065_v31 }
 0x5de   : > { %3021 = vrot.lane.b32.xlu1 %v2966_v19, %s4497_s21  ;;  %v3550_v19 = vmul.f32 %v6824_v60, %v8050_v63 }
 0x5e0   : > { %2870 = vrot.lane.b32.xlu0 %v2834_v9, %s4496_s16  ;;  %v2956_v9 = vmul.f32 %v6800_v34, %v8062_v61 }
 0x5e2   : > { %3025 = vrot.lane.b32.xlu1 %v2968_v37, %s4497_s21  ;;  %v3548_v37 = vmul.f32 %v6824_v60, %v8052_v3 }
 0x5e4   : > { %3568 = vrot.lane.b32.xlu0 %v3531_v16, %s4496_s16  ;;  %v2770_v16 = vadd.f32 %v6698_v46, %v2737_v5  ;;  %v2971_v46 = vmul.f32 %v6824_v60, %v8051_v20 }
 0x5e6   : > { %3620 = vrot.lane.b32.xlu1 %v3547_v53, %s4497_s21  ;;  %v2366_v53 = vadd.f32 %v2365_v56, %v6708_v33  ;;  %v2811_v49 = vmul.f32 %v6731_v6, %v2770_v16  ;;  %vm2778_vm13 = vcmp.ge.f32.partialorder %v2770_v16, 0.0 }
 0x5e8   : > { %3064 = vrot.lane.b32.xlu0 %v2951_v57, %s4491_s19  ;;  %v3538_v57 = vmul.f32 %v6824_v60, %v8053_v52  ;;  %v2738_v15 = vadd.f32 %v2727_v44, %v2366_v53  ;;  %v6873_v33 = vsel %vm2778_vm13, %v2770_v16, %v2811_v49 }
 0x5e9   : > { %v2970_v6 = vmul.f32 %v6873_v33, %v8055_v8 }
 0x5ea   : > { %3616 = vrot.lane.b32.xlu1 %v3545_v27, %s4497_s21  ;;  %v3536_v27 = vmul.f32 %v6824_v60, %v8057_v54  ;;  %v2771_v13 = vadd.f32 %v6712_v25, %v2738_v15 }
 0x5ec   : > { %2989 = vrot.lane.b32.xlu0 %v6800_v34, %s4496_s16  ;;  %v2812_v35 = vmul.f32 %v6720_v12, %v2771_v13  ;;  %vm2779_vm14 = vcmp.ge.f32.partialorder %v2771_v13, 0.0 }
 0x5ee   : > { %3576 = vrot.lane.b32.xlu1 %v3535_v36, %s4496_s16  ;;  %v2853_v36 = vmul.f32 %v6824_v60, %v8054_v41  ;;  %v6886_v18 = vsel %vm2779_vm14, %v2771_v13, %v2812_v35 }
 0x5ef   : > { %v2972_v11 = vmul.f32 %v6886_v18, %v8049_v10  ;;  %v2974_v16 = vmul.f32 %v6886_v18, %v8051_v20  ;;  %v2856_v53 = vmul.f32 %v6886_v18, %v8054_v41  ;;  %v2957_v20 = vmul.f32 %v6873_v33, %v8066_v26 }
 0x5f0   : > { %2922 = vrot.lane.b32.xlu0 %v2850_v42, %s4497_s21  ;;  %v2841_v42 = vmul.f32 %v6824_v60, %v8056_v48  ;;  %v3553_v15 = vmul.f32 %v6886_v18, %v8050_v63  ;;  %v3541_v35 = vmul.f32 %v6886_v18, %v8053_v52 }
 0x5f2   : > { %3572 = vrot.lane.b32.xlu1 %v3533_v50, %s4496_s16  ;;  %v2854_v50 = vmul.f32 %v6873_v33, %v8058_v55 }
 0x5f4   : > { %2878 = vrot.lane.b32.xlu0 %v2838_v32, %s4496_s16  ;;  %v2842_v32 = vmul.f32 %v6873_v33, %v8060_v17 }
 0x5f6   : > { %3072 = vrot.lane.b32.xlu1 %v2955_v7, %s4491_s19  ;;  %v8067_v7 = vld [vmem:[#allocation24_spill] sm:$0xff] }
 0x5f7   : > { %v2829_v24 = vmul.f32 %v6824_v60, %v8067_v7 }
 0x5f8   : > { %3023 = vrot.lane.b32.xlu0 %v2967_v45, %s4497_s21  ;;  %v2959_v45 = vmul.f32 %v6873_v33, %v8062_v61 }
 0x5fa   : > { %2991 = vrot.lane.b32.xlu1 %v6824_v60, %s4496_s16 }
 0x5fc   : > { %2920 = vrot.lane.b32.xlu0 %v2849_v43, %s4497_s21  ;;  %v2852_v43 = vmul.f32 %v6873_v33, %v8061_v29 }
 0x5fe   : > { %2924 = vrot.lane.b32.xlu1 %v2851_v1, %s4497_s21 }
 0x600   : > { %3618 = vrot.lane.b32.xlu0 %v3546_v40, %s4497_s21  ;;  %v8068_v40 = vld [vmem:[#allocation21_spill] sm:$0xff] }
 0x602   : > { %2880 = vrot.lane.b32.xlu1 %v2839_v38, %s4496_s16  ;;  %v2830_v38 = vmul.f32 %v6873_v33, %v8068_v40 }
 0x604   : > { %2876 = vrot.lane.b32.xlu0 %v2837_v0, %s4496_s16  ;;  %v2367_v0 = vpop.f32.mrf.mxu0 }
 0x606   : > { %3070 = vrot.lane.b32.xlu1 %v2954_v21, %s4491_s19  ;;  %v3549_v21 = vmul.f32 %v6873_v33, %v8063_v62 }
 0x608   : > { %3574 = vrot.lane.b32.xlu0 %v3534_v4, %s4496_s16 }
 0x60a   : > { %3626 = vrot.lane.b32.xlu1 %v3550_v19, %s4497_s21  ;;  %v2368_v19 = vadd.f32 %v2367_v0, %v6710_v22  ;;  %v3537_v22 = vmul.f32 %v6873_v33, %v8065_v31 }
 0x60c   : > { %3074 = vrot.lane.b32.xlu0 %v2956_v9, %s4491_s19  ;;  %v2840_v9 = vmul.f32 %v6873_v33, %v8064_v47  ;;  %v2739_v56 = vadd.f32 %v2729_v23, %v2368_v19 }
 0x60e   : > { %3622 = vrot.lane.b32.xlu1 %v3548_v37, %s4497_s21  ;;  %v2772_v10 = vadd.f32 %v6712_v25, %v2739_v56  ;;  %v8069_v56 = vld [vmem:[#allocation20_spill] sm:$0xff] }
 0x610   : > { %3027 = vrot.lane.b32.xlu0 %v2969_v51, %s4497_s21  ;;  %v2813_v49 = vmul.f32 %v6720_v12, %v2772_v10  ;;  %vm2780_vm15 = vcmp.ge.f32.partialorder %v2772_v10, 0.0  ;;  %v3551_v12 = vmul.f32 %v6886_v18, %v8052_v3  ;;  %v2832_v3 = vmul.f32 %v6886_v18, %v8067_v7 }
 0x612   : > { %3582 = vrot.lane.b32.xlu1 %v3538_v57, %s4496_s16  ;;  %v2821_v41 = vsel %vm2780_vm15, %v2772_v10, %v2813_v49 }
 0x613   : > { %v2973_v52 = vmul.f32 %v2821_v41, %v8055_v8  ;;  %v2845_v0 = vmul.f32 %v2821_v41, %v8060_v17  ;;  %v2960_v23 = vmul.f32 %v2821_v41, %v8066_v26  ;;  %v2833_v19 = vmul.f32 %v2821_v41, %v8068_v40 }
 0x614   : > { %3031 = vrot.lane.b32.xlu0 %v2971_v46, %s4497_s21 }
 0x616   : > { %3578 = vrot.lane.b32.xlu1 %v3536_v27, %s4496_s16 }
 0x618   : > { %2993 = vrot.lane.b32.xlu0 %v6873_v33, %s4496_s16 }
 0x61a   : > { %3029 = vrot.lane.b32.xlu1 %v2970_v6, %s4497_s21  ;;  %v2844_v6 = vmul.f32 %v6886_v18, %v8056_v48  ;;  %v3539_v48 = vmul.f32 %v6886_v18, %v8057_v54 }
 0x61c   : > { %2928 = vrot.lane.b32.xlu0 %v2853_v36, %s4497_s21 }
 0x61e   : > { %2995 = vrot.lane.b32.xlu1 %v6886_v18, %s4496_s16 }
 0x620   : > { %2884 = vrot.lane.b32.xlu0 %v2841_v42, %s4496_s16 }
 0x622   : > { %2930 = vrot.lane.b32.xlu1 %v2854_v50, %s4497_s21 }
 0x624   : > { %3078 = vrot.lane.b32.xlu0 %v2958_v30, %s4491_s19 }
 0x626   : > { %2886 = vrot.lane.b32.xlu1 %v2842_v32, %s4496_s16  ;;  %v2961_v32 = vmul.f32 %v6886_v18, %v8059_v28 }
 0x628   : > { %3311 = vrot.lane.b32.xlu0 %v2829_v24, %s4493_s25 }
 0x62a   : > { %3080 = vrot.lane.b32.xlu1 %v2959_v45, %s4491_s19  ;;  %v2857_v45 = vmul.f32 %v2821_v41, %v8058_v55  ;;  %v2843_v55 = vmul.f32 %v2821_v41, %v8064_v47  ;;  %v2962_v47 = vmul.f32 %v2821_v41, %v8062_v61  ;;  %v8070_v61 = vld [vmem:[#allocation25_spill] sm:$0xff] }
 0x62c   : > { %2926 = vrot.lane.b32.xlu0 %v2852_v43, %s4497_s21  ;;  %v6911_v1 = vpop.permute.xlu1 %2983  ;;  %v2855_v43 = vmul.f32 %v2821_v41, %v8061_v29 }
 0x62e   : > { %v6915_v14 = vpop.permute.xlu0 %3015  ;;  %3313 = vrot.lane.b32.xlu1 %v2830_v38, %s4493_s25  ;;  %v3552_v38 = vmul.f32 %v2821_v41, %v8063_v62  ;;  %v3540_v62 = vmul.f32 %v2821_v41, %v8065_v31 }
 0x630   : > { %3624 = vrot.lane.b32.xlu0 %v3549_v21, %s4497_s21  ;;  %v6921_v4 = vpop.permute.xlu1 %3614 }
 0x632   : > { %v6926_v5 = vpop.permute.xlu0 %3019  ;;  %3033 = vrot.lane.b32.xlu1 %v2972_v11, %s4497_s21 }
 0x634   : > { %2882 = vrot.lane.b32.xlu0 %v2840_v9, %s4496_s16  ;;  %v6932_v37 = vpop.permute.xlu1 %3610 }
 0x636   : > { %v6936_v44 = vpop.permute.xlu0 %2985  ;;  %3037 = vrot.lane.b32.xlu1 %v2974_v16, %s4497_s21  ;;  %v2831_v16 = vmul.f32 %v2821_v41, %v8069_v56 }
 0x638   : > { %3580 = vrot.lane.b32.xlu0 %v3537_v22, %s4496_s16  ;;  %v6943_v51 = vpop.permute.xlu1 %3570 }
 0x63a   : > { %v6947_v57 = vpop.permute.xlu0 %2916  ;;  %2934 = vrot.lane.b32.xlu1 %v2856_v53, %s4497_s21  ;;  %v3528_v53 = vmul.f32 %v2821_v41, %v8070_v61 }
 0x63c   : > { %3076 = vrot.lane.b32.xlu0 %v2957_v20, %s4491_s19  ;;  %v6954_v25 = vpop.permute.xlu1 %3017 }
 0x63e   : > { %v6958_v46 = vpop.permute.xlu0 %2872  ;;  %3632 = vrot.lane.b32.xlu1 %v3553_v15, %s4497_s21 }
 0x640   : > { %2997 = vrot.lane.b32.xlu0 %v2821_v41, %s4496_s16  ;;  %v6962_v27 = vpop.permute.xlu1 %2987 }
 0x642   : > { %v6966_v13 = vpop.permute.xlu0 %3566  ;;  %3628 = vrot.lane.b32.xlu1 %v3551_v12, %s4497_s21 }
 0x644   : > { %2890 = vrot.lane.b32.xlu0 %v2844_v6, %s4496_s16  ;;  %v6972_v63 = vpop.permute.xlu1 %2918 }
 0x646   : > { %v6976_v36 = vpop.permute.xlu0 %3066  ;;  %3588 = vrot.lane.b32.xlu1 %v3541_v35, %s4496_s16  ;;  %v2999_v35 = vsel %vm499_vm5, %v6911_v1, %v6936_v44 }
 0x648   : > { %3317 = vrot.lane.b32.xlu0 %v2832_v3, %s4493_s25  ;;  %v6982_v42 = vpop.permute.xlu1 %2874 }
 0x64a   : > { %v6986_v50 = vpop.permute.xlu0 %2914  ;;  %3584 = vrot.lane.b32.xlu1 %v3539_v48, %s4496_s16 }
 0x64c   : > { %3035 = vrot.lane.b32.xlu0 %v2973_v52, %s4497_s21  ;;  %v6991_v30 = vpop.permute.xlu1 %3068  ;;  %v3039_v52 = vsel %vm544_vm6, %v6915_v14, %v6954_v25 }
 0x64e   : > { %v6995_v24 = vpop.permute.xlu0 %3612  ;;  %3084 = vrot.lane.b32.xlu1 %v2961_v32, %s4491_s19 }
 0x650   : > { %2936 = vrot.lane.b32.xlu0 %v2857_v45, %s4497_s21  ;;  %v7000_v54 = vpop.permute.xlu1 %3021  ;;  %v2939_v45 = vsel %vm544_vm6, %v6947_v57, %v6972_v63 }
 0x652   : > { %v7003_v8 = vpop.permute.xlu0 %2870  ;;  %2932 = vrot.lane.b32.xlu1 %v2855_v43, %s4497_s21 }
 0x654   : > { %3630 = vrot.lane.b32.xlu0 %v3552_v38, %s4497_s21  ;;  %v7008_v28 = vpop.permute.xlu1 %3025 }
 0x656   : > { %v7011_v21 = vpop.permute.xlu0 %3568  ;;  %2892 = vrot.lane.b32.xlu1 %v2845_v0, %s4496_s16 }
 0x658   : > { %2888 = vrot.lane.b32.xlu0 %v2843_v55, %s4496_s16  ;;  %v7016_v29 = vpop.permute.xlu1 %3620 }
 0x65a   : > { %v7019_v11 = vpop.permute.xlu0 %3064  ;;  %3082 = vrot.lane.b32.xlu1 %v2960_v23, %s4491_s19 }
 0x65c   : > { %3586 = vrot.lane.b32.xlu0 %v3540_v62, %s4496_s16  ;;  %v7024_v17 = vpop.permute.xlu1 %3616 }
 0x65e   : > { %v7027_v9 = vpop.permute.xlu0 %2989  ;;  %3319 = vrot.lane.b32.xlu1 %v2833_v19, %s4493_s25 }
 0x660   : > { %3086 = vrot.lane.b32.xlu0 %v2962_v47, %s4491_s19  ;;  %v7032_v26 = vpop.permute.xlu1 %3576 }
 0x662   : > { %3092 = vrot.lane.b32.xlu1 %v6936_v44, %s4491_s19  ;;  %v7036_v31 = vpop.permute.xlu0 %2922 }
 0x664   : > { %3315 = vrot.lane.b32.xlu0 %v2831_v16, %s4493_s25  ;;  %v7040_v22 = vpop.permute.xlu1 %3572 }
 0x666   : > { %v7042_v10 = vpop.permute.xlu0 %2878  ;;  %3711 = vrot.lane.b32.xlu1 %v6921_v4, %s4492_s20 }
 0x668   : > { %3679 = vrot.lane.b32.xlu0 %v3528_v53, %s4492_s20  ;;  %v7048_v20 = vpop.permute.xlu1 %3072 }
 0x66a   : > { %v7050_v49 = vpop.permute.xlu0 %3023  ;;  %3687 = vrot.lane.b32.xlu1 %v6943_v51, %s4492_s20 }
 0x66b   : > { %v3041_v53 = vsel %vm544_vm6, %v7000_v54, %v7050_v49 }
 0x66c   : > { %3088 = vrot.lane.b32.xlu0 %v6911_v1, %s4491_s19  ;;  %v7056_v15 = vpop.permute.xlu1 %2991  ;;  %v3040_v1 = vsel %vm544_vm6, %v6954_v25, %v6926_v5  ;;  %v2938_v5 = vsel %vm544_vm6, %v6986_v50, %v6947_v57 }
 0x66e   : > { %v7058_v12 = vpop.permute.xlu0 %2920  ;;  %3094 = vrot.lane.b32.xlu1 %v6962_v27, %s4491_s19 }
 0x670   : > { %3112 = vrot.lane.b32.xlu0 %v6915_v14, %s4491_s19  ;;  %v2925_v41 = vpop.permute.xlu1 %2924  ;;  %v3634_v14 = vsel %vm544_vm6, %v6932_v37, %v6995_v24  ;;  %v3635_v37 = vsel %vm544_vm6, %v6995_v24, %v6921_v4  ;;  %v2894_v4 = vsel %vm499_vm5, %v7003_v8, %v6958_v46 }
 0x672   : > { %v7064_v6 = vpop.permute.xlu0 %3618  ;;  %3349 = vrot.lane.b32.xlu1 %v6972_v63, %s4493_s25  ;;  %v3590_v63 = vsel %vm499_vm5, %v6966_v13, %v7011_v21  ;;  %v2895_v13 = vsel %vm499_vm5, %v6958_v46, %v6982_v42  ;;  %v3000_v46 = vsel %vm499_vm5, %v6962_v27, %v7027_v9  ;;  %v3042_v27 = vsel %vm544_vm6, %v7050_v49, %v7008_v28 }
 0x673   : > { %v3636_v28 = vsel %vm544_vm6, %v7024_v17, %v7064_v6  ;;  %v3637_v17 = vsel %vm544_vm6, %v7064_v6, %v7016_v29 }
 0x674   : > { %3090 = vrot.lane.b32.xlu0 %v2999_v35, %s4491_s19  ;;  %v7072_v3 = vpop.permute.xlu1 %2880 }
 0x676   : > { %v7074_v48 = vpop.permute.xlu0 %2876  ;;  %3325 = vrot.lane.b32.xlu1 %v6982_v42, %s4493_s25  ;;  %v3591_v42 = vsel %vm499_vm5, %v7011_v21, %v6943_v51 }
 0x678   : > { %3114 = vrot.lane.b32.xlu0 %v3039_v52, %s4491_s19  ;;  %v7082_v32 = vpop.permute.xlu1 %3070  ;;  %v2941_v52 = vsel %vm544_vm6, %v7036_v31, %v2925_v41 }
 0x67a   : > { %v7087_v44 = vpop.permute.xlu0 %3574  ;;  %3116 = vrot.lane.b32.xlu1 %v3040_v1, %s4491_s19 }
 0x67c   : > { %3347 = vrot.lane.b32.xlu0 %v2939_v45, %s4493_s25  ;;  %v7094_v43 = vpop.permute.xlu1 %3626 }
 0x67e   : > { %v7099_v38 = vpop.permute.xlu0 %3074  ;;  %3707 = vrot.lane.b32.xlu1 %v3634_v14, %s4492_s20 }
 0x680   : > { %3345 = vrot.lane.b32.xlu0 %v2938_v5, %s4493_s25  ;;  %v7106_v25 = vpop.permute.xlu1 %3622 }
 0x682   : > { %v7111_v0 = vpop.permute.xlu0 %3027  ;;  %3683 = vrot.lane.b32.xlu1 %v3590_v63, %s4492_s20 }
 0x684   : > { %3709 = vrot.lane.b32.xlu0 %v3635_v37, %s4492_s20  ;;  %v7118_v55 = vpop.permute.xlu1 %3582 }
 0x686   : > { %v7120_v57 = vpop.permute.xlu0 %3031  ;;  %3118 = vrot.lane.b32.xlu1 %v7000_v54, %s4491_s19  ;;  %v2940_v54 = vsel %vm544_vm6, %v7058_v12, %v7036_v31  ;;  %v2897_v12 = vsel %vm499_vm5, %v7042_v10, %v7072_v3 }
 0x688   : > { %3323 = vrot.lane.b32.xlu0 %v2895_v13, %s4493_s25  ;;  %v7128_v50 = vpop.permute.xlu1 %3578 }
 0x68a   : > { %v7130_v23 = vpop.permute.xlu0 %2993  ;;  %3717 = vrot.lane.b32.xlu1 %v7016_v29, %s4492_s20  ;;  %v2896_v29 = vsel %vm499_vm5, %v7074_v48, %v7042_v10 }
 0x68c   : > { %3321 = vrot.lane.b32.xlu0 %v2894_v4, %s4493_s25  ;;  %v7138_v24 = vpop.permute.xlu1 %3029 }
 0x68e   : > { %v7140_v62 = vpop.permute.xlu0 %2928  ;;  %3693 = vrot.lane.b32.xlu1 %v7032_v26, %s4492_s20 }
 0x690   : > { %3685 = vrot.lane.b32.xlu0 %v3591_v42, %s4492_s20  ;;  %v7148_v19 = vpop.permute.xlu1 %2995 }
 0x692   : > { %v7153_v8 = vpop.permute.xlu0 %2884  ;;  %3096 = vrot.lane.b32.xlu1 %v3000_v46, %s4491_s19  ;;  %v3043_v46 = vsel %vm544_vm6, %v7111_v0, %v7138_v24 }
 0x694   : > { %3098 = vrot.lane.b32.xlu0 %v7027_v9, %s4491_s19  ;;  %v2931_v47 = vpop.permute.xlu1 %2930 }
 0x696   : > { %v7158_v16 = vpop.permute.xlu0 %3078  ;;  %3355 = vrot.lane.b32.xlu1 %v2925_v41, %s4493_s25  ;;  %v3592_v41 = vsel %vm499_vm5, %v7040_v22, %v7087_v44 }
 0x698   : > { %3100 = vrot.lane.b32.xlu0 %v7056_v15, %s4491_s19  ;;  %v7163_v51 = vpop.permute.xlu1 %2886 }
 0x69a   : > { %v7165_v21 = vpop.permute.xlu0 %3311  ;;  %3331 = vrot.lane.b32.xlu1 %v7072_v3, %s4493_s25  ;;  %v3593_v3 = vsel %vm499_vm5, %v7087_v44, %v7032_v26  ;;  %v3001_v26 = vsel %vm499_vm5, %v7056_v15, %v7130_v23  ;;  %v3044_v15 = vsel %vm544_vm6, %v7138_v24, %v7120_v57 }
 0x69b   : > { %8071 = vst [vmem:[#allocation43_spill] sm:$0xff] %v7165_v21 }
 0x69c   : > { %3122 = vrot.lane.b32.xlu0 %v3042_v27, %s4491_s19  ;;  %v7173_v9 = vpop.permute.xlu1 %3080 }
 0x69e   : > { %v2927_v35 = vpop.permute.xlu0 %2926  ;;  %3120 = vrot.lane.b32.xlu1 %v3041_v53, %s4491_s19  ;;  %v2943_v53 = vsel %vm544_vm6, %v7140_v62, %v2931_v47 }
 0x69f   : > { %v2942_v57 = vsel %vm544_vm6, %v2927_v35, %v7140_v62 }
 0x6a0   : > { %3353 = vrot.lane.b32.xlu0 %v2941_v52, %s4493_s25  ;;  %v7182_v1 = vpop.permute.xlu1 %3313 }
 0x6a1   : > { %8072 = vst [vmem:[#allocation31_spill] sm:$0xff] %v7182_v1 }
 0x6a2   : > { %v3625_v45 = vpop.permute.xlu0 %3624  ;;  %3713 = vrot.lane.b32.xlu1 %v3636_v28, %s4492_s20 }
 0x6a4   : > { %3351 = vrot.lane.b32.xlu0 %v2940_v54, %s4493_s25  ;;  %v7192_v49 = vpop.permute.xlu1 %3033 }
 0x6a6   : > { %v2883_v14 = vpop.permute.xlu0 %2882  ;;  %3689 = vrot.lane.b32.xlu1 %v3592_v41, %s4492_s20 }
 0x6a8   : > { %3715 = vrot.lane.b32.xlu0 %v3637_v17, %s4492_s20  ;;  %v7202_v5 = vpop.permute.xlu1 %3037 }
 0x6aa   : > { %v3581_v31 = vpop.permute.xlu0 %3580  ;;  %3104 = vrot.lane.b32.xlu1 %v7130_v23, %s4491_s19 }
 0x6ac   : > { %3329 = vrot.lane.b32.xlu0 %v2897_v12, %s4493_s25  ;;  %v7210_v22 = vpop.permute.xlu1 %2934 }
 0x6ae   : > { %v7212_v63 = vpop.permute.xlu0 %3076  ;;  %3723 = vrot.lane.b32.xlu1 %v7094_v43, %s4492_s20 }
 0x6b0   : > { %3327 = vrot.lane.b32.xlu0 %v2896_v29, %s4493_s25  ;;  %v7220_v6 = vpop.permute.xlu1 %3632 }
 0x6b2   : > { %v2998_v37 = vpop.permute.xlu0 %2997  ;;  %3699 = vrot.lane.b32.xlu1 %v7118_v55, %s4492_s20 }
 0x6b4   : > { %3691 = vrot.lane.b32.xlu0 %v3593_v3, %s4492_s20  ;;  %v7228_v13 = vpop.permute.xlu1 %3628  ;;  %v3002_v3 = vsel %vm499_vm5, %v7148_v19, %v2998_v37 }
 0x6b6   : > { %v7230_v4 = vpop.permute.xlu0 %2890  ;;  %3106 = vrot.lane.b32.xlu1 %v7148_v19, %s4491_s19 }
 0x6b8   : > { %3124 = vrot.lane.b32.xlu0 %v7111_v0, %s4491_s19  ;;  %v7236_v10 = vpop.permute.xlu1 %3588  ;;  %v3638_v0 = vsel %vm544_vm6, %v7106_v25, %v3625_v45  ;;  %v3639_v25 = vsel %vm544_vm6, %v3625_v45, %v7094_v43  ;;  %v2898_v43 = vsel %vm499_vm5, %v2883_v14, %v7153_v8 }
 0x6ba   : > { %v7238_v48 = vpop.permute.xlu0 %3317  ;;  %3361 = vrot.lane.b32.xlu1 %v2931_v47, %s4493_s25  ;;  %v3594_v47 = vsel %vm499_vm5, %v7128_v50, %v3581_v31  ;;  %v2899_v50 = vsel %vm499_vm5, %v7153_v8, %v7163_v51 }
 0x6bb   : > { %8073 = vst [vmem:[#allocation37_spill] sm:$0xff] %v7238_v48 }
 0x6bc   : > { %3102 = vrot.lane.b32.xlu0 %v3001_v26, %s4491_s19  ;;  %v7245_v44 = vpop.permute.xlu1 %3584 }
 0x6be   : > { %v3036_v42 = vpop.permute.xlu0 %3035  ;;  %3337 = vrot.lane.b32.xlu1 %v7163_v51, %s4493_s25  ;;  %v3595_v51 = vsel %vm499_vm5, %v3581_v31, %v7118_v55  ;;  %v2828_v55 = vmul.f32 %v6873_v33, %v8069_v56 }
 0x6c0   : > { %3126 = vrot.lane.b32.xlu0 %v3043_v46, %s4491_s19  ;;  %v7253_v27 = vpop.permute.xlu1 %3084 }
 0x6c2   : > { %v7258_v23 = vpop.permute.xlu0 %2936  ;;  %3128 = vrot.lane.b32.xlu1 %v3044_v15, %s4491_s19  ;;  %v3045_v15 = vsel %vm544_vm6, %v7192_v49, %v3036_v42 }
 0x6c4   : > { %3359 = vrot.lane.b32.xlu0 %v2943_v53, %s4493_s25  ;;  %v7264_v52 = vpop.permute.xlu1 %2932 }
 0x6c6   : > { %v7268_v28 = vpop.permute.xlu0 %3630  ;;  %3719 = vrot.lane.b32.xlu1 %v3638_v0, %s4492_s20  ;;  %v3046_v0 = vsel %vm544_vm6, %v3036_v42, %v7202_v5 }
 0x6c8   : > { %3357 = vrot.lane.b32.xlu0 %v2942_v57, %s4493_s25  ;;  %v7274_v24 = vpop.permute.xlu1 %2892 }
 0x6ca   : > { %v7278_v54 = vpop.permute.xlu0 %2888  ;;  %3695 = vrot.lane.b32.xlu1 %v3594_v47, %s4492_s20  ;;  %v8078_v47 = vld [vmem:[#allocation23_spill] sm:$0xff] }
 0x6cc   : > { %3721 = vrot.lane.b32.xlu0 %v3639_v25, %s4492_s20  ;;  %v7284_v41 = vpop.permute.xlu1 %3082  ;;  %v3529_v25 = vmul.f32 %v6886_v18, %v8078_v47 }
 0x6ce   : > { %v7286_v17 = vpop.permute.xlu0 %3586  ;;  %3130 = vrot.lane.b32.xlu1 %v7192_v49, %s4491_s19  ;;  %v3525_v49 = vmul.f32 %v6873_v33, %v8070_v61 }
 0x6d0   : > { %3335 = vrot.lane.b32.xlu0 %v2899_v50, %s4493_s25  ;;  %v7294_v62 = vpop.permute.xlu1 %3319 }
 0x6d1   : > { %8074 = vst [vmem:[#allocation42_spill] sm:$0xff] %v7294_v62 }
 0x6d2   : > { %v7296_v35 = vpop.permute.xlu0 %3086  ;;  %3729 = vrot.lane.b32.xlu1 %v7220_v6, %s4492_s20 }
 0x6d4   : > { %3333 = vrot.lane.b32.xlu0 %v2898_v43, %s4493_s25  ;;  %v7303_v45 = vpop.permute.xlu1 %3092 }
 0x6d6   : > { %v7305_v12 = vpop.permute.xlu0 %3315  ;;  %3705 = vrot.lane.b32.xlu1 %v7236_v10, %s4492_s20 }
 0x6d7   : > { %8075 = vst [vmem:[#allocation45_spill] sm:$0xff] %v7305_v12 }
 0x6d8   : > { %3697 = vrot.lane.b32.xlu0 %v3595_v51, %s4492_s20  ;;  %v7312_v29 = vpop.permute.xlu1 %3711  ;;  %v8079_v51 = vld [vmem:[#allocation22_spill] sm:$0xff] }
 0x6da   : > { %v7316_v8 = vpop.permute.xlu0 %3679  ;;  %3108 = vrot.lane.b32.xlu1 %v3002_v3, %s4491_s19  ;;  %v3527_v3 = vmul.f32 %v6886_v18, %v8079_v51 }
 0x6db   : > { %8076 = vst [vmem:[#allocation35_spill] sm:$0xff] %v7316_v8 }
 0x6dc   : > { %3110 = vrot.lane.b32.xlu0 %v2998_v37, %s4491_s19  ;;  %v7320_v14 = vpop.permute.xlu1 %3687  ;;  %v2826_v37 = vmul.f32 %v6751_v58, %v8067_v7 }
 0x6dd   : > { %8077 = vst [vmem:[#allocation46_spill] sm:$0xff] %v7320_v14 }
 0x6de   : > { %v7322_v26 = vpop.permute.xlu0 %3088  ;;  %3367 = vrot.lane.b32.xlu1 %v7258_v23, %s4493_s25 }
 0x6e0   : > { %3309 = vrot.lane.b32.xlu0 %v2828_v55, %s4493_s25  ;;  %v7329_v31 = vpop.permute.xlu1 %3094  ;;  %v2825_v55 = vmul.f32 %v6800_v34, %v8069_v56 }
 0x6e2   : > { %v7331_v19 = vpop.permute.xlu0 %3112  ;;  %3343 = vrot.lane.b32.xlu1 %v7274_v24, %s4493_s25 }
 0x6e4   : > { %3305 = vrot.lane.b32.xlu0 %v2826_v37, %s4493_s25  ;;  %v7338_v46 = vpop.permute.xlu1 %3349  ;;  %v2827_v37 = vmul.f32 %v6800_v34, %v8068_v40 }
 0x6e6   : > { %v7342_v53 = vpop.permute.xlu0 %3090  ;;  %3132 = vrot.lane.b32.xlu1 %v3045_v15, %s4491_s19 }
 0x6e8   : > { %3134 = vrot.lane.b32.xlu0 %v3046_v0, %s4491_s19  ;;  %v3326_v57 = vpop.permute.xlu1 %3325  ;;  %v2945_v0 = vsel %vm544_vm6, %v7210_v22, %v7258_v23  ;;  %s7851_s19 = scalar_lea.vmem %s7888_s10, %s4402_s28 }
 0x6ea   : > { %v7350_v50 = vpop.permute.xlu0 %3114  ;;  %3681 = vrot.lane.b32.xlu1 %v3529_v25, %s4492_s20 }
 0x6ec   : > { %3673 = vrot.lane.b32.xlu0 %v3525_v49, %s4492_s20  ;;  %v3117_v43 = vpop.permute.xlu1 %3116  ;;  %v3526_v49 = vmul.f32 %v6824_v60, %v8078_v47 }
 0x6ed   : > { %v7360_v5 = vsel %vm603_vm0, %v7350_v50, %v3117_v43 }
 0x6ee   : > { %v7362_v42 = vpop.permute.xlu0 %3347  ;;  %3677 = vrot.lane.b32.xlu1 %v3527_v3, %s4492_s20 }
 0x6f0   : > { %3303 = vrot.lane.b32.xlu0 %v2825_v55, %s4493_s25  ;;  %v3708_v33 = vpop.permute.xlu1 %3707  ;;  %v3641_v55 = vsel %vm544_vm6, %v7268_v28, %v7220_v6  ;;  %v3640_v6 = vsel %vm544_vm6, %v7228_v13, %v7268_v28  ;;  %v2900_v13 = vsel %vm499_vm5, %v7278_v54, %v7230_v4 }
 0x6f2   : > { %v3346_v15 = vpop.permute.xlu0 %3345  ;;  %3307 = vrot.lane.b32.xlu1 %v2827_v37, %s4493_s25  ;;  %v2944_v37 = vsel %vm544_vm6, %v7264_v52, %v7210_v22 }
 0x6f3   : > { %v7373_v18 = vsel %vm1015_vm2, %v3346_v15, %v7362_v42 }
 0x6f4   : > { %3365 = vrot.lane.b32.xlu0 %v2945_v0, %s4493_s25  ;;  %v3684_v25 = vpop.permute.xlu1 %3683  ;;  %v2823_v0 = vmul.f32 %v6714_v39, %v8067_v7  ;;  %v2901_v7 = vsel %vm499_vm5, %v7230_v4, %v7274_v24 }
 0x6f6   : > { %v7381_v43 = vpop.permute.xlu0 %3709  ;;  %3675 = vrot.lane.b32.xlu1 %v3526_v49, %s4492_s20 }
 0x6f7   : > { %8080 = vst [vmem:[#allocation50_spill] sm:$0xff] %v7381_v43  ;;  %v7386_v3 = vsel %vm446_vm1, %v3708_v33, %v7381_v43 }
 0x6f8   : > { %8081 = vst [vmem:[#allocation34_spill] sm:$0xff] %v7386_v3  ;;  %3727 = vrot.lane.b32.xlu0 %v3641_v55, %s4492_s20  ;;  %v3119_v23 = vpop.permute.xlu1 %3118 }
 0x6fa   : > { %v3324_v15 = vpop.permute.xlu0 %3323  ;;  %3363 = vrot.lane.b32.xlu1 %v2944_v37, %s4493_s25 }
 0x6fb   : > { %v7399_v33 = vsel %vm1015_vm2, %v3324_v15, %v3326_v57  ;;  %v3524_v57 = vmul.f32 %v6824_v60, %v8079_v51  ;;  %v3596_v60 = vsel %vm499_vm5, %v7245_v44, %v7286_v17  ;;  %v3522_v44 = vmul.f32 %v6800_v34, %v8070_v61 }
 0x6fc   : > { %8082 = vst [vmem:[#allocation38_spill] sm:$0xff] %v7399_v33  ;;  %3299 = vrot.lane.b32.xlu0 %v2823_v0, %s4493_s25  ;;  %v3718_v49 = vpop.permute.xlu1 %3717  ;;  %v3597_v0 = vsel %vm499_vm5, %v7286_v17, %v7236_v10  ;;  %v3523_v17 = vmul.f32 %v6751_v58, %v8078_v47 }
 0x6fe   : > { %v3322_v55 = vpop.permute.xlu0 %3321  ;;  %3725 = vrot.lane.b32.xlu1 %v3640_v6, %s4492_s20 }
 0x6ff   : > { %v7407_v22 = vsel %vm1015_vm2, %v3322_v55, %v3324_v15 }
 0x700   : > { %8083 = vst [vmem:[#allocation39_spill] sm:$0xff] %v7407_v22  ;;  %3341 = vrot.lane.b32.xlu0 %v2901_v7, %s4493_s25  ;;  %v7413_v52 = vpop.permute.xlu1 %3693  ;;  %v2822_v7 = vmul.f32 %v6734_v59, %v8069_v56 }
 0x702   : > { %v7417_v37 = vpop.permute.xlu0 %3685  ;;  %3671 = vrot.lane.b32.xlu1 %v3524_v57, %s4492_s20  ;;  %v3521_v57 = vmul.f32 %v6751_v58, %v8079_v51  ;;  %v3520_v58 = vmul.f32 %v6714_v39, %v8078_v47  ;;  %v4389_v47 = vld [vmem:[%s7880_s2 + $0x50] sm:$0xff] }
 0x703   : > { %8084 = vst [vmem:[#allocation47_spill] sm:$0xff] %v7417_v37  ;;  %v7425_v28 = vsel %vm446_vm1, %v3684_v25, %v7417_v37  ;;  %v2824_v25 = vmul.f32 %v6734_v59, %v8068_v40 }
 0x704   : > { %8085 = vst [vmem:[#allocation51_spill] sm:$0xff] %v7425_v28  ;;  %3339 = vrot.lane.b32.xlu0 %v2900_v13, %s4493_s25  ;;  %v7428_v24 = vpop.permute.xlu1 %3096 }
 0x706   : > { %v3099_v15 = vpop.permute.xlu0 %3098  ;;  %3701 = vrot.lane.b32.xlu1 %v3596_v60, %s4492_s20 }
 0x707   : > { %v7439_v4 = vsel %vm603_vm0, %v7428_v24, %v3099_v15  ;;  %v3519_v15 = vmul.f32 %v6734_v59, %v8070_v61  ;;  %v4390_v59 = vld [vmem:[%s7880_s2 + $0x58] sm:$0xff] }
 0x708   : > { %3703 = vrot.lane.b32.xlu0 %v3597_v0, %s4492_s20  ;;  %v3356_v54 = vpop.permute.xlu1 %3355 }
 0x70a   : > { %v7444_v6 = vpop.permute.xlu0 %3100  ;;  %3301 = vrot.lane.b32.xlu1 %v2824_v25, %s4493_s25  ;;  %v3518_v25 = vmul.f32 %v6714_v39, %v8079_v51  ;;  %v4394_v39 = vld [vmem:[%s7881_s3 + $0x58] sm:$0xff] }
 0x70c   : > { %3667 = vrot.lane.b32.xlu0 %v3522_v44, %s4492_s20  ;;  %v3332_v10 = vpop.permute.xlu1 %3331 }
 0x70e   : > { %v3123_v55 = vpop.permute.xlu0 %3122  ;;  %3669 = vrot.lane.b32.xlu1 %v3523_v17, %s4492_s20 }
 0x710   : > { %3297 = vrot.lane.b32.xlu0 %v2822_v7, %s4493_s25  ;;  %v3121_v40 = vpop.permute.xlu1 %3120  ;;  %v4388_v7 = vld [vmem:[%s7880_s2 + $0x48] sm:$0xff] }
 0x711   : > { %v7459_v34 = vsel %vm603_vm0, %v3119_v23, %v3121_v40  ;;  %v7462_v13 = vsel %vm603_vm0, %v3121_v40, %v3123_v55 }
 0x712   : > { %v3354_v60 = vpop.permute.xlu0 %3353  ;;  %3665 = vrot.lane.b32.xlu1 %v3521_v57, %s4492_s20  ;;  %v4393_v57 = vld [vmem:[%s7881_s3 + $0x50] sm:$0xff] }
 0x713   : > { %v7468_v56 = vsel %vm1015_vm2, %v3354_v60, %v3356_v54 }
 0x714   : > { %3661 = vrot.lane.b32.xlu0 %v3519_v15, %s4492_s20  ;;  %v3714_v0 = vpop.permute.xlu1 %3713 }
 0x716   : > { %v3352_v23 = vpop.permute.xlu0 %3351  ;;  %3663 = vrot.lane.b32.xlu1 %v3520_v58, %s4492_s20 }
 0x717   : > { %v7477_v44 = vsel %vm1015_vm2, %v3352_v23, %v3354_v60  ;;  %v4392_v23 = vld [vmem:[%s7881_s3 + $0x48] sm:$0xff] }
 0x718   : > { %3659 = vrot.lane.b32.xlu0 %v3518_v25, %s4492_s20  ;;  %v3690_v61 = vpop.permute.xlu1 %3689 }
 0x71a   : > { %v3716_v54 = vpop.permute.xlu0 %3715  ;;  %3910 = vperm.xlu1 %4454, %v4390_v59  }
 0x71b   : > { %v7487_v17 = vsel %vm446_vm1, %v3714_v0, %v3716_v54  ;;  %v7493_v51 = vsel %vm446_vm1, %v3716_v54, %v3718_v49  ;;  %v4387_v49 = vld [vmem:[%s7880_s2 + $0x40] sm:$0xff] }
 0x71c   : > { %3905 = vperm.xlu0 %4453, %v4389_v47   ;;  %v7495_v55 = vpop.permute.xlu1 %3104 }
 0x71e   : > { %v3330_v40 = vpop.permute.xlu0 %3329  ;;  %3951 = vperm.xlu1 %4454, %v4394_v39  }
 0x71f   : > { %v7504_v60 = vsel %vm1015_vm2, %v3330_v40, %v3332_v10  ;;  %v4391_v10 = vld [vmem:[%s7881_s3 + $0x40] sm:$0xff] }
 0x720   : > { %8086 = vst [vmem:[#allocation29_spill] sm:$0xff] %v7504_v60  ;;  %3900 = vperm.xlu0 %4453, %v4388_v7   ;;  %v7506_v15 = vpop.permute.xlu1 %3723 }
 0x722   : > { %v3328_v0 = vpop.permute.xlu0 %3327  ;;  %3946 = vperm.xlu1 %4454, %v4393_v57  }
 0x723   : > { %v7512_v58 = vsel %vm1015_vm2, %v3328_v0, %v3330_v40 }
 0x724   : > { %8087 = vst [vmem:[#allocation28_spill] sm:$0xff] %v7512_v58  ;;  %3895 = vperm.xlu0 %4453, %v4387_v49   ;;  %v7517_v25 = vpop.permute.xlu1 %3699 }
 0x725   : > { %8088 = vst [vmem:[#allocation49_spill] sm:$0xff] %v7517_v25 }
 0x726   : > { %v3692_v59 = vpop.permute.xlu0 %3691  ;;  %3941 = vperm.xlu1 %4454, %v4392_v23  }
 0x727   : > { %v7523_v47 = vsel %vm446_vm1, %v3690_v61, %v3692_v59  ;;  %v7527_v54 = vsel %vm446_vm1, %v3692_v59, %v7413_v52 }
 0x728   : > { %8089 = vst [vmem:[#allocation30_spill] sm:$0xff] %v7523_v47  ;;  %8090 = vst [vmem:[#allocation40_spill] sm:$0xff] %v7527_v54  ;;  %3936 = vperm.xlu0 %4453, %v4391_v10   ;;  %v3107_v39 = vpop.permute.xlu1 %3106 }
 0x72a   : > { %v3125_v7 = vpop.permute.xlu0 %3124 }
 0x72c   : > { %v7529_v40 = vpop.permute.xlu1 %3361 }
 0x72e   : > { %v3103_v57 = vpop.permute.xlu0 %3102 }
 0x730   : > { %v7531_v49 = vpop.permute.xlu1 %3337 }
 0x732   : > { %v3127_v0 = vpop.permute.xlu0 %3126 }
 0x734   : > { %v3129_v8 = vpop.permute.xlu1 %3128 }
 0x736   : > { %v7533_v28 = vpop.permute.xlu0 %3359 }
 0x738   : > { %v7535_v23 = vpop.permute.xlu1 %3719 }
 0x73a   : > { %v7537_v61 = vpop.permute.xlu0 %3357 }
 0x73c   : > { %v7539_v37 = vpop.permute.xlu1 %3695 }
 0x73d   : > { %8091 = vst [vmem:[#allocation48_spill] sm:$0xff] %v7539_v37 }
 0x73e   : > { %v7541_v52 = vpop.permute.xlu0 %3721 }
 0x740   : > { %v3131_v10 = vpop.permute.xlu1 %3130 }
 0x742   : > { %v7543_v59 = vpop.permute.xlu0 %3335 }
 0x744   : > { %v7545_v14 = vpop.permute.xlu1 %3729 }
 0x746   : > { %v7547_v47 = vpop.permute.xlu0 %3333 }
 0x748   : > { %v7549_v21 = vpop.permute.xlu1 %3705 }
 0x749   : > { %8092 = vst [vmem:[#allocation27_spill] sm:$0xff] %v7549_v21  ;;  %v3156_v21 = vsel %vm603_vm0, %v3125_v7, %v3127_v0 }
 0x74a   : > { %v7551_v1 = vpop.permute.xlu0 %3697 }
 0x74b   : > { %8093 = vst [vmem:[#allocation26_spill] sm:$0xff] %v7551_v1  ;;  %v3157_v1 = vsel %vm603_vm0, %v3127_v0, %v3129_v8 }
 0x74c   : > { %v3109_v54 = vpop.permute.xlu1 %3108 }
 0x74e   : > { %v3111_v12 = vpop.permute.xlu0 %3110 }
 0x74f   : > { %v3151_v8 = vsel %vm603_vm0, %v3109_v54, %v3111_v12  ;;  %v3146_v12 = vsel %vm603_vm0, %v7329_v31, %v7428_v24  ;;  %v3143_v31 = vsel %vm603_vm0, %v7253_v27, %v7296_v35  ;;  %v3142_v24 = vsel %vm603_vm0, %v7284_v41, %v7253_v27 }
 0x750   : > { %v3368_v48 = vpop.permute.xlu1 %3367  ;;  %v3390_v27 = vsel %vm1015_vm2, %v7533_v28, %v7529_v40  ;;  %v3389_v41 = vsel %vm1015_vm2, %v7537_v61, %v7533_v28  ;;  %v3137_v35 = vsel %vm603_vm0, %v6976_v36, %v6991_v30  ;;  %v4367_v28 = vld [vmem:[%s7879_s1 + $0xe0] sm:$0xff]  ;;  %v8096_v40 = vld [vmem:[#allocation29_spill] sm:$0xff]  ;;  %v8101_v61 = vld [vmem:[#allocation39_spill] sm:$0xff] }
 0x752   : > { %v7553_v62 = vpop.permute.xlu0 %3309 }
 0x754   : > { %v7555_v25 = vpop.permute.xlu1 %3343 }
 0x756   : > { %v7557_v37 = vpop.permute.xlu0 %3305 }
 0x757   : > { %8094 = vst [vmem:[#allocation44_spill] sm:$0xff] %v7557_v37 }
 0x758   : > { %v3133_v22 = vpop.permute.xlu1 %3132 }
 0x759   : > { %v3158_v3 = vsel %vm603_vm0, %v3131_v10, %v3133_v22  ;;  %v8103_v10 = vld [vmem:[#allocation26_spill] sm:$0xff] }
 0x75a   : > { %v3135_v33 = vpop.permute.xlu0 %3134 }
 0x75b   : > { %v3159_v58 = vsel %vm603_vm0, %v3133_v22, %v3135_v33  ;;  %v3152_v33 = vsel %vm603_vm0, %v7331_v19, %v7350_v50 }
 0x75c   : > { %3204 = vmatprep.subr.mxu0 %v3159_v58  ;;  %v7561_v60 = vpop.permute.xlu1 %3681 }
 0x75d   : > { %3205 = vmatpush1.msra.mxu0 %v3158_v3  ;;  %v3149_v3 = vsel %vm603_vm0, %v3103_v57, %v7495_v55 }
 0x75e   : > { %v7565_v43 = vpop.permute.xlu0 %3673  ;;  %3206 = vmatprep.subr.mxu0 %v3157_v1  ;;  %v3150_v1 = vsel %vm603_vm0, %v3107_v39, %v3109_v54  ;;  %v8095_v54 = vld [vmem:[#allocation50_spill] sm:$0xff] }
 0x75f   : > { %3207 = vmatpush1.msra.mxu0 %v3156_v21  ;;  %v3748_v39 = vsel %vm446_vm1, %v8095_v54, %v7312_v29 }
 0x760   : > { %3208 = vmatprep.subr.mxu0 %v7462_v13  ;;  %v7568_v37 = vpop.permute.xlu1 %3677  ;;  %v3145_v13 = vsel %vm603_vm0, %v7342_v53, %v7303_v45  ;;  %v3141_v45 = vsel %vm603_vm0, %v7158_v16, %v7173_v9  ;;  %v3139_v9 = vsel %vm603_vm0, %v7048_v20, %v7099_v38  ;;  %v3136_v38 = vsel %vm603_vm0, %v7019_v11, %v6976_v36 }
 0x761   : > { %3209 = vmatpush1.msra.mxu0 %v7459_v34  ;;  %v3148_v34 = vsel %vm603_vm0, %v7444_v6, %v3103_v57  ;;  %v8097_v57 = vld [vmem:[#allocation27_spill] sm:$0xff] }
 0x762   : > { %v7574_v22 = vpop.permute.xlu0 %3303  ;;  %3210 = vmatprep.subr.mxu0 %v7360_v5 }
 0x763   : > { %3211 = vmatpush1.msra.mxu0 %v3152_v33  ;;  %v8104_v33 = vld [vmem:[#allocation48_spill] sm:$0xff] }
 0x764   : > { %3212 = vmatprep.subr.mxu0 %v3151_v8  ;;  %v7579_v21 = vpop.permute.xlu1 %3307  ;;  %v3743_v8 = vsel %vm446_vm1, %v8104_v33, %v8103_v10 }
 0x765   : > { %3213 = vmatpush1.msra.mxu0 %v3150_v1  ;;  %v8105_v1 = vld [vmem:[#allocation42_spill] sm:$0xff] }
 0x766   : > { %v3366_v19 = vpop.permute.xlu0 %3365  ;;  %3214 = vmatprep.subr.mxu0 %v3149_v3  ;;  %v8106_v3 = vld [vmem:[#allocation37_spill] sm:$0xff] }
 0x767   : > { %3215 = vmatpush1.msra.mxu0 %v3148_v34  ;;  %v3392_v50 = vsel %vm1015_vm2, %v3366_v19, %v3368_v48  ;;  %v3144_v48 = vsel %vm603_vm0, %v7322_v26, %v7342_v53  ;;  %v3140_v26 = vsel %vm603_vm0, %v7212_v63, %v7158_v16  ;;  %v3138_v16 = vsel %vm603_vm0, %v7082_v32, %v7048_v20 }
 0x768   : > { %3216 = vmatprep.subr.mxu0 %v7439_v4  ;;  %3437 = vmatprep.subr.mxu1 %v3392_v50  ;;  %v7590_v5 = vpop.permute.xlu1 %3675  ;;  %v3386_v20 = vsel %vm1015_vm2, %v7362_v42, %v7338_v46  ;;  %v3752_v42 = vsel %vm446_vm1, %v7541_v52, %v7506_v15  ;;  %v3381_v15 = vsel %vm1015_vm2, %v7547_v47, %v7543_v59  ;;  %v8098_v47 = vld [vmem:[#allocation34_spill] sm:$0xff] }
 0x769   : > { %3217 = vmatpush1.msra.mxu0 %v3146_v12  ;;  %v3376_v34 = vsel %vm1015_vm2, %v8106_v3, %v8105_v1 }
 0x76a   : > { %v3728_v6 = vpop.permute.xlu0 %3727  ;;  %3218 = vmatprep.subr.mxu0 %v3145_v13  ;;  %v8108_v13 = vld [vmem:[#allocation40_spill] sm:$0xff] }
 0x76b   : > { %3219 = vmatpush1.msra.mxu0 %v3144_v48  ;;  %v3754_v36 = vsel %vm446_vm1, %v3728_v6, %v7545_v14  ;;  %v8110_v48 = vld [vmem:[#allocation43_spill] sm:$0xff] }
 0x76c   : > { %3220 = vmatprep.subr.mxu0 %v3143_v31  ;;  %v3364_v4 = vpop.permute.xlu1 %3363 }
 0x76d   : > { %v3391_v55 = vsel %vm1015_vm2, %v3364_v4, %v3366_v19  ;;  %3221 = vmatpush1.msra.mxu0 %v3142_v24  ;;  %v8107_v19 = vld [vmem:[#allocation45_spill] sm:$0xff]  ;;  %v4369_v24 = vld [vmem:[%s7879_s1 + $0xf0] sm:$0xff]  ;;  %v3373_v4 = vsel %vm1015_vm2, %v7553_v62, %v8110_v48 }
 0x76e   : > { %v7611_v53 = vpop.permute.xlu0 %3299  ;;  %3222 = vmatprep.subr.mxu0 %v3141_v45  ;;  %3438 = vmatpush1.msra.mxu1 %v3391_v55  ;;  %v3375_v50 = vsel %vm1015_vm2, %v8107_v19, %v8106_v3  ;;  %v8111_v55 = vld [vmem:[#allocation30_spill] sm:$0xff] }
 0x76f   : > { %3223 = vmatpush1.msra.mxu0 %v3140_v26  ;;  %3439 = vmatprep.subr.mxu1 %v3390_v27  ;;  %v8112_v26 = vld [vmem:[#allocation46_spill] sm:$0xff]  ;;  %v8113_v27 = vld [vmem:[#allocation47_spill] sm:$0xff] }
 0x770   : > { %3224 = vmatprep.subr.mxu0 %v3139_v9  ;;  %3440 = vmatpush1.msra.mxu1 %v3389_v41  ;;  %v3726_v63 = vpop.permute.xlu1 %3725  ;;  %v3740_v41 = vsel %vm446_vm1, %v8113_v27, %v8112_v26  ;;  %v8114_v9 = vld [vmem:[#allocation44_spill] sm:$0xff] }
 0x771   : > { %3225 = vmatpush1.msra.mxu0 %v3138_v16  ;;  %3441 = vmatprep.subr.mxu1 %v7468_v56  ;;  %v3753_v32 = vsel %vm446_vm1, %v3726_v63, %v3728_v6  ;;  %v8109_v6 = vld [vmem:[#allocation31_spill] sm:$0xff]  ;;  %v3372_v16 = vsel %vm1015_vm2, %v8114_v9, %v7579_v21  ;;  %v3371_v62 = vsel %vm1015_vm2, %v7574_v22, %v8114_v9  ;;  %v4370_v22 = vld [vmem:[%s7879_s1 + $0xf8] sm:$0xff] }
 0x772   : > { %v3342_v58 = vpop.permute.xlu0 %3341  ;;  %3226 = vmatprep.subr.mxu0 %v3137_v35  ;;  %3442 = vmatpush1.msra.mxu1 %v7477_v44  ;;  %v3382_v44 = vsel %vm1015_vm2, %v7543_v59, %v7531_v49  ;;  %v3374_v31 = vsel %vm1015_vm2, %v8110_v48, %v8109_v6  ;;  %v8115_v35 = vld [vmem:[#allocation51_spill] sm:$0xff] }
 0x773   : > { %3227 = vmatpush1.msra.mxu0 %v3136_v38  ;;  %3443 = vmatprep.subr.mxu1 %v3386_v20  ;;  %v3384_v30 = vsel %vm1015_vm2, %v3342_v58, %v7555_v25 }
 0x774   : > { %4371 = vmatmul.mubr.msk.f32.vlgmr.msra.gmra.mxu0 %vm829_vm9, %v4367_v28  ;;  %3444 = vmatpush1.msra.mxu1 %v7373_v18  ;;  %v7645_v11 = vpop.permute.xlu1 %3671  ;;  %v3751_v18 = vsel %vm446_vm1, %v7535_v23, %v7541_v52  ;;  %v8100_v23 = vld [vmem:[#allocation38_spill] sm:$0xff]  ;;  %v8102_v52 = vld [vmem:[#allocation49_spill] sm:$0xff]  ;;  %v8116_v28 = vld [vmem:[#allocation35_spill] sm:$0xff] }
 0x775   : > { %3799 = vmatprep.subr.mxu0 %v3754_v36  ;;  %3445 = vmatprep.subr.mxu1 %v3384_v30  ;;  %v3744_v59 = vsel %vm446_vm1, %v8103_v10, %v8102_v52  ;;  %v3738_v38 = vsel %vm446_vm1, %v8116_v28, %v7561_v60  ;;  %v4363_v60 = vld [vmem:[%s7879_s1 + $0xc0] sm:$0xff] }
 0x776   : > { %3800 = vmatpush1.msra.mxu0 %v3753_v32  ;;  %v3340_v46 = vpop.permute.xlu0 %3339  ;;  %3266 = vmatprep.mubr.f32.mxu0 %v7986_v2  ;;  %v3735_v32 = vsel %vm446_vm1, %v7645_v11, %v7565_v43  ;;  %v4379_v11 = vld [vmem:[%s7879_s1 + $0x100] sm:$0xff] }
 0x777   : > { %v3383_v14 = vsel %vm1015_vm2, %v3340_v46, %v3342_v58  ;;  %3801 = vmatprep.subr.mxu0 %v3752_v42  ;;  %v3737_v58 = vsel %vm446_vm1, %v7568_v37, %v8116_v28  ;;  %v3736_v37 = vsel %vm446_vm1, %v7565_v43, %v7590_v5  ;;  %v4364_v43 = vld [vmem:[%s7879_s1 + $0xc8] sm:$0xff] }
 0x778   : > { %3802 = vmatpush1.msra.mxu0 %v3751_v18  ;;  %3446 = vmatpush1.msra.mxu1 %v3383_v14  ;;  %v3702_v56 = vpop.permute.xlu1 %3701  ;;  %v4365_v14 = vld [vmem:[%s7879_s1 + $0xd0] sm:$0xff] }
 0x779   : > { %3803 = vmatprep.subr.mxu0 %v7493_v51  ;;  %3447 = vmatprep.subr.mxu1 %v3382_v44  ;;  %v8099_v51 = vld [vmem:[#allocation28_spill] sm:$0xff]  ;;  %v4366_v44 = vld [vmem:[%s7879_s1 + $0xd8] sm:$0xff] }
 0x77a   : > { %3804 = vmatpush1.msra.mxu0 %v7487_v17  ;;  %v3704_v25 = vpop.permute.xlu0 %3703  ;;  %3448 = vmatpush1.msra.mxu1 %v3381_v15  ;;  %v4368_v17 = vld [vmem:[%s7879_s1 + $0xe8] sm:$0xff]  ;;  %v4381_v15 = vld [vmem:[%s7879_s1 + $0x110] sm:$0xff] }
 0x77b   : > { %v3745_v7 = vsel %vm446_vm1, %v3702_v56, %v3704_v25  ;;  %3805 = vmatprep.subr.mxu0 %v3748_v39  ;;  %3449 = vmatprep.subr.mxu1 %v8096_v40  ;;  %v3746_v49 = vsel %vm446_vm1, %v3704_v25, %v8097_v57  ;;  %v4380_v56 = vld [vmem:[%s7879_s1 + $0x108] sm:$0xff]  ;;  %v4382_v25 = vld [vmem:[%s7879_s1 + $0x118] sm:$0xff] }
 0x77c   : > { %3806 = vmatpush1.msra.mxu0 %v8098_v47  ;;  %3450 = vmatpush1.msra.mxu1 %v8099_v51  ;;  %v3302_v0 = vpop.permute.xlu1 %3301 }
 0x77d   : > { %3807 = vmatprep.subr.mxu0 %v3746_v49  ;;  %3451 = vmatprep.subr.mxu1 %v8100_v23  ;;  %v3370_v21 = vsel %vm1015_vm2, %v7611_v53, %v3302_v0 }
 0x77e   : > { %3808 = vmatpush1.msra.mxu0 %v3745_v7  ;;  %v3668_v29 = vpop.permute.xlu0 %3667  ;;  %3452 = vmatpush1.msra.mxu1 %v8101_v61 }
 0x77f   : > { %3809 = vmatprep.subr.mxu0 %v3744_v59  ;;  %4372 = vmatmul.mubr.msk.f32.gmra.mxu0 %vm829_vm9, %v4368_v17 }
 0x780   : > { %3453 = vmatprep.subr.mxu1 %v3376_v34  ;;  %3810 = vmatpush1.msra.mxu0 %v3743_v8  ;;  %v3670_v12 = vpop.permute.xlu1 %3669 }
 0x781   : > { %3454 = vmatpush1.msra.mxu1 %v3375_v50  ;;  %3811 = vmatprep.subr.mxu0 %v8108_v13 }
 0x782   : > { %3455 = vmatprep.subr.mxu1 %v3374_v31  ;;  %3812 = vmatpush1.msra.mxu0 %v8111_v55  ;;  %v3298_v45 = vpop.permute.xlu0 %3297 }
 0x783   : > { %3272 = vmatprep.mubr.f32.mxu0 %v7986_v2  ;;  %3456 = vmatpush1.msra.mxu1 %v3373_v4  ;;  %v3369_v30 = vsel %vm1015_vm2, %v3298_v45, %v7611_v53  ;;  %v3734_v53 = vsel %vm446_vm1, %v3668_v29, %v3670_v12 }
 0x784   : > { %3813 = vmatprep.subr.mxu0 %v3740_v41  ;;  %4373 = vmatmul.mubr.msk.f32.gmra.mxu0 %vm829_vm9, %v4369_v24  ;;  %v3666_v63 = vpop.permute.xlu1 %3665 }
 0x785   : > { %3457 = vmatprep.subr.mxu1 %v3372_v16  ;;  %3814 = vmatpush1.msra.mxu0 %v8115_v35  ;;  %v3733_v18 = vsel %vm446_vm1, %v3666_v63, %v3668_v29 }
 0x786   : > { %3458 = vmatpush1.msra.mxu1 %v3371_v62  ;;  %3815 = vmatprep.subr.mxu0 %v3738_v38  ;;  %v3662_v20 = vpop.permute.xlu0 %3661 }
 0x787   : > { %3459 = vmatprep.subr.mxu1 %v3370_v21  ;;  %3816 = vmatpush1.msra.mxu0 %v3737_v58 }
 0x788   : > { %3278 = vmatprep.mubr.f32.mxu0 %v7986_v2  ;;  %3460 = vmatpush1.msra.mxu1 %v3369_v30  ;;  %v3664_v36 = vpop.permute.xlu1 %3663 }
 0x789   : > { %3817 = vmatprep.subr.mxu0 %v3736_v37  ;;  %4374 = vmatmul.mubr.msk.f32.gmra.mxu0 %vm829_vm9, %v4370_v22  ;;  %v3732_v42 = vsel %vm446_vm1, %v3662_v20, %v3664_v36 }
 0x78a   : > { %4375 = vmatmul.mubr.msk.f32.vlgmr.msra.gmra.mxu1 %vm829_vm9, %v4363_v60  ;;  %3818 = vmatpush1.msra.mxu0 %v3735_v32  ;;  %v3660_v46 = vpop.permute.xlu0 %3659 }
 0x78b   : > { %3819 = vmatprep.subr.mxu0 %v3734_v53  ;;  %v3731_v5 = vsel %vm446_vm1, %v3660_v46, %v3662_v20  ;;  %3499 = vmatprep.mubr.f32.mxu1 %v7986_v2 }
 0x78c   : > { %3820 = vmatpush1.msra.mxu0 %v3733_v18  ;;  %3855 = vmatprep.mubr.f32.mxu0 %v7986_v2 }
 0x78d   : > { %3821 = vmatprep.subr.mxu0 %v3732_v42  ;;  %4414 = vmatprep.subr.mxu1 %v7986_v2 }
 0x78e   : > { %4376 = vmatmul.mubr.msk.f32.gmra.mxu1 %vm829_vm9, %v4364_v43  ;;  %3822 = vmatpush1.msra.mxu0 %v3731_v5 }
 0x78f   : > { %4383 = vmatmul.mubr.msk.f32.vlgmr.msra.gmra.mxu0 %vm829_vm9, %v4379_v11  ;;  %3505 = vmatprep.mubr.f32.mxu1 %v7986_v2 }
 0x790   : > { %3861 = vmatprep.mubr.f32.mxu0 %v7986_v2 }
 0x792   : > { %4377 = vmatmul.mubr.msk.f32.gmra.mxu1 %vm829_vm9, %v4365_v14 }
 0x793   : > { %4384 = vmatmul.mubr.msk.f32.gmra.mxu0 %vm829_vm9, %v4380_v56  ;;  %3511 = vmatprep.mubr.f32.mxu1 %v7986_v2 }
 0x794   : > { %3867 = vmatprep.mubr.f32.mxu0 %v7986_v2 }
 0x795   : > { %v3911_v51 = vpop.permute.xlu1 %3910 }
 0x796   : > { %4378 = vmatmul.mubr.msk.f32.gmra.mxu1 %vm829_vm9, %v4366_v44 }
 0x797   : > { %4385 = vmatmul.mubr.msk.f32.gmra.mxu0 %vm829_vm9, %v4381_v15  ;;  %v3906_v61 = vpop.permute.xlu0 %3905  ;;  %4422 = vmatprep.mubr.msk.f32.mxu1 %vm4502_vm7, %v7986_v2 }
 0x798   : > { %3873 = vmatprep.mubr.f32.mxu0 %v7986_v2 }
 0x799   : > { %v3952_v10 = vpop.permute.xlu1 %3951 }
 0x79b   : > { %4386 = vmatmul.mubr.msk.f32.gmra.mxu0 %vm829_vm9, %v4382_v25  ;;  %v3901_v19 = vpop.permute.xlu0 %3900 }
 0x79d   : > { %v3947_v13 = vpop.permute.xlu1 %3946 }
 0x79f   : > { %v3896_v38 = vpop.permute.xlu0 %3895 }
 0x7a1   : > { %v3942_v22 = vpop.permute.xlu1 %3941 }
 0x7a3   : > { %v3937_v25 = vpop.permute.xlu0 %3936 }
 0x834   : > { %v3262_v54 = vpop.f32.mrf.mxu0 }
 0x836   : > { %v3264_v39 = vpop.f32.mrf.mxu0 }
 0x83f   : > { %v3268_v7 = vpop.f32.mrf.mxu0 }
 0x841   : > { %v3270_v40 = vpop.f32.mrf.mxu0 }
 0x844   : > { %v3274_v57 = vpop.f32.mrf.mxu0 }
 0x846   : > { %v3276_v49 = vpop.f32.mrf.mxu0 }
 0x849   : > { %v3280_v47 = vpop.f32.mrf.mxu0 }
 0x84a   : > { %v3495_v0 = vpop.f32.mrf.mxu1 }
 0x84b   : > { %v3282_v23 = vpop.f32.mrf.mxu0  ;;  %v3496_v27 = vadd.f32 %v3495_v0, %v3262_v54 }
 0x84c   : > { %v3497_v17 = vpop.f32.mrf.mxu1 }
 0x84d   : > { %v3498_v24 = vadd.f32 %v3497_v17, %v3264_v39 }
 0x84e   : > { %v3501_v29 = vpop.f32.mrf.mxu1 }
 0x84f   : > { %v3857_v52 = vpop.f32.mrf.mxu0  ;;  %v3502_v50 = vadd.f32 %v3501_v29, %v3268_v7 }
 0x850   : > { %v3503_v59 = vpop.f32.mrf.mxu1  ;;  %v3880_v58 = vadd.f32 %v3857_v52, %v3496_v27 }
 0x851   : > { %v3859_v33 = vpop.f32.mrf.mxu0  ;;  %v3504_v3 = vadd.f32 %v3503_v59, %v3270_v40 }
 0x852   : > { %v3507_v8 = vpop.f32.mrf.mxu1  ;;  %v3881_v41 = vadd.f32 %v3859_v33, %v3498_v24  ;;  %v3913_v43 = vadd.f32 %v3896_v38, %v3880_v58 }
 0x853   : > { %v3863_v1 = vpop.f32.mrf.mxu0  ;;  %v3508_v6 = vadd.f32 %v3507_v8, %v3274_v57 }
 0x854   : > { %v3509_v34 = vpop.f32.mrf.mxu1  ;;  %v3882_v4 = vadd.f32 %v3863_v1, %v3502_v50  ;;  %v3914_v32 = vadd.f32 %v3896_v38, %v3881_v41  ;;  %v3954_v57 = vmul.f32 %v3937_v25, %v3913_v43  ;;  %vm3921_vm4 = vcmp.ge.f32.partialorder %v3913_v43, 0.0  ;;  %v4066_v50 = vld [vmem:[%s7886_s8] sm:$0xff]  ;;  %v4072_v38 = vld [vmem:[%s7887_s9 + $0x10] sm:$0xff] }
 0x855   : > { %v3865_v12 = vpop.f32.mrf.mxu0  ;;  %v3510_v45 = vadd.f32 %v3509_v34, %v3276_v49  ;;  %v4070_v41 = vld [vmem:[%s7887_s9] sm:$0xff] }
 0x856   : > { %v3513_v48 = vpop.f32.mrf.mxu1  ;;  %v3883_v31 = vadd.f32 %v3865_v12, %v3504_v3  ;;  %v3915_v21 = vadd.f32 %v3901_v19, %v3882_v4  ;;  %v3955_v39 = vmul.f32 %v3937_v25, %v3914_v32  ;;  %vm3922_vm3 = vcmp.ge.f32.partialorder %v3914_v32, 0.0  ;;  %v3987_v12 = vld [vmem:[%s7884_s6] sm:$0xff]  ;;  %v4067_v4 = vld [vmem:[%s7886_s8 + $0x8] sm:$0xff] }
 0x857   : > { %v3869_v55 = vpop.f32.mrf.mxu0  ;;  %v3514_v62 = vadd.f32 %v3513_v48, %v3280_v47  ;;  %v7799_v29 = vsel %vm3921_vm4, %v3913_v43, %v3954_v57 }
 0x858   : > { %v3884_v26 = vadd.f32 %v3869_v55, %v3508_v6  ;;  %v3916_v9 = vadd.f32 %v3901_v19, %v3883_v31  ;;  %v3515_v16 = vpop.f32.mrf.mxu1  ;;  %v3956_v11 = vmul.f32 %v3942_v22, %v3915_v21  ;;  %vm3923_vm5 = vcmp.ge.f32.partialorder %v3915_v21, 0.0  ;;  %v3986_v19 = vld [vmem:[%s7883_s5] sm:$0xff]  ;;  %v4068_v55 = vld [vmem:[%s7886_s8 + $0x10] sm:$0xff] }
 0x859   : > { %v3871_v63 = vpop.f32.mrf.mxu0  ;;  %v3516_v30 = vadd.f32 %v3515_v16, %v3282_v23  ;;  %v7797_v23 = vsel %vm3922_vm3, %v3914_v32, %v3955_v39  ;;  %v4063_v6 = vld [vmem:[%s7885_s7] sm:$0xff] }
 0x85a   : > { %v3917_v35 = vadd.f32 %v3906_v61, %v3884_v26  ;;  %v3885_v28 = vadd.f32 %v3871_v63, %v3510_v45  ;;  %v3957_v53 = vmul.f32 %v3942_v22, %v3916_v9  ;;  %vm3924_vm2 = vcmp.ge.f32.partialorder %v3916_v9, 0.0  ;;  %v4069_v45 = vld [vmem:[%s7886_s8 + $0x18] sm:$0xff]  ;;  %v4071_v26 = vld [vmem:[%s7887_s9 + $0x8] sm:$0xff] }
 0x85b   : > { %v3875_v20 = vpop.f32.mrf.mxu0  ;;  %v4073_v63 = vld [vmem:[%s7887_s9 + $0x18] sm:$0xff] }
 0x85c   : > { %v3958_v60 = vmul.f32 %v3947_v13, %v3917_v35  ;;  %v3918_v37 = vadd.f32 %v3906_v61, %v3885_v28  ;;  %v3886_v36 = vadd.f32 %v3875_v20, %v3514_v62  ;;  %vm3925_vm0 = vcmp.ge.f32.partialorder %v3917_v35, 0.0 }
 0x85d   : > { %v3877_v46 = vpop.f32.mrf.mxu0  ;;  %v7785_v40 = vsel %vm3924_vm2, %v3916_v9, %v3957_v53  ;;  %v3970_v61 = vadd.f32 %v7797_v23, %v7799_v29 }
 0x85e   : > { %vm3926_vm1 = vcmp.ge.f32.partialorder %v3918_v37, 0.0  ;;  %v3959_v42 = vmul.f32 %v3947_v13, %v3918_v37  ;;  %v3919_v18 = vadd.f32 %v3911_v51, %v3886_v36  ;;  %v3887_v5 = vadd.f32 %v3877_v46, %v3516_v30 }
 0x85f   : > { %v7779_v44 = vsel %vm3925_vm0, %v3917_v35, %v3958_v60 }
 0x860   : > { %v3960_v14 = vmul.f32 %v3952_v10, %v3919_v18  ;;  %v3920_v56 = vadd.f32 %v3911_v51, %v3887_v5  ;;  %v7781_v15 = vsel %vm3926_vm1, %v3918_v37, %v3959_v42  ;;  %vm3927_vm6 = vcmp.ge.f32.partialorder %v3919_v18, 0.0 }
 0x861   : > { %v3976_v54 = vadd.f32 %v7781_v15, %v7779_v44  ;;  %v7791_v51 = vsel %vm3923_vm5, %v3915_v21, %v3956_v11 }
 0x862   : > { %vm3928_vm9 = vcmp.ge.f32.partialorder %v3920_v56, 0.0  ;;  %v3961_v7 = vmul.f32 %v3952_v10, %v3920_v56  ;;  %v7787_v49 = vsel %vm3927_vm6, %v3919_v18, %v3960_v14  ;;  %v3973_v17 = vadd.f32 %v7785_v40, %v7791_v51 }
 0x863   : > { %3977 = vadd.xlane.f32.xlu0 %v3976_v54 }
 0x864   : > { %v7789_v47 = vsel %vm3928_vm9, %v3920_v56, %v3961_v7 }
 0x865   : > { %v3979_v0 = vadd.f32 %v7789_v47, %v7787_v49 }
 0x867   : > { %3980 = vadd.xlane.f32.xlu1 %v3979_v0  ;;  %3974 = vadd.xlane.f32.xlu0 %v3973_v17 }
 0x86b   : > { %3971 = vadd.xlane.f32.xlu1 %v3970_v61 }
 0x8ec   : > { %v3978_v52 = vpop.xlane.xlu0 %3977 }
 0x8ed   : > { %v3984_v8 = vmul.f32 0.00390625, %v3978_v52  ;;  %v4475_v52 = vld [vmem:[%s4609_s12 + $0x10] sm:$0xff] }
 0x8f0   : > { %v3981_v10 = vpop.xlane.xlu1 %3980  ;;  %v3975_v33 = vpop.xlane.xlu0 %3974 }
 0x8f1   : > { %v3985_v59 = vmul.f32 0.00390625, %v3981_v10  ;;  %v3983_v3 = vmul.f32 0.00390625, %v3975_v33 }
 0x8f3   : > { %4415 = vmatpush3.msra.mxu1 %v3985_v59  ;;  %v4476_v59 = vld [vmem:[%s4609_s12 + $0x18] sm:$0xff] }
 0x8f4   : > { %4416 = vmatprep.subr.mxu1 %v7986_v2  ;;  %v3972_v1 = vpop.xlane.xlu1 %3971 }
 0x8f5   : > { %4417 = vmatpush3.msra.mxu1 %v3984_v8  ;;  %v3982_v34 = vmul.f32 0.00390625, %v3972_v1 }
 0x8f6   : > { %4418 = vmatprep.subr.mxu1 %v7986_v2 }
 0x8f7   : > { %4419 = vmatpush3.msra.mxu1 %v3983_v3  ;;  %v4478_v3 = vld [vmem:[%s4609_s12 + $0x8] sm:$0xff] }
 0x8f8   : > { %4420 = vmatprep.subr.mxu1 %v7986_v2 }
 0x8f9   : > { %4421 = vmatpush3.msra.mxu1 %v3982_v34 }
 0x8fa   : > { %4423 = vmatmul.mubr.msk.f32.vlgmr.msra.gmra.mxu1 %vm3988_vm8, %v3986_v19 }
 0x8fb   : > { %4427 = vmatprep.mubr.msk.f32.mxu1 %vm4074_vm10, %v4066_v50 }
 0x9ba   : > { %v4058_v13 = vpop.f32.mrf.mxu1 }
 0x9bb   : > { %v4059_v48 = vadd.f32 %v4058_v13, %v3987_v12 }
 0x9bc   : > { %v4424_v2 = vpop.f32.mrf.mxu1 }
 0x9bd   : > { %v4064_v31 = vmul.f32 %v4063_v6, %v4059_v48  ;;  %vm4062_vm11 = vcmp.ge.f32.partialorder %v4059_v48, 0.0  ;;  %v4479_v6 = vld [vmem:[%s4609_s12 + $0x20] sm:$0xff]  ;;  %v4480_v2 = vld [vmem:[%s4609_s12 + $0x28] sm:$0xff] }
 0x9bf   : > { %v4065_v24 = vsel %vm4062_vm11, %v4059_v48, %v4064_v31 }
 0x9c0   : > { %4425 = vmatprep.subr.mxu1 %v4065_v24 }
 0x9c1   : > { %4426 = vmatpush3.msra.mxu1 %v4065_v24  ;;  %v4481_v24 = vld [vmem:[%s4609_s12 + $0x30] sm:$0xff] }
 0x9c2   : > { %4428 = vmatmul.mubr.msk.f32.vlgmr.msra.gmra.mxu1 %vm4074_vm10, %v4067_v4 }
 0x9c3   : > { %4430 = vmatprep.mubr.msk.f32.mxu1 %vm4074_vm10, %v4068_v55  ;;  %v4482_v55 = vld [vmem:[%s4609_s12 + $0x38] sm:$0xff] }
 0x9c6   : > { %4431 = vmatmul.mubr.msk.f32.gmra.mxu1 %vm4074_vm10, %v4069_v45 }
 0xa82   : > { %v4429_v27 = vpop.f32.mrf.mxu1 }
 0xa83   : > { %v4159_v9 = vadd.f32 %v4429_v27, %v4071_v26 }
 0xa84   : > { %v4153_v16 = vpop.f32.mrf.mxu1 }
 0xa85   : > { %v4173_v62 = vsub.f32 0.0, %v4159_v9  ;;  %v4154_v35 = vadd.f32 %v4153_v16, %v4070_v41 }
 0xa86   : > { %v4432_v28 = vpop.f32.mrf.mxu1 }
 0xa87   : > { %v4178_v58 = vmul.f32 1.442695, %v4173_v62  ;;  %v4172_v21 = vsub.f32 0.0, %v4154_v35  ;;  %v4169_v20 = vadd.f32 %v4432_v28, %v4073_v63 }
 0xa88   : > { %v4163_v22 = vpop.f32.mrf.mxu1 }
 0xa89   : > { %4455 = vpow2.f32 %v4178_v58  ;;  %v4176_v30 = vmul.f32 1.442695, %v4172_v21  ;;  %v4175_v60 = vsub.f32 0.0, %v4169_v20  ;;  %v4164_v37 = vadd.f32 %v4163_v22, %v4072_v38 }
 0xa8b   : > { %4457 = vpow2.f32 %v4176_v30  ;;  %v4182_v36 = vmul.f32 1.442695, %v4175_v60  ;;  %v4174_v32 = vsub.f32 0.0, %v4164_v37 }
 0xa8d   : > { %4459 = vpow2.f32 %v4182_v36  ;;  %v4180_v53 = vmul.f32 1.442695, %v4174_v32 }
 0xa8f   : > { %4461 = vpow2.f32 %v4180_v53 }
 0xa96   : > { %v4456_v46 = vpop.eup %4455 }
 0xa97   : > { %v4185_v42 = vadd.f32 1.0, %v4456_v46 }
 0xa98   : > { %v4458_v18 = vpop.eup %4457 }
 0xa99   : > { %4463 = vrcp.f32 %v4185_v42  ;;  %v4184_v5 = vadd.f32 1.0, %v4458_v18 }
 0xa9a   : > { %v4460_v43 = vpop.eup %4459 }
 0xa9b   : > { %4465 = vrcp.f32 %v4184_v5  ;;  %v4187_v11 = vadd.f32 1.0, %v4460_v43 }
 0xa9c   : > { %v4462_v14 = vpop.eup %4461 }
 0xa9d   : > { %v4186_v56 = vadd.f32 1.0, %v4462_v14  ;;  %4467 = vrcp.f32 %v4187_v11 }
 0xa9f   : > { %4469 = vrcp.f32 %v4186_v56 }
 0xaa6   : > { %v4464_v25 = vpop.eup %4463 }
 0xaa7   : > { %4203 = vperm.xlu1 %4454, %v4464_v25  }
 0xaa8   : > { %v4466_v54 = vpop.eup %4465 }
 0xaa9   : > { %4198 = vperm.xlu0 %4453, %v4466_v54  }
 0xaaa   : > { %v4468_v39 = vpop.eup %4467 }
 0xaac   : > { %v4470_v7 = vpop.eup %4469 }
 0xaad   : > { %4208 = vperm.xlu1 %4454, %v4470_v7   ;;  %4213 = vperm.xlu0 %4453, %v4468_v39  }
 0xb22   : > { %v4204_v57 = vpop.permute.xlu1 %4203 }
 0xb23   : > { %v4218_v0 = vmul.f32 %v4204_v57, %v7791_v51  ;;  %v4219_v17 = vmul.f32 %v4204_v57, %v7785_v40  ;;  %v4477_v51 = vld [vmem:[%s4609_s12] sm:$0xff] }
 0xb24   : > { %v4199_v61 = vpop.permute.xlu0 %4198 }
 0xb25   : > { %v4226_v10 = vadd.f32 %v4475_v52, %v4218_v0  ;;  %v4227_v33 = vadd.f32 %v4476_v59, %v4219_v17  ;;  %v4216_v8 = vmul.f32 %v4199_v61, %v7799_v29  ;;  %v4217_v40 = vmul.f32 %v4199_v61, %v7797_v23 }
 0xb27   : > { %4234 = vst [vmem:[%s7851_s19 + $0x10] sm:$0xff] %v4226_v10  ;;  %4235 = vst [vmem:[%s7851_s19 + $0x18] sm:$0xff] %v4227_v33  ;;  %v4224_v1 = vadd.f32 %v4477_v51, %v4216_v8  ;;  %v4225_v34 = vadd.f32 %v4478_v3, %v4217_v40 }
 0xb28   : > { %v4209_v19 = vpop.permute.xlu1 %4208  ;;  %v4214_v50 = vpop.permute.xlu0 %4213 }
 0xb29   : > { %4232 = vst [vmem:[%s7851_s19] sm:$0xff] %v4224_v1  ;;  %4233 = vst [vmem:[%s7851_s19 + $0x8] sm:$0xff] %v4225_v34  ;;  %v4220_v29 = vmul.f32 %v4209_v19, %v7779_v44  ;;  %v4221_v23 = vmul.f32 %v4209_v19, %v7781_v15  ;;  %v4222_v12 = vmul.f32 %v4214_v50, %v7787_v49 }
 0xb2a   : > { %v4223_v13 = vmul.f32 %v4214_v50, %v7789_v47 }
 0xb2b   : > { %v4228_v48 = vadd.f32 %v4479_v6, %v4220_v29  ;;  %v4229_v31 = vadd.f32 %v4480_v2, %v4221_v23  ;;  %v4230_v4 = vadd.f32 %v4481_v24, %v4222_v12 }
 0xb2c   : > { %v4231_v45 = vadd.f32 %v4482_v55, %v4223_v13 }
 0xb2d   : > { %4236 = vst [vmem:[%s7851_s19 + $0x20] sm:$0xff] %v4228_v48  ;;  %4237 = vst [vmem:[%s7851_s19 + $0x28] sm:$0xff] %v4229_v31 }
 0xb2e   : > { %4238 = vst [vmem:[%s7851_s19 + $0x30] sm:$0xff] %v4230_v4  ;;  %4239 = vst [vmem:[%s7851_s19 + $0x38] sm:$0xff] %v4231_v45 }
 0xb2f PF: > { %s20_s13 = sadd.s32 1, %s4489_s13  }
 0xb30   : > { %p17_p4 = scmp.ge.s32.totalorder %s20_s13, 4  }
 0xb32   :  { %19 = sbr.rel (!%p17_p4) target bundleno = 1 (0x1), region = 109 }

</bundles_post_ra>
